<compile_context>
chip_gen: v7x
topology: tpu7x:2x2x1
jax: 0.10.0
libtpu: 0.0.40
codegen_flags: <defaults>
</compile_context>

<pallas_src>
import functools

import jax
import jax.numpy as jnp
from jax import lax
from jax.experimental import pallas as pl
from jax.experimental.pallas import tpu as pltpu

C = 256          # channel count fixed by the module definition
EPS = 1e-5       # nn.InstanceNorm2d defaults: eps=1e-5, affine=False, biased var


def residual_block_kernel(x_ref, w1_ref, w2_ref, o_ref, hp_ref, *, bn, H, W):
    """One grid step processes `bn` images.

    x_ref : (bn, H, W, C)       f32  unpadded input block
    w*_ref: (3, 3*C, C)         bf16 weights, dy-stacked per dx
    o_ref : (bn, H, W, C)            output block
    hp_ref: (bn, H+2, W+2, C)   bf16 VMEM scratch (reflection-padded conv input)
    """
    HW = H * W
    M = bn * HW
    inv_hw = 1.0 / HW

    def reflect_pad(src):
        # src: (bn, H, W, C) bf16 -> hp_ref holds ReflectionPad2d(1)(src).
        hp_ref[:, 1:H + 1, 1:W + 1, :] = src
        hp_ref[:, 0:1, 1:W + 1, :] = src[:, 1:2, :, :]
        hp_ref[:, H + 1:H + 2, 1:W + 1, :] = src[:, H - 2:H - 1, :, :]
        hp_ref[:, :, 0:1, :] = hp_ref[:, :, 2:3, :]
        hp_ref[:, :, W + 1:W + 2, :] = hp_ref[:, :, W - 1:W, :]

    def conv3x3(w_ref):
        # 3x3 conv as 3 (M, 3C) @ (3C, C) MXU matmuls with f32 accumulation.
        # The dx (width) shift is materialized once per dx as a bf16 column
        # slab; the 3 dy shifts are free slices along the major H axis that
        # are stacked once so the dy accumulation happens inside the MXU.
        acc = jnp.zeros((M, C), jnp.float32)
        for dx in range(3):
            col = hp_ref[:, :, dx:dx + W, :]                     # (bn,H+2,W,C)
            patch = jnp.concatenate(
                [col[:, dy:dy + H] for dy in range(3)], axis=-1  # (bn,H,W,3C)
            ).reshape(M, 3 * C)
            acc = acc + jnp.dot(patch, w_ref[dx],
                                preferred_element_type=jnp.float32)
        return acc                                               # (M, C) f32

    def inst_norm(y_flat):
        # Per-image, per-channel normalization over spatial (biased variance),
        # fused into one sweep: sum and sum-of-squares together.
        y = y_flat.reshape(bn, HW, C)
        s = jnp.sum(y, axis=1, keepdims=True)
        ss = jnp.sum(y * y, axis=1, keepdims=True)
        mean = s * inv_hw
        var = jnp.maximum(ss * inv_hw - mean * mean, 0.0)
        return (y - mean) * lax.rsqrt(var + EPS)                 # (bn, HW, C)

    # ---- conv1 -> instance norm -> ReLU (bias cancelled by the norm) ----
    reflect_pad(x_ref[...].astype(jnp.bfloat16))
    h = jnp.maximum(inst_norm(conv3x3(w1_ref)), 0.0)             # (bn, HW, C)

    # ---- conv2 -> instance norm (reuse the same padded scratch) ----
    reflect_pad(h.reshape(bn, H, W, C).astype(jnp.bfloat16))
    h2 = inst_norm(conv3x3(w2_ref)).reshape(bn, H, W, C)

    # ---- residual add straight from the unpadded, aligned input block ----
    o_ref[...] = (x_ref[...] + h2).astype(o_ref.dtype)


def _stack_weights(w_hwio):
    # (ky, kx, Cin, Cout) -> (kx, ky*Cin, Cout): dy-major, then Cin, matching
    # the per-dx dy-stacked patch layout used in the kernel.
    return jnp.transpose(w_hwio, (1, 0, 2, 3)).reshape(3, 3 * C, C).astype(jnp.bfloat16)


def _pick_bn(N, H, W):
    # Target M = bn*H*W >= 512 (MXU row fill), but never let the parallel grid
    # collapse to 1 step (v7x has 2 TensorCores), and bn must divide N.
    bn_fill = -(-512 // (H * W))
    bn_cap = max(1, N // 2)
    bn = max(1, min(N, bn_fill, bn_cap))
    while N % bn:
        bn -= 1
    return bn


def _vmem_limit_bytes():
    # v5e/v6e have 128 MiB physical VMEM -> ~100 MiB limit; v7x has 64 MiB
    # -> 48 MiB. Leave headroom for Mosaic-internal scratch.
    try:
        cap = pltpu.get_tpu_info().vmem_capacity_bytes
    except Exception:
        cap = 64 << 20
    return int(min(cap - (16 << 20), 100 << 20))


def residual_block_nhwc(x, w1_hwio, b1, w2_hwio, b2):
    """x: (N, H, W, 256) f32; w*_hwio: (3, 3, 256, 256) HWIO; b*: (256,).

    b1/b2 are accepted for interface fidelity but are mathematically cancelled
    by the affine=False InstanceNorm that follows each conv, so they are not
    passed into the kernel."""
    del b1, b2
    N, H, W, Cin = x.shape
    assert Cin == C and H >= 2 and W >= 2

    w1s = _stack_weights(w1_hwio)
    w2s = _stack_weights(w2_hwio)
    bn = _pick_bn(N, H, W)

    kernel = functools.partial(residual_block_kernel, bn=bn, H=H, W=W)
    return pl.pallas_call(
        kernel,
        out_shape=jax.ShapeDtypeStruct((N, H, W, C), x.dtype),
        grid_spec=pltpu.PrefetchScalarGridSpec(
            num_scalar_prefetch=0,
            grid=(N // bn,),
            in_specs=[
                pl.BlockSpec((bn, H, W, C), lambda n: (n, 0, 0, 0)),
                # Grid-invariant weights: single-buffered to save VMEM.
                pl.BlockSpec((3, 3 * C, C), lambda n: (0, 0, 0),
                             pipeline_mode=pl.Buffered(1)),
                pl.BlockSpec((3, 3 * C, C), lambda n: (0, 0, 0),
                             pipeline_mode=pl.Buffered(1)),
            ],
            out_specs=pl.BlockSpec((bn, H, W, C), lambda n: (n, 0, 0, 0)),
            scratch_shapes=[pltpu.VMEM((bn, H + 2, W + 2, C), jnp.bfloat16)],
        ),
        compiler_params=pltpu.CompilerParams(
            dimension_semantics=("parallel",),
            vmem_limit_bytes=_vmem_limit_bytes(),
        ),
    )(x, w1s, w2s)


def residual_block_nchw(x_nchw, w1, b1, w2, b2):
    """PyTorch-layout wrapper. x: (N, 256, H, W); w*: (256, 256, 3, 3) OIHW.

    If the surrounding model runs NHWC, call residual_block_nhwc directly and
    skip these boundary transposes (they are separate HBM-bound XLA ops)."""
    x = jnp.transpose(x_nchw, (0, 2, 3, 1))          # NCHW -> NHWC
    w1_hwio = jnp.transpose(w1, (2, 3, 1, 0))        # OIHW -> HWIO
    w2_hwio = jnp.transpose(w2, (2, 3, 1, 0))
    out = residual_block_nhwc(x, w1_hwio, b1, w2_hwio, b2)
    return jnp.transpose(out, (0, 3, 1, 2))          # back to NCHW


def _reference_nchw(x_nchw, w1, b1, w2, b2, conv_dtype=jnp.float32):
    # Pure-JAX reference matching the PyTorch module (biases included). With
    # conv_dtype=bf16 the convolution inputs are rounded the same way the
    # kernel rounds them (accumulation stays f32), giving a tight comparison.
    def conv(y, w, b):
        y32 = y.astype(conv_dtype).astype(jnp.float32)
        w32 = w.astype(conv_dtype).astype(jnp.float32)
        yp = jnp.pad(y32, ((0, 0), (0, 0), (1, 1), (1, 1)), mode="reflect")
        out = lax.conv_general_dilated(
            yp, w32, window_strides=(1, 1), padding="VALID",
            dimension_numbers=("NCHW", "OIHW", "NCHW"))
        return out + b[None, :, None, None]

    def inorm(y):
        m = jnp.mean(y, axis=(2, 3), keepdims=True)
        v = jnp.mean(jnp.square(y - m), axis=(2, 3), keepdims=True)
        return (y - m) / jnp.sqrt(v + EPS)

    h = jnp.maximum(inorm(conv(x_nchw, w1, b1)), 0.0)
    h = inorm(conv(h, w2, b2))
    return x_nchw + h


if __name__ == "__main__":
    key = jax.random.PRNGKey(0)
    k_x, k_w1, k_b1, k_w2, k_b2 = jax.random.split(key, 5)

    N, H, W = 2, 8, 8                       # small spatial; C=256 fixed by module
    x = jax.random.normal(k_x, (N, C, H, W), jnp.float32)
    w1 = jax.random.normal(k_w1, (C, C, 3, 3), jnp.float32) * 0.02
    b1 = jax.random.normal(k_b1, (C,), jnp.float32) * 0.1
    w2 = jax.random.normal(k_w2, (C, C, 3, 3), jnp.float32) * 0.02
    b2 = jax.random.normal(k_b2, (C,), jnp.float32) * 0.1

    out = jax.block_until_ready(residual_block_nchw(x, w1, b1, w2, b2))
    assert out.shape == (N, C, H, W)

    # Tight check vs. a reference that rounds the conv inputs to bf16 like the
    # kernel does (accumulation in f32 in both; kernel uses fused-pass variance
    # and drops the norm-cancelled biases, both bounded well below tolerance).
    ref_bf16 = _reference_nchw(x, w1, b1, w2, b2, conv_dtype=jnp.bfloat16)
    err_tight = float(jnp.max(jnp.abs(out - ref_bf16)))
    assert err_tight < 5e-3, f"tight check failed: {err_tight}"

    # Loose check vs. the exact f32 PyTorch-semantics reference (bf16 MXU
    # inputs introduce a small, bounded deviation).
    ref_f32 = _reference_nchw(x, w1, b1, w2, b2)
    err_full = float(jnp.max(jnp.abs(out - ref_f32)))
    assert err_full < 5e-2, f"f32 check failed: {err_full}"

    print("KERNEL_OK")
</pallas_src>

<mosaic_0001>
module attributes {stable_mosaic.version = 11 : i64} {
  func.func @residual_block_kernel(%arg0: i32, %arg1: memref<1x8x8x256xf32, #tpu.memory_space<vmem>>, %arg2: memref<3x768x256xbf16, #tpu.memory_space<vmem>>, %arg3: memref<3x768x256xbf16, #tpu.memory_space<vmem>>, %arg4: memref<1x8x8x256xf32, #tpu.memory_space<vmem>>, %arg5: memref<1x10x10x256xbf16, #tpu.memory_space<vmem>>) attributes {dimension_semantics = [#tpu.dimension_semantics<parallel>], iteration_bounds = array<i64: 2>, scalar_prefetch = 0 : i64, scratch_operands = 1 : i64, tpu.core_type = #tpu.core_type<tc>, window_params = [{transform_indices = @transform_0, window_bounds = array<i64: 1, 8, 8, 256>}, {pipeline_mode = #tpu.pipeline_mode<synchronous>, transform_indices = @transform_1, window_bounds = array<i64: 3, 768, 256>}, {pipeline_mode = #tpu.pipeline_mode<synchronous>, transform_indices = @transform_2, window_bounds = array<i64: 3, 768, 256>}, {transform_indices = @transform_3, window_bounds = array<i64: 1, 8, 8, 256>}]} {
    %c0 = arith.constant 0 : index
    %c0_0 = arith.constant 0 : index
    %c0_1 = arith.constant 0 : index
    %c0_2 = arith.constant 0 : index
    %0 = vector.load %arg1[%c0, %c0_0, %c0_1, %c0_2] : memref<1x8x8x256xf32, #tpu.memory_space<vmem>>, vector<1x8x8x256xf32>
    %1 = arith.truncf %0 : vector<1x8x8x256xf32> to vector<1x8x8x256xbf16>
    %c0_3 = arith.constant 0 : index
    %c1 = arith.constant 1 : index
    %c1_4 = arith.constant 1 : index
    %c0_5 = arith.constant 0 : index
    %2 = vector.load %arg5[%c0_3, %c1, %c1_4, %c0_5] : memref<1x10x10x256xbf16, #tpu.memory_space<vmem>>, vector<1x8x8x256xbf16>
    tpu.vector_store %arg5[%c0_3, %c1, %c1_4, %c0_5], %1 {strides = array<i32>} : memref<1x10x10x256xbf16, #tpu.memory_space<vmem>>, vector<1x8x8x256xbf16>,
    %3 = vector.extract_strided_slice %1 {offsets = [0, 1, 0, 0], sizes = [1, 1, 8, 256], strides = [1, 1, 1, 1]} : vector<1x8x8x256xbf16> to vector<1x1x8x256xbf16>
    %c0_6 = arith.constant 0 : index
    %c0_7 = arith.constant 0 : index
    %c1_8 = arith.constant 1 : index
    %c0_9 = arith.constant 0 : index
    %4 = vector.load %arg5[%c0_6, %c0_7, %c1_8, %c0_9] : memref<1x10x10x256xbf16, #tpu.memory_space<vmem>>, vector<1x1x8x256xbf16>
    tpu.vector_store %arg5[%c0_6, %c0_7, %c1_8, %c0_9], %3 {strides = array<i32>} : memref<1x10x10x256xbf16, #tpu.memory_space<vmem>>, vector<1x1x8x256xbf16>,
    %5 = vector.extract_strided_slice %1 {offsets = [0, 6, 0, 0], sizes = [1, 1, 8, 256], strides = [1, 1, 1, 1]} : vector<1x8x8x256xbf16> to vector<1x1x8x256xbf16>
    %c0_10 = arith.constant 0 : index
    %c9 = arith.constant 9 : index
    %c1_11 = arith.constant 1 : index
    %c0_12 = arith.constant 0 : index
    %6 = vector.load %arg5[%c0_10, %c9, %c1_11, %c0_12] : memref<1x10x10x256xbf16, #tpu.memory_space<vmem>>, vector<1x1x8x256xbf16>
    tpu.vector_store %arg5[%c0_10, %c9, %c1_11, %c0_12], %5 {strides = array<i32>} : memref<1x10x10x256xbf16, #tpu.memory_space<vmem>>, vector<1x1x8x256xbf16>,
    %c0_13 = arith.constant 0 : index
    %c0_14 = arith.constant 0 : index
    %c2 = arith.constant 2 : index
    %c0_15 = arith.constant 0 : index
    %7 = vector.load %arg5[%c0_13, %c0_14, %c2, %c0_15] : memref<1x10x10x256xbf16, #tpu.memory_space<vmem>>, vector<1x10x1x256xbf16>
    %c0_16 = arith.constant 0 : index
    %c0_17 = arith.constant 0 : index
    %c0_18 = arith.constant 0 : index
    %c0_19 = arith.constant 0 : index
    %8 = vector.load %arg5[%c0_16, %c0_17, %c0_18, %c0_19] : memref<1x10x10x256xbf16, #tpu.memory_space<vmem>>, vector<1x10x1x256xbf16>
    tpu.vector_store %arg5[%c0_16, %c0_17, %c0_18, %c0_19], %7 {strides = array<i32>} : memref<1x10x10x256xbf16, #tpu.memory_space<vmem>>, vector<1x10x1x256xbf16>,
    %c0_20 = arith.constant 0 : index
    %c0_21 = arith.constant 0 : index
    %c7 = arith.constant 7 : index
    %c0_22 = arith.constant 0 : index
    %9 = vector.load %arg5[%c0_20, %c0_21, %c7, %c0_22] : memref<1x10x10x256xbf16, #tpu.memory_space<vmem>>, vector<1x10x1x256xbf16>
    %c0_23 = arith.constant 0 : index
    %c0_24 = arith.constant 0 : index
    %c9_25 = arith.constant 9 : index
    %c0_26 = arith.constant 0 : index
    %10 = vector.load %arg5[%c0_23, %c0_24, %c9_25, %c0_26] : memref<1x10x10x256xbf16, #tpu.memory_space<vmem>>, vector<1x10x1x256xbf16>
    tpu.vector_store %arg5[%c0_23, %c0_24, %c9_25, %c0_26], %9 {strides = array<i32>} : memref<1x10x10x256xbf16, #tpu.memory_space<vmem>>, vector<1x10x1x256xbf16>,
    %cst = arith.constant 0.000000e+00 : f32
    %11 = vector.broadcast %cst : f32 to vector<64x256xf32>
    %c0_27 = arith.constant 0 : index
    %c0_28 = arith.constant 0 : index
    %c0_29 = arith.constant 0 : index
    %c0_30 = arith.constant 0 : index
    %12 = vector.load %arg5[%c0_27, %c0_28, %c0_29, %c0_30] : memref<1x10x10x256xbf16, #tpu.memory_space<vmem>>, vector<1x10x8x256xbf16>
    %13 = vector.extract_strided_slice %12 {offsets = [0, 0, 0, 0], sizes = [1, 8, 8, 256], strides = [1, 1, 1, 1]} : vector<1x10x8x256xbf16> to vector<1x8x8x256xbf16>
    %14 = vector.extract_strided_slice %12 {offsets = [0, 1, 0, 0], sizes = [1, 8, 8, 256], strides = [1, 1, 1, 1]} : vector<1x10x8x256xbf16> to vector<1x8x8x256xbf16>
    %15 = vector.extract_strided_slice %12 {offsets = [0, 2, 0, 0], sizes = [1, 8, 8, 256], strides = [1, 1, 1, 1]} : vector<1x10x8x256xbf16> to vector<1x8x8x256xbf16>
    %16 = tpu.concatenate %13, %14, %15 in 3 : vector<1x8x8x256xbf16>, vector<1x8x8x256xbf16>, vector<1x8x8x256xbf16> -> vector<1x8x8x768xbf16>
    %17 = vector.shape_cast %16 : vector<1x8x8x768xbf16> to vector<64x768xbf16>
    %c0_31 = arith.constant 0 : index
    %c0_32 = arith.constant 0 : index
    %c0_33 = arith.constant 0 : index
    %18 = vector.load %arg2[%c0_31, %c0_32, %c0_33] : memref<3x768x256xbf16, #tpu.memory_space<vmem>>, vector<1x768x256xbf16>
    %19 = vector.shape_cast %18 : vector<1x768x256xbf16> to vector<768x256xbf16>
    %cst_34 = arith.constant dense<0.000000e+00> : vector<64x256xf32>
    %20 = tpu.matmul %17, %19, %cst_34 {dimension_numbers = #tpu.dot_dimension_numbers<[1], [0], [0], [1], [0, 0, 1, 1], [], []>} : vector<64x768xbf16>, vector<768x256xbf16>, vector<64x256xf32> -> vector<64x256xf32>
    %21 = arith.addf %11, %20 : vector<64x256xf32>
    %c0_35 = arith.constant 0 : index
    %c0_36 = arith.constant 0 : index
    %c1_37 = arith.constant 1 : index
    %c0_38 = arith.constant 0 : index
    %22 = vector.load %arg5[%c0_35, %c0_36, %c1_37, %c0_38] : memref<1x10x10x256xbf16, #tpu.memory_space<vmem>>, vector<1x10x8x256xbf16>
    %23 = vector.extract_strided_slice %22 {offsets = [0, 0, 0, 0], sizes = [1, 8, 8, 256], strides = [1, 1, 1, 1]} : vector<1x10x8x256xbf16> to vector<1x8x8x256xbf16>
    %24 = vector.extract_strided_slice %22 {offsets = [0, 1, 0, 0], sizes = [1, 8, 8, 256], strides = [1, 1, 1, 1]} : vector<1x10x8x256xbf16> to vector<1x8x8x256xbf16>
    %25 = vector.extract_strided_slice %22 {offsets = [0, 2, 0, 0], sizes = [1, 8, 8, 256], strides = [1, 1, 1, 1]} : vector<1x10x8x256xbf16> to vector<1x8x8x256xbf16>
    %26 = tpu.concatenate %23, %24, %25 in 3 : vector<1x8x8x256xbf16>, vector<1x8x8x256xbf16>, vector<1x8x8x256xbf16> -> vector<1x8x8x768xbf16>
    %27 = vector.shape_cast %26 : vector<1x8x8x768xbf16> to vector<64x768xbf16>
    %c1_39 = arith.constant 1 : index
    %c0_40 = arith.constant 0 : index
    %c0_41 = arith.constant 0 : index
    %28 = vector.load %arg2[%c1_39, %c0_40, %c0_41] : memref<3x768x256xbf16, #tpu.memory_space<vmem>>, vector<1x768x256xbf16>
    %29 = vector.shape_cast %28 : vector<1x768x256xbf16> to vector<768x256xbf16>
    %cst_42 = arith.constant dense<0.000000e+00> : vector<64x256xf32>
    %30 = tpu.matmul %27, %29, %cst_42 {dimension_numbers = #tpu.dot_dimension_numbers<[1], [0], [0], [1], [0, 0, 1, 1], [], []>} : vector<64x768xbf16>, vector<768x256xbf16>, vector<64x256xf32> -> vector<64x256xf32>
    %31 = arith.addf %21, %30 : vector<64x256xf32>
    %c0_43 = arith.constant 0 : index
    %c0_44 = arith.constant 0 : index
    %c2_45 = arith.constant 2 : index
    %c0_46 = arith.constant 0 : index
    %32 = vector.load %arg5[%c0_43, %c0_44, %c2_45, %c0_46] : memref<1x10x10x256xbf16, #tpu.memory_space<vmem>>, vector<1x10x8x256xbf16>
    %33 = vector.extract_strided_slice %32 {offsets = [0, 0, 0, 0], sizes = [1, 8, 8, 256], strides = [1, 1, 1, 1]} : vector<1x10x8x256xbf16> to vector<1x8x8x256xbf16>
    %34 = vector.extract_strided_slice %32 {offsets = [0, 1, 0, 0], sizes = [1, 8, 8, 256], strides = [1, 1, 1, 1]} : vector<1x10x8x256xbf16> to vector<1x8x8x256xbf16>
    %35 = vector.extract_strided_slice %32 {offsets = [0, 2, 0, 0], sizes = [1, 8, 8, 256], strides = [1, 1, 1, 1]} : vector<1x10x8x256xbf16> to vector<1x8x8x256xbf16>
    %36 = tpu.concatenate %33, %34, %35 in 3 : vector<1x8x8x256xbf16>, vector<1x8x8x256xbf16>, vector<1x8x8x256xbf16> -> vector<1x8x8x768xbf16>
    %37 = vector.shape_cast %36 : vector<1x8x8x768xbf16> to vector<64x768xbf16>
    %c2_47 = arith.constant 2 : index
    %c0_48 = arith.constant 0 : index
    %c0_49 = arith.constant 0 : index
    %38 = vector.load %arg2[%c2_47, %c0_48, %c0_49] : memref<3x768x256xbf16, #tpu.memory_space<vmem>>, vector<1x768x256xbf16>
    %39 = vector.shape_cast %38 : vector<1x768x256xbf16> to vector<768x256xbf16>
    %cst_50 = arith.constant dense<0.000000e+00> : vector<64x256xf32>
    %40 = tpu.matmul %37, %39, %cst_50 {dimension_numbers = #tpu.dot_dimension_numbers<[1], [0], [0], [1], [0, 0, 1, 1], [], []>} : vector<64x768xbf16>, vector<768x256xbf16>, vector<64x256xf32> -> vector<64x256xf32>
    %41 = arith.addf %31, %40 : vector<64x256xf32>
    %42 = vector.shape_cast %41 : vector<64x256xf32> to vector<1x64x256xf32>
    %cst_51 = arith.constant dense<0.000000e+00> : vector<1x256xf32>
    %43 = vector.multi_reduction <add>, %42, %cst_51 [1] : vector<1x64x256xf32> to vector<1x256xf32>
    %44 = vector.shape_cast %43 : vector<1x256xf32> to vector<1x1x256xf32>
    %45 = arith.mulf %42, %42 : vector<1x64x256xf32>
    %cst_52 = arith.constant dense<0.000000e+00> : vector<1x256xf32>
    %46 = vector.multi_reduction <add>, %45, %cst_52 [1] : vector<1x64x256xf32> to vector<1x256xf32>
    %47 = vector.shape_cast %46 : vector<1x256xf32> to vector<1x1x256xf32>
    %cst_53 = arith.constant 1.562500e-02 : f32
    %48 = vector.broadcast %cst_53 : f32 to vector<1x1x256xf32>
    %49 = arith.mulf %44, %48 : vector<1x1x256xf32>
    %cst_54 = arith.constant 1.562500e-02 : f32
    %50 = vector.broadcast %cst_54 : f32 to vector<1x1x256xf32>
    %51 = arith.mulf %47, %50 : vector<1x1x256xf32>
    %52 = arith.mulf %49, %49 : vector<1x1x256xf32>
    %53 = arith.subf %51, %52 : vector<1x1x256xf32>
    %cst_55 = arith.constant 0.000000e+00 : f32
    %54 = vector.broadcast %cst_55 : f32 to vector<1x1x256xf32>
    %55 = arith.maximumf %53, %54 : vector<1x1x256xf32>
    %56 = vector.broadcast %49 : vector<1x1x256xf32> to vector<1x64x256xf32>
    %57 = arith.subf %42, %56 : vector<1x64x256xf32>
    %cst_56 = arith.constant 9.99999974E-6 : f32
    %58 = vector.broadcast %cst_56 : f32 to vector<1x1x256xf32>
    %59 = arith.addf %55, %58 : vector<1x1x256xf32>
    %60 = math.rsqrt %59 : vector<1x1x256xf32>
    %61 = vector.broadcast %60 : vector<1x1x256xf32> to vector<1x64x256xf32>
    %62 = arith.mulf %57, %61 : vector<1x64x256xf32>
    %cst_57 = arith.constant 0.000000e+00 : f32
    %63 = vector.broadcast %cst_57 : f32 to vector<1x64x256xf32>
    %64 = arith.maximumf %62, %63 : vector<1x64x256xf32>
    %65 = vector.shape_cast %64 : vector<1x64x256xf32> to vector<1x8x8x256xf32>
    %66 = arith.truncf %65 : vector<1x8x8x256xf32> to vector<1x8x8x256xbf16>
    %c0_58 = arith.constant 0 : index
    %c1_59 = arith.constant 1 : index
    %c1_60 = arith.constant 1 : index
    %c0_61 = arith.constant 0 : index
    %67 = vector.load %arg5[%c0_58, %c1_59, %c1_60, %c0_61] : memref<1x10x10x256xbf16, #tpu.memory_space<vmem>>, vector<1x8x8x256xbf16>
    tpu.vector_store %arg5[%c0_58, %c1_59, %c1_60, %c0_61], %66 {strides = array<i32>} : memref<1x10x10x256xbf16, #tpu.memory_space<vmem>>, vector<1x8x8x256xbf16>,
    %68 = vector.extract_strided_slice %66 {offsets = [0, 1, 0, 0], sizes = [1, 1, 8, 256], strides = [1, 1, 1, 1]} : vector<1x8x8x256xbf16> to vector<1x1x8x256xbf16>
    %c0_62 = arith.constant 0 : index
    %c0_63 = arith.constant 0 : index
    %c1_64 = arith.constant 1 : index
    %c0_65 = arith.constant 0 : index
    %69 = vector.load %arg5[%c0_62, %c0_63, %c1_64, %c0_65] : memref<1x10x10x256xbf16, #tpu.memory_space<vmem>>, vector<1x1x8x256xbf16>
    tpu.vector_store %arg5[%c0_62, %c0_63, %c1_64, %c0_65], %68 {strides = array<i32>} : memref<1x10x10x256xbf16, #tpu.memory_space<vmem>>, vector<1x1x8x256xbf16>,
    %70 = vector.extract_strided_slice %66 {offsets = [0, 6, 0, 0], sizes = [1, 1, 8, 256], strides = [1, 1, 1, 1]} : vector<1x8x8x256xbf16> to vector<1x1x8x256xbf16>
    %c0_66 = arith.constant 0 : index
    %c9_67 = arith.constant 9 : index
    %c1_68 = arith.constant 1 : index
    %c0_69 = arith.constant 0 : index
    %71 = vector.load %arg5[%c0_66, %c9_67, %c1_68, %c0_69] : memref<1x10x10x256xbf16, #tpu.memory_space<vmem>>, vector<1x1x8x256xbf16>
    tpu.vector_store %arg5[%c0_66, %c9_67, %c1_68, %c0_69], %70 {strides = array<i32>} : memref<1x10x10x256xbf16, #tpu.memory_space<vmem>>, vector<1x1x8x256xbf16>,
    %c0_70 = arith.constant 0 : index
    %c0_71 = arith.constant 0 : index
    %c2_72 = arith.constant 2 : index
    %c0_73 = arith.constant 0 : index
    %72 = vector.load %arg5[%c0_70, %c0_71, %c2_72, %c0_73] : memref<1x10x10x256xbf16, #tpu.memory_space<vmem>>, vector<1x10x1x256xbf16>
    %c0_74 = arith.constant 0 : index
    %c0_75 = arith.constant 0 : index
    %c0_76 = arith.constant 0 : index
    %c0_77 = arith.constant 0 : index
    %73 = vector.load %arg5[%c0_74, %c0_75, %c0_76, %c0_77] : memref<1x10x10x256xbf16, #tpu.memory_space<vmem>>, vector<1x10x1x256xbf16>
    tpu.vector_store %arg5[%c0_74, %c0_75, %c0_76, %c0_77], %72 {strides = array<i32>} : memref<1x10x10x256xbf16, #tpu.memory_space<vmem>>, vector<1x10x1x256xbf16>,
    %c0_78 = arith.constant 0 : index
    %c0_79 = arith.constant 0 : index
    %c7_80 = arith.constant 7 : index
    %c0_81 = arith.constant 0 : index
    %74 = vector.load %arg5[%c0_78, %c0_79, %c7_80, %c0_81] : memref<1x10x10x256xbf16, #tpu.memory_space<vmem>>, vector<1x10x1x256xbf16>
    %c0_82 = arith.constant 0 : index
    %c0_83 = arith.constant 0 : index
    %c9_84 = arith.constant 9 : index
    %c0_85 = arith.constant 0 : index
    %75 = vector.load %arg5[%c0_82, %c0_83, %c9_84, %c0_85] : memref<1x10x10x256xbf16, #tpu.memory_space<vmem>>, vector<1x10x1x256xbf16>
    tpu.vector_store %arg5[%c0_82, %c0_83, %c9_84, %c0_85], %74 {strides = array<i32>} : memref<1x10x10x256xbf16, #tpu.memory_space<vmem>>, vector<1x10x1x256xbf16>,
    %cst_86 = arith.constant 0.000000e+00 : f32
    %76 = vector.broadcast %cst_86 : f32 to vector<64x256xf32>
    %c0_87 = arith.constant 0 : index
    %c0_88 = arith.constant 0 : index
    %c0_89 = arith.constant 0 : index
    %c0_90 = arith.constant 0 : index
    %77 = vector.load %arg5[%c0_87, %c0_88, %c0_89, %c0_90] : memref<1x10x10x256xbf16, #tpu.memory_space<vmem>>, vector<1x10x8x256xbf16>
    %78 = vector.extract_strided_slice %77 {offsets = [0, 0, 0, 0], sizes = [1, 8, 8, 256], strides = [1, 1, 1, 1]} : vector<1x10x8x256xbf16> to vector<1x8x8x256xbf16>
    %79 = vector.extract_strided_slice %77 {offsets = [0, 1, 0, 0], sizes = [1, 8, 8, 256], strides = [1, 1, 1, 1]} : vector<1x10x8x256xbf16> to vector<1x8x8x256xbf16>
    %80 = vector.extract_strided_slice %77 {offsets = [0, 2, 0, 0], sizes = [1, 8, 8, 256], strides = [1, 1, 1, 1]} : vector<1x10x8x256xbf16> to vector<1x8x8x256xbf16>
    %81 = tpu.concatenate %78, %79, %80 in 3 : vector<1x8x8x256xbf16>, vector<1x8x8x256xbf16>, vector<1x8x8x256xbf16> -> vector<1x8x8x768xbf16>
    %82 = vector.shape_cast %81 : vector<1x8x8x768xbf16> to vector<64x768xbf16>
    %c0_91 = arith.constant 0 : index
    %c0_92 = arith.constant 0 : index
    %c0_93 = arith.constant 0 : index
    %83 = vector.load %arg3[%c0_91, %c0_92, %c0_93] : memref<3x768x256xbf16, #tpu.memory_space<vmem>>, vector<1x768x256xbf16>
    %84 = vector.shape_cast %83 : vector<1x768x256xbf16> to vector<768x256xbf16>
    %cst_94 = arith.constant dense<0.000000e+00> : vector<64x256xf32>
    %85 = tpu.matmul %82, %84, %cst_94 {dimension_numbers = #tpu.dot_dimension_numbers<[1], [0], [0], [1], [0, 0, 1, 1], [], []>} : vector<64x768xbf16>, vector<768x256xbf16>, vector<64x256xf32> -> vector<64x256xf32>
    %86 = arith.addf %76, %85 : vector<64x256xf32>
    %c0_95 = arith.constant 0 : index
    %c0_96 = arith.constant 0 : index
    %c1_97 = arith.constant 1 : index
    %c0_98 = arith.constant 0 : index
    %87 = vector.load %arg5[%c0_95, %c0_96, %c1_97, %c0_98] : memref<1x10x10x256xbf16, #tpu.memory_space<vmem>>, vector<1x10x8x256xbf16>
    %88 = vector.extract_strided_slice %87 {offsets = [0, 0, 0, 0], sizes = [1, 8, 8, 256], strides = [1, 1, 1, 1]} : vector<1x10x8x256xbf16> to vector<1x8x8x256xbf16>
    %89 = vector.extract_strided_slice %87 {offsets = [0, 1, 0, 0], sizes = [1, 8, 8, 256], strides = [1, 1, 1, 1]} : vector<1x10x8x256xbf16> to vector<1x8x8x256xbf16>
    %90 = vector.extract_strided_slice %87 {offsets = [0, 2, 0, 0], sizes = [1, 8, 8, 256], strides = [1, 1, 1, 1]} : vector<1x10x8x256xbf16> to vector<1x8x8x256xbf16>
    %91 = tpu.concatenate %88, %89, %90 in 3 : vector<1x8x8x256xbf16>, vector<1x8x8x256xbf16>, vector<1x8x8x256xbf16> -> vector<1x8x8x768xbf16>
    %92 = vector.shape_cast %91 : vector<1x8x8x768xbf16> to vector<64x768xbf16>
    %c1_99 = arith.constant 1 : index
    %c0_100 = arith.constant 0 : index
    %c0_101 = arith.constant 0 : index
    %93 = vector.load %arg3[%c1_99, %c0_100, %c0_101] : memref<3x768x256xbf16, #tpu.memory_space<vmem>>, vector<1x768x256xbf16>
    %94 = vector.shape_cast %93 : vector<1x768x256xbf16> to vector<768x256xbf16>
    %cst_102 = arith.constant dense<0.000000e+00> : vector<64x256xf32>
    %95 = tpu.matmul %92, %94, %cst_102 {dimension_numbers = #tpu.dot_dimension_numbers<[1], [0], [0], [1], [0, 0, 1, 1], [], []>} : vector<64x768xbf16>, vector<768x256xbf16>, vector<64x256xf32> -> vector<64x256xf32>
    %96 = arith.addf %86, %95 : vector<64x256xf32>
    %c0_103 = arith.constant 0 : index
    %c0_104 = arith.constant 0 : index
    %c2_105 = arith.constant 2 : index
    %c0_106 = arith.constant 0 : index
    %97 = vector.load %arg5[%c0_103, %c0_104, %c2_105, %c0_106] : memref<1x10x10x256xbf16, #tpu.memory_space<vmem>>, vector<1x10x8x256xbf16>
    %98 = vector.extract_strided_slice %97 {offsets = [0, 0, 0, 0], sizes = [1, 8, 8, 256], strides = [1, 1, 1, 1]} : vector<1x10x8x256xbf16> to vector<1x8x8x256xbf16>
    %99 = vector.extract_strided_slice %97 {offsets = [0, 1, 0, 0], sizes = [1, 8, 8, 256], strides = [1, 1, 1, 1]} : vector<1x10x8x256xbf16> to vector<1x8x8x256xbf16>
    %100 = vector.extract_strided_slice %97 {offsets = [0, 2, 0, 0], sizes = [1, 8, 8, 256], strides = [1, 1, 1, 1]} : vector<1x10x8x256xbf16> to vector<1x8x8x256xbf16>
    %101 = tpu.concatenate %98, %99, %100 in 3 : vector<1x8x8x256xbf16>, vector<1x8x8x256xbf16>, vector<1x8x8x256xbf16> -> vector<1x8x8x768xbf16>
    %102 = vector.shape_cast %101 : vector<1x8x8x768xbf16> to vector<64x768xbf16>
    %c2_107 = arith.constant 2 : index
    %c0_108 = arith.constant 0 : index
    %c0_109 = arith.constant 0 : index
    %103 = vector.load %arg3[%c2_107, %c0_108, %c0_109] : memref<3x768x256xbf16, #tpu.memory_space<vmem>>, vector<1x768x256xbf16>
    %104 = vector.shape_cast %103 : vector<1x768x256xbf16> to vector<768x256xbf16>
    %cst_110 = arith.constant dense<0.000000e+00> : vector<64x256xf32>
    %105 = tpu.matmul %102, %104, %cst_110 {dimension_numbers = #tpu.dot_dimension_numbers<[1], [0], [0], [1], [0, 0, 1, 1], [], []>} : vector<64x768xbf16>, vector<768x256xbf16>, vector<64x256xf32> -> vector<64x256xf32>
    %106 = arith.addf %96, %105 : vector<64x256xf32>
    %107 = vector.shape_cast %106 : vector<64x256xf32> to vector<1x64x256xf32>
    %cst_111 = arith.constant dense<0.000000e+00> : vector<1x256xf32>
    %108 = vector.multi_reduction <add>, %107, %cst_111 [1] : vector<1x64x256xf32> to vector<1x256xf32>
    %109 = vector.shape_cast %108 : vector<1x256xf32> to vector<1x1x256xf32>
    %110 = arith.mulf %107, %107 : vector<1x64x256xf32>
    %cst_112 = arith.constant dense<0.000000e+00> : vector<1x256xf32>
    %111 = vector.multi_reduction <add>, %110, %cst_112 [1] : vector<1x64x256xf32> to vector<1x256xf32>
    %112 = vector.shape_cast %111 : vector<1x256xf32> to vector<1x1x256xf32>
    %cst_113 = arith.constant 1.562500e-02 : f32
    %113 = vector.broadcast %cst_113 : f32 to vector<1x1x256xf32>
    %114 = arith.mulf %109, %113 : vector<1x1x256xf32>
    %cst_114 = arith.constant 1.562500e-02 : f32
    %115 = vector.broadcast %cst_114 : f32 to vector<1x1x256xf32>
    %116 = arith.mulf %112, %115 : vector<1x1x256xf32>
    %117 = arith.mulf %114, %114 : vector<1x1x256xf32>
    %118 = arith.subf %116, %117 : vector<1x1x256xf32>
    %cst_115 = arith.constant 0.000000e+00 : f32
    %119 = vector.broadcast %cst_115 : f32 to vector<1x1x256xf32>
    %120 = arith.maximumf %118, %119 : vector<1x1x256xf32>
    %121 = vector.broadcast %114 : vector<1x1x256xf32> to vector<1x64x256xf32>
    %122 = arith.subf %107, %121 : vector<1x64x256xf32>
    %cst_116 = arith.constant 9.99999974E-6 : f32
    %123 = vector.broadcast %cst_116 : f32 to vector<1x1x256xf32>
    %124 = arith.addf %120, %123 : vector<1x1x256xf32>
    %125 = math.rsqrt %124 : vector<1x1x256xf32>
    %126 = vector.broadcast %125 : vector<1x1x256xf32> to vector<1x64x256xf32>
    %127 = arith.mulf %122, %126 : vector<1x64x256xf32>
    %128 = vector.shape_cast %127 : vector<1x64x256xf32> to vector<1x8x8x256xf32>
    %c0_117 = arith.constant 0 : index
    %c0_118 = arith.constant 0 : index
    %c0_119 = arith.constant 0 : index
    %c0_120 = arith.constant 0 : index
    %129 = vector.load %arg1[%c0_117, %c0_118, %c0_119, %c0_120] : memref<1x8x8x256xf32, #tpu.memory_space<vmem>>, vector<1x8x8x256xf32>
    %130 = arith.addf %129, %128 : vector<1x8x8x256xf32>
    %c0_121 = arith.constant 0 : index
    %c0_122 = arith.constant 0 : index
    %c0_123 = arith.constant 0 : index
    %c0_124 = arith.constant 0 : index
    %131 = vector.load %arg4[%c0_121, %c0_122, %c0_123, %c0_124] : memref<1x8x8x256xf32, #tpu.memory_space<vmem>>, vector<1x8x8x256xf32>
    tpu.vector_store %arg4[%c0_121, %c0_122, %c0_123, %c0_124], %130 {strides = array<i32>} : memref<1x8x8x256xf32, #tpu.memory_space<vmem>>, vector<1x8x8x256xf32>,
    return
  }
  func.func @transform_0(%arg0: i32) -> (i32, i32, i32, i32) {
    %c0_i32 = arith.constant 0 : i32
    %c0_i32_0 = arith.constant 0 : i32
    %c0_i32_1 = arith.constant 0 : i32
    %c0_i32_2 = arith.constant 0 : i32
    return %arg0, %c0_i32, %c0_i32_0, %c0_i32_1 : i32, i32, i32, i32
  }
  func.func @transform_1(%arg0: i32) -> (i32, i32, i32) {
    %c0_i32 = arith.constant 0 : i32
    %c0_i32_0 = arith.constant 0 : i32
    %c0_i32_1 = arith.constant 0 : i32
    %c0_i32_2 = arith.constant 0 : i32
    return %c0_i32, %c0_i32_0, %c0_i32_1 : i32, i32, i32
  }
  func.func @transform_2(%arg0: i32) -> (i32, i32, i32) {
    %c0_i32 = arith.constant 0 : i32
    %c0_i32_0 = arith.constant 0 : i32
    %c0_i32_1 = arith.constant 0 : i32
    %c0_i32_2 = arith.constant 0 : i32
    return %c0_i32, %c0_i32_0, %c0_i32_1 : i32, i32, i32
  }
  func.func @transform_3(%arg0: i32) -> (i32, i32, i32, i32) {
    %c0_i32 = arith.constant 0 : i32
    %c0_i32_0 = arith.constant 0 : i32
    %c0_i32_1 = arith.constant 0 : i32
    %c0_i32_2 = arith.constant 0 : i32
    return %arg0, %c0_i32, %c0_i32_0, %c0_i32_1 : i32, i32, i32, i32
  }
}

</mosaic_0001>

<bundles_post_ra>
// kernel: tpu_custom_call.1
= control target key start
LH: loop header
LB: loop body
LE: loop exit
PB: predicated region body
PF: predicated region fallthrough
CT: control target
= control target key end

     0   :  { %8 = vsyncpa [#allocation4], 0  ;;  %s10777_s0 = inlined_call_operand.hbm [shape: f32[2,8,8,256], index: 0, kind: input, shape index: {}]   ;;  %s10778_s1 = inlined_call_operand.hbm [shape: bf16[3,768,256], index: 1, kind: input, shape index: {}]   ;;  %s10779_s2 = inlined_call_operand.hbm [shape: bf16[3,768,256], index: 2, kind: input, shape index: {}]   ;;  %s10780_s3 = inlined_call_operand.hbm [shape: f32[2,8,8,256], index: 3, kind: output, shape index: {}]  }
   0x1   :  { %10 = vsyncpa [#allocation4 + $0x1], 0 }
   0x2   :  { %11 = vsyncpa [#allocation7], 0 }
   0x3   :  { %12 = vsyncpa [#allocation5], 0 }
   0x4   :  { %14 = vsyncpa [#allocation5 + $0x1], 0  ;;  %s9354_s12 = smov 0   ;;  %s9356_s13 = smov 0  }
   0x5   :  { %s9358_s14 = smov 0   ;;  %s9360_s15 = smov 0  }
   0x6 LB: > { %s9375_s16 = sadd.s32 4294967295, %s9322_s15   ;;  %s7131_s17 = sadd.s32 4294967294, %s9322_s15   ;;  %s9322_s15 = sphi %s9360_s15, %s10842_s15   ;;  %s9318_s14 = sphi %s9358_s14, %s10841_s14   ;;  %s9314_s13 = sphi %s9356_s13, %s10840_s13   ;;  %s9310_s12 = sphi %s9354_s12, %s10839_s12  }
   0x7   : > { %p40_p0 = scmp.ne.s32.totalorder %s9314_s13, %s9310_s12  ;;  %p10781_p1 = scmp.eq.s32.totalorder %s9375_s16, 0 }
   0x8   : > { %p112_p3 = scmp.eq.s32.totalorder %s7131_s17, 1  ;;  %p7132_p5 = scmp.ge.s32.totalorder %s9322_s15, 1 }
   0x9   : > { %p9384_p4 = por %p10781_p1, %p40_p0  ;;  %p119_p7 = scmp.lt.s32.totalorder %s9322_s15, 3 }
   0xa   : > { %p9389_p6 = por %p112_p3, %p40_p0  ;;  %s9324_s21 = smov [#allocation6]  }
   0xb   : > { %s10784_s18 = scalar_select %p9384_p4, 1, 0 }
   0xc   : > { %s10785_s19 = scalar_select %p9389_p6, 1, 0 }
   0xd   : > { %p9394_p8 = pnand %p7132_p5, %p119_p7  ;;  %s131_s22 = sshll.u32 %s9324_s21, 4  ;;  %s9398_s22 = int_to_ptr.vmem [resolvable:$true] %s131_s22 }
   0xe   : > { %s9325_s24 = smov [#allocation8]   ;;  %s9166_s28 = scalar_lea.hbm %s10778_s1, 36864 }
   0xf   : > { %p8195_p9 = pneg %p9394_p8  ;;  %s144_s25 = sshll.u32 %s9325_s24, 4  ;;  %s9409_s25 = int_to_ptr.vmem [resolvable:$true] %s144_s25 }
  0x10   : > { %p9167_p12 = scmp.ne.s32.totalorder %s10778_s1, %s9166_s28  ;;  %p9173_p5 = scmp.lt.u32.totalorder %s9166_s28, %s10778_s1 }
  0x11   : > { %p9405_p11 = pnand %p8195_p9, %p10781_p1 }
  0x13   : > { %p9168_p13 = pneg %p9405_p11 }
  0x15   : > { %p9169_p0 = pnand %p9168_p13, %p9167_p12 }
  0x17   : > { %p9170_p3 = pneg %p9169_p0 }
  0x19   : > { %p9175_p7 = pnand %p9173_p5, %p9170_p3 }
  0x1b   : > { %9178 = shalt.err (!%p9175_p7)
}
  0x1c   : > { %s9179_s6 = scalar_lea.vmem %s9398_s22, 36864  ;;  %p9187_p2 = scmp.lt.s32.totalorder %s9398_s22, %s9398_s22 }
  0x1d   : > { %p9180_p9 = scmp.ne.s32.totalorder %s9398_s22, %s9179_s6  ;;  %p9188_p12 = scmp.lt.s32.totalorder %s9179_s6, %s9179_s6 }
  0x1f   : > { %p9182_p10 = pnand %p9180_p9, %p9168_p13  ;;  %p9189_p0 = por %p9188_p12, %p9187_p2 }
  0x21   : > { %p9183_p1 = pneg %p9182_p10 }
  0x23   : > { %p9190_p6 = pnand %p9189_p0, %p9183_p1 }
  0x25   : > { %9193 = shalt.err (!%p9190_p6)
}
  0x26   : > { %s9326_s7 = smov 128   ;;  %s9327_s8 = smov 8  }
  0x27   : > { %8198 = dma.hbm_to_vmem [thread:$0]  (!%p9405_p11), %s10778_s1, 36864, %s9398_s22, [#allocation7], %s9326_s7, %s9326_s7, %s9327_s8  }
  0x28   : > { %s9194_s21 = scalar_lea.hbm %s10779_s2, 36864 }
  0x29   : > { %p9195_p2 = scmp.ne.s32.totalorder %s10779_s2, %s9194_s21  ;;  %p9201_p10 = scmp.lt.u32.totalorder %s9194_s21, %s10779_s2 }
  0x2b   : > { %p9197_p1 = pnand %p9195_p2, %p9168_p13 }
  0x2d   : > { %p9198_p6 = pneg %p9197_p1 }
  0x2f   : > { %p9203_p3 = pnand %p9201_p10, %p9198_p6 }
  0x31   : > { %9206 = shalt.err (!%p9203_p3)
}
  0x32   : > { %s9207_s22 = scalar_lea.vmem %s9409_s25, 36864  ;;  %p9215_p12 = scmp.lt.s32.totalorder %s9409_s25, %s9409_s25 }
  0x33   : > { %p9208_p5 = scmp.ne.s32.totalorder %s9409_s25, %s9207_s22  ;;  %p9216_p0 = scmp.lt.s32.totalorder %s9207_s22, %s9207_s22 }
  0x35   : > { %p9210_p7 = pnand %p9208_p5, %p9168_p13  ;;  %p9217_p2 = por %p9216_p0, %p9215_p12 }
  0x37   : > { %p9211_p9 = pneg %p9210_p7 }
  0x39   : > { %p9218_p1 = pnand %p9217_p2, %p9211_p9 }
  0x3b   : > { %9221 = shalt.err (!%p9218_p1)
}
  0x3c   : > { %8201 = dma.hbm_to_vmem [thread:$0]  (!%p9405_p11), %s10779_s2, 36864, %s9409_s25, [#allocation7], %s9326_s7, %s9326_s7, %s9327_s8  }
  0x3d   : > { %s9464_s4 = sadd.s32 1, %s9322_s15   ;;  %s27_s23 = sadd.s32 1, %s9318_s14 }
  0x3e   : > { %s24_s5 = ssub.s32 %s9322_s15, %s9464_s4  ;;  %p34_p13 = scmp.ne.s32.totalorder %s9318_s14, %s9314_s13 }
  0x3f   : > { %p25_p6 = scmp.eq.s32.totalorder %s24_s5, 0  ;;  %p35_p10 = scmp.eq.s32.totalorder %s9322_s15, 0 }
  0x40   : > { %p10788_p3 = scmp.eq.s32.totalorder %s9375_s16, 1  ;;  %p8212_p7 = scmp.lt.s32.totalorder %s9322_s15, 2 }
  0x41   : > { %s9480_s9 = scalar_select %p25_p6, %s9318_s14, %s27_s23  }
  0x42   : > { %p9474_p5 = por %p10788_p3, %p34_p13  ;;  %p36_p9 = por %p35_p10, %p34_p13 }
  0x43   : > { %s158_s10 = sand.u32 1, %s9318_s14   ;;  %s7909_s25 = sshll.u32 %s9322_s15, 11 }
  0x44   : > { %s10789_s6 = scalar_select %p9474_p5, 1, 0 }
  0x45   : > { %s7136_s11 = sshll.u32 %s158_s10, 7  ;;  %s9487_s17 = scalar_lea.hbm %s10777_s0, %s7909_s25 }
  0x46   : > { %s162_s21 = scalar_lea.vmem [#allocation3], %s7136_s11  ;;  %p9491_p11 = pnand %p8212_p7, %p36_p9 }
  0x47   : > { %s169_s24 = sshll.u32 %s162_s21, 4  ;;  %s9495_s27 = scalar_lea.sflag [#allocation4], %s158_s10  ;;  %s9489_s24 = int_to_ptr.vmem [resolvable:$true] %s169_s24 }
  0x48   : > { %s9222_s28 = scalar_lea.hbm %s9487_s17, 2048  ;;  %p9224_p0 = pneg %p9491_p11 }
  0x49   : > { %p9223_p12 = scmp.ne.s32.totalorder %s9487_s17, %s9222_s28  ;;  %s9227_s30 = scalar_lea.hbm %s10777_s0, 4096 }
  0x4a   : > { %p9228_p13 = scmp.lt.u32.totalorder %s9487_s17, %s10777_s0  ;;  %p9229_p6 = scmp.lt.u32.totalorder %s9227_s30, %s9222_s28 }
  0x4b   : > { %p9225_p2 = pnand %p9224_p0, %p9223_p12  ;;  %p9231_p3 = scmp.lt.u32.totalorder %s9222_s28, %s9487_s17 }
  0x4c   : > { %p9230_p10 = por %p9229_p6, %p9228_p13 }
  0x4d   : > { %p9226_p1 = pneg %p9225_p2 }
  0x4e   : > { %p9232_p7 = por %p9231_p3, %p9230_p10 }
  0x50   : > { %p9233_p9 = pnand %p9232_p7, %p9226_p1 }
  0x52   : > { %9236 = shalt.err (!%p9233_p9)
}
  0x53   : > { %s9237_s10 = scalar_lea.vmem %s9489_s24, 2048  ;;  %s9328_s11 = smov [#allocation3]  }
  0x54   : > { %p9238_p12 = scmp.ne.s32.totalorder %s9489_s24, %s9237_s10  ;;  %s9242_s25 = sshll.u32 %s9328_s11, 4  ;;  %s9243_s25 = int_to_ptr.vmem [resolvable:$false] %s9242_s25 }
  0x55   : > { %s9244_s7 = scalar_lea.vmem %s9243_s25, 4096  ;;  %p9245_p4 = scmp.lt.s32.totalorder %s9489_s24, %s9243_s25 }
  0x56   : > { %p9240_p2 = pnand %p9238_p12, %p9224_p0  ;;  %p9246_p13 = scmp.lt.s32.totalorder %s9244_s7, %s9237_s10 }
  0x58   : > { %p9241_p5 = pneg %p9240_p2  ;;  %p9247_p6 = por %p9246_p13, %p9245_p4 }
  0x5a   : > { %p9248_p10 = pnand %p9247_p6, %p9241_p5 }
  0x5c   : > { %9251 = shalt.err (!%p9248_p10)
}
  0x5d   : > { %s9329_s8 = smov 256   ;;  %s9330_s21 = smov 16  }
  0x5e   : > { %8205 = dma.hbm_to_vmem [thread:$0]  (!%p9491_p11), %s9487_s17, 2048, %s9489_s24, %s9495_s27, %s9329_s8, %s9329_s8, %s9330_s21  }
  0x5f   : > { %181 = sbr.rel (%p9394_p8) target bundleno = 1826 (0x722), region = 32  ;;  %s9526_s28 = sand.u32 (!%p9394_p8), 1, %s9314_s13  }
  0x60   : > { %s7140_s22 = sshll.u32 (!%p9394_p8), %s9526_s28, 7  ;;  %s184_s29 = scalar_lea.sflag (!%p9394_p8), [#allocation4], %s9526_s28 }
  0x61   : > { %s9532_s30 = scalar_lea.vmem (!%p9394_p8), [#allocation3], %s7140_s22  ;;  %p10791_p4 = scmp.ne.s32.totalorder (!%p9394_p8), %s10784_s18, 0 }
  0x66   : > { %9297 = dma.done.wait (%p10791_p4), %s184_s29, 2048  }
  0x67   : > { %9299 = vsyncadd (%p10791_p4), %s184_s29, 4294965248  ;;  %p10792_p5 = scmp.eq.s32.totalorder %s9375_s16, 0 }
  0x69   : > { %9301 = dma.done.wait (%p10792_p5), [#allocation7], 73728   ;;  %p10793_p8 = pmov %p10792_p5 }
  0x6a   : > { %v8256_v0 = vld [vmem:[#allocation6 + $0x304] ss:$8 sps:$4 sm:$0xff]   ;;  %v8258_v1 = vld [vmem:[#allocation6 + $0x300] ss:$8 sps:$4 sm:$0xff]   ;;  %v8259_v2 = vld [vmem:[#allocation6 + $0x314] ss:$8 sps:$4 sm:$0xff]  }
  0x6b   : > { %9303 = vsyncadd (%p10793_p8), [#allocation7], 4294893568  ;;  %1581 = vmatprep.subr.bf16.mxu0 %v8256_v0  ;;  %v8261_v3 = vld [vmem:[#allocation6 + $0x310] ss:$8 sps:$4 sm:$0xff]   ;;  %v8262_v4 = vld [vmem:[#allocation6 + $0x324] ss:$8 sps:$4 sm:$0xff]  }
  0x6c   : > { %1582 = vmatpush1.bf16.msra.mxu0 %v8258_v1  ;;  %v8264_v5 = vld [vmem:[#allocation6 + $0x320] ss:$8 sps:$4 sm:$0xff]   ;;  %v8265_v6 = vld [vmem:[#allocation6 + $0x334] ss:$8 sps:$4 sm:$0xff]   ;;  %v8267_v7 = vld [vmem:[#allocation6 + $0x330] ss:$8 sps:$4 sm:$0xff]  }
  0x6d   : > { %1583 = vmatprep.subr.bf16.mxu0 %v8259_v2  ;;  %v8268_v8 = vld [vmem:[#allocation6 + $0x344] ss:$8 sps:$4 sm:$0xff]   ;;  %vm371_vm0 = vcmask 1043456   ;;  %vm372_vm1 = vsmask.f32 7938  ;;  %vm374_vm2 = vcmask 1047556  }
  0x6e   : > { %v8270_v9 = vld [vmem:[#allocation6 + $0x340] ss:$8 sps:$4 sm:$0xff]   ;;  %vm375_vm3 = vsmask.f32 7954  ;;  %vm381_vm4 = vcmask 1040384   ;;  %vm9543_vm6 = vmand %vm371_vm0, %vm372_vm1  ;;  %vm384_vm8 = vcmask 1044484  }
  0x6f   : > { %v8271_v10 = vld [vmem:[#allocation6 + $0x354] ss:$8 sps:$4 sm:$0xff]   ;;  %vm382_vm5 = vsmask.f32 256  ;;  %vm9548_vm7 = vmand %vm374_vm2, %vm375_vm3  ;;  %vm385_vm9 = vsmask.f32 4352 }
  0x70   : > { %1584 = vmatpush1.bf16.msra.mxu0 %v8261_v3  ;;  %v8273_v13 = vld [vmem:[#allocation6 + $0x350] ss:$8 sps:$4 sm:$0xff]   ;;  %vm9553_vm10 = vmand %vm381_vm4, %vm382_vm5  ;;  %v8274_v15 = vld [vmem:[#allocation6 + $0x364] ss:$8 sps:$4 sm:$0xff]   ;;  %vm806_vm2 = vsmask.f32 7440 }
  0x71   : > { %1585 = vmatprep.subr.bf16.mxu0 %v8262_v4  ;;  %v218_v16 = vld [vmem:[%s9532_s30] sm:$0xff]  ;;  %v219_v17 = vld [vmem:[%s9532_s30 + $0x8] sm:$0xff]  ;;  %vm386_vm11 = vmand %vm384_vm8, %vm385_vm9  ;;  %vm2586_vm5 = vcmask 1046532   ;;  %s7926_s18 = sshll.u32 %s9375_s16, 11  ;;  %s10706_s20 = scalar_lea.vmem [#allocation9], %s7140_s22 }
  0x72   : > { %v220_v18 = vld [vmem:[%s9532_s30 + $0x10] sm:$0xff]  ;;  %v221_v19 = vld [vmem:[%s9532_s30 + $0x18] sm:$0xff]  ;;  %v7910_v20 = vpack.c.bf16 %v219_v17, %v218_v16  ;;  %v8276_v21 = vld [vmem:[#allocation6 + $0x360] ss:$8 sps:$4 sm:$0xff]   ;;  %s7039_s17 = sshll.u32 %s10706_s20, 4  ;;  %s10723_s26 = scalar_lea.hbm %s10780_s3, %s7926_s18  ;;  %s10725_s17 = int_to_ptr.vmem [resolvable:$true] %s7039_s17 }
  0x73   : > { %v7911_v22 = vpack.c.bf16 %v221_v19, %v220_v18  ;;  %vm9566_vm12 = vmor %vm9548_vm7, %vm9543_vm6  ;;  %v8277_v24 = vld [vmem:[#allocation6 + $0x374] ss:$8 sps:$4 sm:$0xff]   ;;  %v8279_v28 = vld [vmem:[#allocation6 + $0x370] ss:$8 sps:$4 sm:$0xff]   ;;  %s7026_s27 = scalar_lea.sflag [#allocation5], %s9526_s28  ;;  %s9252_s23 = scalar_lea.vmem %s10725_s17, 2048 }
  0x74   : > { %1586 = vmatpush1.bf16.msra.mxu0 %v8264_v5  ;;  %v291_v25 = vshrl.u32 %v7910_v20, 16  ;;  %v294_v26 = vshll.u32 %v7910_v20, 16  ;;  %vm9572_vm13 = vmor %vm386_vm11, %vm9553_vm10  ;;  %v8280_v31 = vld [vmem:[#allocation6 + $0x384] ss:$8 sps:$4 sm:$0xff]   ;;  %v378_v33 = vld [vmem:[#allocation2 + $0x10] sm:$0xff]  ;;  %p9253_p11 = scmp.ne.s32.totalorder %s10725_s17, %s9252_s23  ;;  %p10836_p0 = scmp.ne.s32.totalorder %s10789_s6, 0 }
  0x75   : > { %1587 = vmatprep.subr.bf16.mxu0 %v8265_v6  ;;  %v299_v29 = vshrl.u32 %v7911_v22, 16  ;;  %v302_v30 = vshll.u32 %v7911_v22, 16  ;;  %v388_v34 = vld [vmem:[#allocation2 + $0x18] sm:$0x11]  ;;  %v391_v35 = vld [vmem:[#allocation2 + $0x20] sm:$0xff]  ;;  %vm9590_vm14 = vmand %vm381_vm4, %vm372_vm1  ;;  %vm2585_vm4 = vcmask 1042432  }
  0x76   : > { %v293_v32 = vrot.slane %v291_v25, 7  ;;  %v394_v37 = vld [vmem:[#allocation2 + $0x28] sm:$0x11]  ;;  %v433_v40 = vld [vmem:[#allocation2] sm:$0xff]  ;;  %v8283_v51 = vld [vmem:[#allocation6 + $0x394] ss:$8 sps:$4 sm:$0xff]   ;;  %p9254_p1 = pnand %p9253_p11, %p10836_p0 }
  0x77   : > { %v301_v36 = vrot.slane %v299_v29, 7  ;;  %v436_v41 = vld [vmem:[#allocation2 + $0x8] sm:$0x11]  ;;  %v8285_v52 = vld [vmem:[#allocation6 + $0x390] ss:$8 sps:$4 sm:$0xff]   ;;  %vm9596_vm15 = vmand %vm384_vm8, %vm375_vm3  ;;  %s9331_s5 = smov [#allocation9]  }
  0x78   : > { %1588 = vmatpush1.bf16.msra.mxu0 %v8267_v7  ;;  %v296_v38 = vor.u32 %v294_v26, %v293_v32  ;;  %v297_v39 = vrot.slane %v293_v32, 4  ;;  %v8282_v46 = vld [vmem:[#allocation6 + $0x380] ss:$8 sps:$4 sm:$0xff]   ;;  %v8286_v53 = vld [vmem:[#allocation6 + $0x3a4] ss:$8 sps:$4 sm:$0xff]   ;;  %vm9604_vm0 = vmor %vm9596_vm15, %vm9590_vm14  ;;  %p9255_p3 = pneg %p9254_p1  ;;  %s9256_s10 = sshll.u32 %s9331_s5, 4  ;;  %s9257_s10 = int_to_ptr.vmem [resolvable:$false] %s9256_s10 }
  0x79   : > { %1589 = vmatprep.subr.bf16.mxu0 %v8268_v8  ;;  %v304_v42 = vor.u32 %v302_v30, %v301_v36  ;;  %v305_v43 = vrot.slane %v301_v36, 4  ;;  %v8288_v55 = vld [vmem:[#allocation6 + $0x3a0] ss:$8 sps:$4 sm:$0xff]   ;;  %v8289_v57 = vld [vmem:[#allocation6 + $0x3b4] ss:$8 sps:$4 sm:$0xff]   ;;  %vm9872_vm6 = vmor %vm2585_vm4, %vm2586_vm5  ;;  %s9258_s11 = scalar_lea.vmem %s9257_s10, 4096  ;;  %p9259_p7 = scmp.lt.s32.totalorder %s10725_s17, %s9257_s10 }
  0x7a   : > { %v379_v44 = vsel %vm9566_vm12, %v296_v38, %v378_v33  ;;  %v389_v45 = vsel %vm9572_vm13, %v297_v39, %v388_v34  ;;  %v8291_v16 = vld [vmem:[#allocation6 + $0x3b0] ss:$8 sps:$4 sm:$0xff]   ;;  %v8292_v18 = vld [vmem:[#allocation6 + $0x3c4] ss:$8 sps:$4 sm:$0xff]   ;;  %v8294_v25 = vld [vmem:[#allocation6 + $0x3c0] ss:$8 sps:$4 sm:$0xff]   ;;  %p9260_p9 = scmp.lt.s32.totalorder %s9258_s11, %s9252_s23 }
  0x7b   : > { %380 = vst [vmem:[#allocation2 + $0x10] sm:$0xff] %v379_v44  ;;  %390 = vst [vmem:[#allocation2 + $0x18] sm:$0x11] %v389_v45  ;;  %v392_v47 = vsel %vm9566_vm12, %v304_v42, %v391_v35  ;;  %v395_v48 = vsel %vm9572_vm13, %v305_v43, %v394_v37  ;;  %v434_v49 = vsel %vm9566_vm12, %v304_v42, %v433_v40  ;;  %v223_v22 = vld [vmem:[%s9532_s30 + $0x28] sm:$0xff]  ;;  %vm805_vm1 = vsmask.f32 3328 }
  0x7c   : > { %1590 = vmatpush1.bf16.msra.mxu0 %v8270_v9  ;;  %v437_v50 = vsel %vm9572_vm13, %v305_v43, %v436_v41  ;;  %393 = vst [vmem:[#allocation2 + $0x20] sm:$0xff] %v392_v47  ;;  %396 = vst [vmem:[#allocation2 + $0x28] sm:$0x11] %v395_v48  ;;  %v224_v32 = vld [vmem:[%s9532_s30 + $0x30] sm:$0xff]  ;;  %v225_v33 = vld [vmem:[%s9532_s30 + $0x38] sm:$0xff]  ;;  %p9261_p12 = por %p9260_p9, %p9259_p7 }
  0x7d   : > { %1591 = vmatprep.subr.bf16.mxu0 %v8271_v10  ;;  %435 = vst [vmem:[#allocation2] sm:$0xff] %v434_v49  ;;  %438 = vst [vmem:[#allocation2 + $0x8] sm:$0x11] %v437_v50  ;;  %v8297_v34 = vld [vmem:[#allocation6 + $0x3d0] ss:$8 sps:$4 sm:$0xff]   ;;  %v226_v41 = vld [vmem:[%s9532_s30 + $0x40] sm:$0xff]  ;;  %v7913_v48 = vpack.c.bf16 %v225_v33, %v224_v32 }
  0x7e   : > { %v227_v42 = vld [vmem:[%s9532_s30 + $0x48] sm:$0xff]  ;;  %vm9628_vm3 = vmor %vm805_vm1, %vm806_vm2  ;;  %p9262_p2 = pnand %p9261_p12, %p9255_p3 }
  0x7f   : > { %v8298_v43 = vld [vmem:[#allocation6 + $0x3e4] ss:$8 sps:$4 sm:$0xff]   ;;  %v8300_v54 = vld [vmem:[#allocation6 + $0x3e0] ss:$8 sps:$4 sm:$0xff]  }
  0x80   : > { %1592 = vmatpush1.bf16.msra.mxu0 %v8273_v13  ;;  %v8304_v32 = vld [vmem:[#allocation6 + $0x400] ss:$8 sps:$4 sm:$0xff]  }
  0x81   : > { %1593 = vmatprep.subr.bf16.mxu0 %v8274_v15 }
  0x82   : > { %v447_v58 = vld [vmem:[#allocation2 + $0x10] sm:$0x22]  ;;  %v499_v59 = vld [vmem:[#allocation2 + $0x10] sm:$0x11]  ;;  %v527_v60 = vld [vmem:[#allocation2 + $0x10] sm:$0x88] }
  0x83   : > { %v448_v62 = vld [vmem:[#allocation2 + $0x20] sm:$0x22]  ;;  %v7153_v63 = vrot.slane %v447_v58, 9  ;;  %v7163_v0 = vrot.slane %v527_v60, 11  ;;  %v502_v4 = vld [vmem:[#allocation2 + $0x20] sm:$0x11]  ;;  %v7914_v58 = vpack.c.bf16 %v227_v42, %v226_v41 }
  0x84   : > { %1594 = vmatpush1.bf16.msra.mxu0 %v8276_v21  ;;  %v446_v61 = vld [vmem:[#allocation2] sm:$0x22]  ;;  %v7154_v2 = vrot.slane %v448_v62, 9  ;;  %v496_v3 = vld [vmem:[#allocation2] sm:$0x11] }
  0x85   : > { %1595 = vmatprep.subr.bf16.mxu0 %v8277_v24  ;;  %v7152_v1 = vrot.slane %v446_v61, 9  ;;  %v500_v6 = vsel %vm9572_vm13, %v7153_v63, %v499_v59  ;;  %v526_v7 = vld [vmem:[#allocation2] sm:$0x88]  ;;  %v579_v9 = vld [vmem:[#allocation2 + $0x8] sm:$0x11] }
  0x86   : > { %v528_v8 = vld [vmem:[#allocation2 + $0x20] sm:$0x88]  ;;  %501 = vst [vmem:[#allocation2 + $0x10] sm:$0x11] %v500_v6  ;;  %v503_v11 = vsel %vm9572_vm13, %v7154_v2, %v502_v4  ;;  %v7162_v12 = vrot.slane %v526_v7, 11  ;;  %v315_v6 = vshrl.u32 %v7913_v48, 16 }
  0x87   : > { %v497_v10 = vsel %vm9572_vm13, %v7152_v1, %v496_v3  ;;  %v7164_v13 = vrot.slane %v528_v8, 11  ;;  %v582_v14 = vld [vmem:[#allocation2 + $0x18] sm:$0x11]  ;;  %v585_v15 = vld [vmem:[#allocation2 + $0x28] sm:$0x11]  ;;  %v222_v21 = vld [vmem:[%s9532_s30 + $0x20] sm:$0xff] }
  0x88   : > { %1596 = vmatpush1.bf16.msra.mxu0 %v8279_v28  ;;  %498 = vst [vmem:[#allocation2] sm:$0x11] %v497_v10  ;;  %504 = vst [vmem:[#allocation2 + $0x20] sm:$0x11] %v503_v11  ;;  %v583_v17 = vsel %vm9604_vm0, %v7163_v0, %v582_v14  ;;  %v580_v19 = vsel %vm9604_vm0, %v7162_v12, %v579_v9  ;;  %v7912_v24 = vpack.c.bf16 %v223_v22, %v222_v21  ;;  %v8295_v28 = vld [vmem:[#allocation6 + $0x3d4] ss:$8 sps:$4 sm:$0xff]  }
  0x89   : > { %1597 = vmatprep.subr.bf16.mxu0 %v8280_v31  ;;  %584 = vst [vmem:[#allocation2 + $0x18] sm:$0x11] %v583_v17  ;;  %v586_v20 = vsel %vm9604_vm0, %v7164_v13, %v585_v15  ;;  %581 = vst [vmem:[#allocation2 + $0x8] sm:$0x11] %v580_v19  ;;  %v8301_v63 = vld [vmem:[#allocation6 + $0x3f4] ss:$8 sps:$4 sm:$0xff]  }
  0x8a   : > { %587 = vst [vmem:[#allocation2 + $0x28] sm:$0x11] %v586_v20  ;;  %v307_v26 = vshrl.u32 %v7912_v24, 16  ;;  %v310_v29 = vshll.u32 %v7912_v24, 16  ;;  %v8303_v2 = vld [vmem:[#allocation6 + $0x3f0] ss:$8 sps:$4 sm:$0xff]  }
  0x8b   : > { %v318_v7 = vshll.u32 %v7913_v48, 16  ;;  %v8306_v10 = vld [vmem:[#allocation6 + $0x404] ss:$8 sps:$4 sm:$0xff]   ;;  %v323_v11 = vshrl.u32 %v7914_v58, 16  ;;  %v326_v12 = vshll.u32 %v7914_v58, 16  ;;  %v228_v13 = vld [vmem:[%s9532_s30 + $0x50] sm:$0xff] }
  0x8c   : > { %1598 = vmatpush1.bf16.msra.mxu0 %v8282_v46  ;;  %v309_v31 = vrot.slane %v307_v26, 7  ;;  %v317_v15 = vrot.slane %v315_v6, 7  ;;  %v230_v17 = vld [vmem:[%s9532_s30 + $0x60] sm:$0xff]  ;;  %v406_v22 = vld [vmem:[#allocation2 + $0x48] sm:$0x11]  ;;  %v409_v24 = vld [vmem:[#allocation2 + $0x50] sm:$0xff] }
  0x8d   : > { %1599 = vmatprep.subr.bf16.mxu0 %v8283_v51  ;;  %v610_v30 = vld [vmem:[#allocation2 + $0x10] sm:$0xff]  ;;  %v325_v20 = vrot.slane %v323_v11, 7  ;;  %v403_v21 = vld [vmem:[#allocation2 + $0x40] sm:$0xff]  ;;  %v424_v6 = vld [vmem:[#allocation2 + $0x78] sm:$0x11] }
  0x8e   : > { %v823_v36 = vshrl.u32 %v610_v30, 16  ;;  %v826_v37 = vshll.u32 %v610_v30, 16  ;;  %v312_v47 = vor.u32 %v310_v29, %v309_v31  ;;  %v313_v62 = vrot.slane %v309_v31, 4  ;;  %v412_v29 = vld [vmem:[#allocation2 + $0x58] sm:$0x11] }
  0x8f   : > { %v609_v35 = vld [vmem:[#allocation2] sm:$0xff]  ;;  %v320_v26 = vor.u32 %v318_v7, %v317_v15  ;;  %v328_v33 = vor.u32 %v326_v12, %v325_v20 }
  0x90   : > { %1600 = vmatpush1.bf16.msra.mxu0 %v8285_v52  ;;  %v746_v38 = vld [vmem:[#allocation2 + $0x18] sm:$0x11]  ;;  %v809_v39 = vshrl.u32 %v609_v35, 16  ;;  %v812_v40 = vshll.u32 %v609_v35, 16  ;;  %v745_v44 = vld [vmem:[#allocation2 + $0x8] sm:$0x11] }
  0x91   : > { %1601 = vmatprep.subr.bf16.mxu0 %v8286_v53  ;;  %v825_v45 = vrot.slane %v823_v36, 4  ;;  %v828_v46 = vrot.slane %v826_v37, 5  ;;  %v818_v51 = vshll.u32 %v745_v44, 16  ;;  %v832_v52 = vshll.u32 %v746_v38, 16  ;;  %v397_v53 = vld [vmem:[#allocation2 + $0x30] sm:$0xff]  ;;  %v9636_v8 = vld [vmem:[#allocation2 + $0x20] sm:$0xff] }
  0x92   : > { %v811_v49 = vrot.slane %v809_v39, 4  ;;  %v814_v50 = vrot.slane %v812_v40, 5  ;;  %v398_v1 = vsel %vm9566_vm12, %v312_v47, %v397_v53  ;;  %v8309_v36 = vld [vmem:[#allocation6 + $0x414] ss:$8 sps:$4 sm:$0xff]   ;;  %v404_v37 = vsel %vm9566_vm12, %v320_v26, %v403_v21 }
  0x93   : > { %v829_v56 = vor.u32 %v828_v46, %v825_v45  ;;  %v820_v60 = vrot.slane %v818_v51, 5  ;;  %v834_v61 = vrot.slane %v832_v52, 5  ;;  %399 = vst [vmem:[#allocation2 + $0x30] sm:$0xff] %v398_v1  ;;  %405 = vst [vmem:[#allocation2 + $0x40] sm:$0xff] %v404_v37  ;;  %v410_v44 = vsel %vm9566_vm12, %v328_v33, %v409_v24  ;;  %v8307_v46 = vld [vmem:[#allocation6 + $0x410] ss:$8 sps:$4 sm:$0xff]  }
  0x94   : > { %1602 = vmatpush1.bf16.msra.mxu0 %v8288_v55  ;;  %v815_v59 = vor.u32 %v814_v50, %v811_v49  ;;  %411 = vst [vmem:[#allocation2 + $0x50] sm:$0xff] %v410_v44  ;;  %v840_v52 = vshll.u32 %v9636_v8, 16  ;;  %v8310_v1 = vld [vmem:[#allocation6 + $0x420] ss:$8 sps:$4 sm:$0xff]   ;;  %v8313_v33 = vld [vmem:[#allocation6 + $0x430] ss:$8 sps:$4 sm:$0xff]  }
  0x95   : > { %1603 = vmatprep.subr.bf16.mxu0 %v8289_v57  ;;  %v400_v57 = vld [vmem:[#allocation2 + $0x38] sm:$0x11]  ;;  %v830_v0 = vrot.slane %v829_v56, 4  ;;  %v418_v56 = vld [vmem:[#allocation2 + $0x68] sm:$0x11] }
  0x96   : > { %v816_v3 = vrot.slane %v815_v59, 4  ;;  %v401_v4 = vsel %vm9572_vm13, %v313_v62, %v400_v57  ;;  %v747_v57 = vld [vmem:[#allocation2 + $0x28] sm:$0x11]  ;;  %v842_v7 = vrot.slane %v840_v52, 5  ;;  %v8864_v55 = vld [vmem:[#allocation8 + $0x74] ss:$8 sps:$4 sm:$0xff]  }
  0x97   : > { %v9640_v9 = vsel %vm9628_vm3, %v830_v0, %v834_v61  ;;  %402 = vst [vmem:[#allocation2 + $0x38] sm:$0x11] %v401_v4  ;;  %v8312_v62 = vld [vmem:[#allocation6 + $0x424] ss:$8 sps:$4 sm:$0xff]   ;;  %v421_v4 = vld [vmem:[#allocation2 + $0x70] sm:$0xff] }
  0x98   : > { %1604 = vmatpush1.bf16.msra.mxu0 %v8291_v16  ;;  %v821_v14 = vsel %vm9628_vm3, %v816_v3, %v820_v60  ;;  %v229_v16 = vld [vmem:[%s9532_s30 + $0x58] sm:$0xff]  ;;  %v8318_v37 = vld [vmem:[#allocation6 + $0x444] ss:$8 sps:$4 sm:$0xff]  }
  0x99   : > { %1605 = vmatprep.subr.bf16.mxu0 %v8292_v18  ;;  %v231_v18 = vld [vmem:[%s9532_s30 + $0x68] sm:$0xff]  ;;  %v7173_v19 = vcombine.high %v821_v14, %v9640_v9  ;;  %v7915_v30 = vpack.c.bf16 %v229_v16, %v228_v13  ;;  %v7172_v31 = vcombine.low %v821_v14, %v9640_v9 }
  0x9a   : > { %v7916_v35 = vpack.c.bf16 %v231_v18, %v230_v17  ;;  %v449_v41 = vld [vmem:[#allocation2 + $0x30] sm:$0x22]  ;;  %v505_v42 = vld [vmem:[#allocation2 + $0x30] sm:$0x11]  ;;  %v450_v13 = vld [vmem:[#allocation2 + $0x40] sm:$0x22] }
  0x9b   : > { %1613 = vmatprep.mubr.bf16.mxu0 %v7173_v19  ;;  %v331_v39 = vshrl.u32 %v7915_v30, 16  ;;  %v334_v40 = vshll.u32 %v7915_v30, 16  ;;  %v7155_v47 = vrot.slane %v449_v41, 9  ;;  %v508_v14 = vld [vmem:[#allocation2 + $0x40] sm:$0x11]  ;;  %v7156_v17 = vrot.slane %v450_v13, 9 }
  0x9c   : > { %1606 = vmatpush1.bf16.msra.mxu0 %v8294_v25  ;;  %v837_v25 = vshrl.u32 %v9636_v8, 16  ;;  %v339_v51 = vshrl.u32 %v7916_v35, 16  ;;  %v342_v53 = vshll.u32 %v7916_v35, 16  ;;  %v846_v8 = vshll.u32 %v747_v57, 16  ;;  %v451_v16 = vld [vmem:[#allocation2 + $0x50] sm:$0x22] }
  0x9d   : > { %1607 = vmatprep.subr.bf16.mxu0 %v8295_v28  ;;  %v321_v28 = vrot.slane %v317_v15, 4  ;;  %v333_v50 = vrot.slane %v331_v39, 7  ;;  %v506_v58 = vsel %vm9572_vm13, %v7155_v47, %v505_v42  ;;  %v530_v15 = vld [vmem:[#allocation2 + $0x40] sm:$0x88]  ;;  %v511_v18 = vld [vmem:[#allocation2 + $0x50] sm:$0x11] }
  0x9e   : > { %v588_v49 = vld [vmem:[#allocation2 + $0x38] sm:$0x11]  ;;  %507 = vst [vmem:[#allocation2 + $0x30] sm:$0x11] %v506_v58  ;;  %v839_v0 = vrot.slane %v837_v25, 4  ;;  %v7166_v19 = vrot.slane %v530_v15, 11 }
  0x9f   : > { %v407_v38 = vsel %vm9572_vm13, %v321_v28, %v406_v22  ;;  %v336_v60 = vor.u32 %v334_v40, %v333_v50  ;;  %v337_v61 = vrot.slane %v333_v50, 4  ;;  %v7157_v22 = vrot.slane %v451_v16, 9  ;;  %v531_v24 = vld [vmem:[#allocation2 + $0x50] sm:$0x88]  ;;  %v8316_v42 = vld [vmem:[#allocation6 + $0x440] ss:$8 sps:$4 sm:$0xff]  }
  0xa0   : > { %1608 = vmatpush1.bf16.msra.mxu0 %v8297_v34  ;;  %v329_v34 = vrot.slane %v325_v20, 4  ;;  %408 = vst [vmem:[#allocation2 + $0x48] sm:$0x11] %v407_v38  ;;  %v843_v26 = vor.u32 %v842_v7, %v839_v0  ;;  %v509_v28 = vsel %vm9572_vm13, %v7156_v17, %v508_v14  ;;  %v8324_v7 = vld [vmem:[#allocation6 + $0x464] ss:$8 sps:$4 sm:$0xff]  }
  0xa1   : > { %1609 = vmatprep.subr.bf16.mxu0 %v8298_v43  ;;  %v529_v43 = vld [vmem:[#allocation2 + $0x30] sm:$0x88]  ;;  %v419_v3 = vsel %vm9572_vm13, %v337_v61, %v418_v56  ;;  %510 = vst [vmem:[#allocation2 + $0x40] sm:$0x11] %v509_v28 }
  0xa2   : > { %v413_v45 = vsel %vm9572_vm13, %v329_v34, %v412_v29  ;;  %v7165_v48 = vrot.slane %v529_v43, 11  ;;  %420 = vst [vmem:[#allocation2 + $0x68] sm:$0x11] %v419_v3  ;;  %v7167_v29 = vrot.slane %v531_v24, 11 }
  0xa3   : > { %414 = vst [vmem:[#allocation2 + $0x58] sm:$0x11] %v413_v45 }
  0xa4   : > { %1610 = vmatpush1.bf16.msra.mxu0 %v8300_v54  ;;  %v415_v54 = vld [vmem:[#allocation2 + $0x60] sm:$0xff]  ;;  %v589_v59 = vsel %vm9604_vm0, %v7165_v48, %v588_v49 }
  0xa5   : > { %1611 = vmatprep.subr.bf16.mxu0 %v8301_v63  ;;  %590 = vst [vmem:[#allocation2 + $0x38] sm:$0x11] %v589_v59  ;;  %v9664_v63 = vrot.slane %v339_v51, 7  ;;  %v612_v34 = vld [vmem:[#allocation2 + $0x30] sm:$0xff] }
  0xa6   : > { %v851_v38 = vshrl.u32 %v612_v34, 16  ;;  %v854_v39 = vshll.u32 %v612_v34, 16  ;;  %v8321_v51 = vld [vmem:[#allocation6 + $0x454] ss:$8 sps:$4 sm:$0xff]  }
  0xa7   : > { %v9671_v11 = vor.u32 %v342_v53, %v9664_v63  ;;  %v345_v12 = vrot.slane %v9664_v63, 4  ;;  %v591_v25 = vld [vmem:[#allocation2 + $0x48] sm:$0x11] }
  0xa8   : > { %1612 = vmatpush1.bf16.msra.mxu0 %v8303_v2  ;;  %v416_v2 = vsel %vm9566_vm12, %v336_v60, %v415_v54  ;;  %v592_v30 = vsel %vm9604_vm0, %v7166_v19, %v591_v25  ;;  %v853_v47 = vrot.slane %v851_v38, 4  ;;  %v856_v48 = vrot.slane %v854_v39, 5 }
  0xa9   : > { %1654 = vmatprep.subr.bf16.mxu0 %v8306_v10  ;;  %v8315_v10 = vld [vmem:[#allocation6 + $0x434] ss:$8 sps:$4 sm:$0xff]   ;;  %417 = vst [vmem:[#allocation2 + $0x60] sm:$0xff] %v416_v2  ;;  %v422_v20 = vsel %vm9566_vm12, %v9671_v11, %v421_v4  ;;  %v425_v21 = vsel %vm9572_vm13, %v345_v12, %v424_v6  ;;  %593 = vst [vmem:[#allocation2 + $0x48] sm:$0x11] %v592_v30  ;;  %v613_v4 = vld [vmem:[#allocation2 + $0x40] sm:$0xff] }
  0xaa   : > { %423 = vst [vmem:[#allocation2 + $0x70] sm:$0xff] %v422_v20  ;;  %426 = vst [vmem:[#allocation2 + $0x78] sm:$0x11] %v425_v21  ;;  %v597_v50 = vld [vmem:[#allocation2 + $0x68] sm:$0x11]  ;;  %v857_v54 = vor.u32 %v856_v48, %v853_v47  ;;  %v868_v13 = vshll.u32 %v613_v4, 16 }
  0xab   : > { %1614 = vmatmul.mubr.bf16.vlgmr.msra.gmra.mrb[0].mxu0 %v7172_v31  ;;  %v594_v31 = vld [vmem:[#allocation2 + $0x58] sm:$0x11]  ;;  %v8322_v30 = vld [vmem:[#allocation6 + $0x460] ss:$8 sps:$4 sm:$0xff]  }
  0xac   : > { %1655 = vmatpush1.bf16.msra.mxu0 %v8304_v32  ;;  %v848_v32 = vrot.slane %v846_v8, 5  ;;  %v748_v35 = vld [vmem:[#allocation2 + $0x38] sm:$0x11]  ;;  %v595_v41 = vsel %vm9604_vm0, %v7167_v29, %v594_v31  ;;  %v858_v3 = vrot.slane %v857_v54, 4  ;;  %v870_v25 = vrot.slane %v868_v13, 5 }
  0xad   : > { %1656 = vmatprep.subr.bf16.mxu0 %v8309_v36  ;;  %v512_v36 = vsel %vm9572_vm13, %v7157_v22, %v511_v18  ;;  %v860_v40 = vshll.u32 %v748_v35, 16  ;;  %596 = vst [vmem:[#allocation2 + $0x58] sm:$0x11] %v595_v41  ;;  %v8319_v2 = vld [vmem:[#allocation6 + $0x450] ss:$8 sps:$4 sm:$0xff]  }
  0xae   : > { %513 = vst [vmem:[#allocation2 + $0x50] sm:$0x11] %v512_v36  ;;  %v8325_v41 = vld [vmem:[#allocation6 + $0x470] ss:$8 sps:$4 sm:$0xff]  }
  0xaf   : > { %v862_v52 = vrot.slane %v860_v40, 5  ;;  %v8331_v13 = vld [vmem:[#allocation6 + $0x490] ss:$8 sps:$4 sm:$0xff]  }
  0xb0   : > { %1657 = vmatpush1.bf16.msra.mxu0 %v8307_v46  ;;  %v452_v43 = vld [vmem:[#allocation2 + $0x60] sm:$0x22]  ;;  %v514_v44 = vld [vmem:[#allocation2 + $0x60] sm:$0x11]  ;;  %v532_v45 = vld [vmem:[#allocation2 + $0x60] sm:$0x88] }
  0xb1   : > { %1658 = vmatprep.subr.bf16.mxu0 %v8312_v62  ;;  %v844_v46 = vrot.slane %v843_v26, 4  ;;  %v7158_v49 = vrot.slane %v452_v43, 9  ;;  %v7168_v53 = vrot.slane %v532_v45, 11  ;;  %v453_v56 = vld [vmem:[#allocation2 + $0x70] sm:$0x22]  ;;  %v9701_v16 = vsel %vm9628_vm3, %v858_v3, %v862_v52 }
  0xb2   : > { %v517_v58 = vld [vmem:[#allocation2 + $0x70] sm:$0x11]  ;;  %v533_v59 = vld [vmem:[#allocation2 + $0x70] sm:$0x88]  ;;  %v7159_v60 = vrot.slane %v453_v56, 9 }
  0xb3   : > { %v515_v57 = vsel %vm9572_vm13, %v7158_v49, %v514_v44  ;;  %v7169_v61 = vrot.slane %v533_v59, 11  ;;  %v598_v62 = vsel %vm9604_vm0, %v7168_v53, %v597_v50  ;;  %v600_v0 = vld [vmem:[#allocation2 + $0x78] sm:$0x11]  ;;  %v749_v6 = vld [vmem:[#allocation2 + $0x48] sm:$0x11] }
  0xb4   : > { %1659 = vmatpush1.bf16.msra.mxu0 %v8310_v1  ;;  %516 = vst [vmem:[#allocation2 + $0x60] sm:$0x11] %v515_v57  ;;  %v9695_v1 = vsel %vm9628_vm3, %v844_v46, %v848_v32  ;;  %599 = vst [vmem:[#allocation2 + $0x68] sm:$0x11] %v598_v62  ;;  %v874_v14 = vshll.u32 %v749_v6, 16  ;;  %v518_v15 = vsel %vm9572_vm13, %v7159_v60, %v517_v58  ;;  %v233_v6 = vld [vmem:[%s9532_s30 + $0x78] sm:$0xff] }
  0xb5   : > { %1660 = vmatprep.subr.bf16.mxu0 %v8315_v10  ;;  %v614_v8 = vld [vmem:[#allocation2 + $0x50] sm:$0xff]  ;;  %v865_v10 = vshrl.u32 %v613_v4, 16  ;;  %v750_v17 = vld [vmem:[#allocation2 + $0x58] sm:$0x11]  ;;  %519 = vst [vmem:[#allocation2 + $0x70] sm:$0x11] %v518_v15  ;;  %v601_v20 = vsel %vm9604_vm0, %v7169_v61, %v600_v0  ;;  %v9707_v21 = vcombine.high %v9695_v1, %v9701_v16  ;;  %v9711_v22 = vcombine.low %v9695_v1, %v9701_v16 }
  0xb6   : > { %v879_v18 = vshrl.u32 %v614_v8, 16  ;;  %v882_v19 = vshll.u32 %v614_v8, 16  ;;  %602 = vst [vmem:[#allocation2 + $0x78] sm:$0x11] %v601_v20  ;;  %v888_v29 = vshll.u32 %v750_v17, 16  ;;  %v876_v32 = vrot.slane %v874_v14, 5 }
  0xb7   : > { %v867_v24 = vrot.slane %v865_v10, 4  ;;  %1623 = vmatprep.mubr.bf16.mxu0 %v9707_v21  ;;  %v8330_v44 = vld [vmem:[#allocation6 + $0x484] ss:$8 sps:$4 sm:$0xff]   ;;  %v8328_v61 = vld [vmem:[#allocation6 + $0x480] ss:$8 sps:$4 sm:$0xff]   ;;  %v232_v4 = vld [vmem:[%s9532_s30 + $0x70] sm:$0xff] }
  0xb8   : > { %1661 = vmatpush1.bf16.msra.mxu0 %v8313_v33  ;;  %v881_v26 = vrot.slane %v879_v18, 4  ;;  %v884_v28 = vrot.slane %v882_v19, 5  ;;  %v8327_v33 = vld [vmem:[#allocation6 + $0x474] ss:$8 sps:$4 sm:$0xff]   ;;  %v890_v35 = vrot.slane %v888_v29, 5  ;;  %v7917_v10 = vpack.c.bf16 %v233_v6, %v232_v4 }
  0xb9   : > { %1662 = vmatprep.subr.bf16.mxu0 %v8318_v37  ;;  %v871_v31 = vor.u32 %v870_v25, %v867_v24  ;;  %1624 = vmatmul.mubr.bf16.gmra.mrb[4].mxu0 %v9711_v22  ;;  %v8333_v0 = vld [vmem:[#allocation6 + $0x494] ss:$8 sps:$4 sm:$0xff]   ;;  %v8336_v14 = vld [vmem:[#allocation6 + $0x4a4] ss:$8 sps:$4 sm:$0xff]   ;;  %v7175_v24 = vcombine.high %v9640_v9, %v9695_v1  ;;  %v8334_v25 = vld [vmem:[#allocation6 + $0x4a0] ss:$8 sps:$4 sm:$0xff]  }
  0xba   : > { %v885_v34 = vor.u32 %v884_v28, %v881_v26  ;;  %v347_v17 = vshrl.u32 %v7917_v10, 16  ;;  %v350_v18 = vshll.u32 %v7917_v10, 16  ;;  %v427_v28 = vld [vmem:[#allocation2 + $0x80] sm:$0xff]  ;;  %v430_v29 = vld [vmem:[#allocation2 + $0x88] sm:$0x11] }
  0xbb   : > { %v615_v36 = vld [vmem:[#allocation2 + $0x60] sm:$0xff]  ;;  %v872_v37 = vrot.slane %v871_v31, 4  ;;  %v751_v38 = vld [vmem:[#allocation2 + $0x68] sm:$0x11] }
  0xbc   : > { %1663 = vmatpush1.bf16.msra.mxu0 %v8316_v42  ;;  %v893_v39 = vshrl.u32 %v615_v36, 16  ;;  %v896_v40 = vshll.u32 %v615_v36, 16  ;;  %v886_v42 = vrot.slane %v885_v34, 4  ;;  %v902_v43 = vshll.u32 %v751_v38, 16  ;;  %v616_v46 = vld [vmem:[#allocation2 + $0x70] sm:$0xff] }
  0xbd   : > { %1664 = vmatprep.subr.bf16.mxu0 %v8321_v51  ;;  %v9717_v45 = vsel %vm9628_vm3, %v872_v37, %v876_v32  ;;  %v752_v50 = vld [vmem:[#allocation2 + $0x78] sm:$0x11]  ;;  %v907_v51 = vshrl.u32 %v616_v46, 16  ;;  %v910_v52 = vshll.u32 %v616_v46, 16  ;;  %v349_v26 = vrot.slane %v347_v17, 7 }
  0xbe   : > { %v895_v47 = vrot.slane %v893_v39, 4  ;;  %v898_v48 = vrot.slane %v896_v40, 5  ;;  %v9721_v49 = vsel %vm9628_vm3, %v886_v42, %v890_v35  ;;  %v916_v57 = vshll.u32 %v752_v50, 16  ;;  %v8337_v35 = vld [vmem:[#allocation6 + $0x4b0] ss:$8 sps:$4 sm:$0xff]  }
  0xbf   : > { %v9725_v53 = vcombine.high %v9717_v45, %v9721_v49  ;;  %v9729_v54 = vcombine.low %v9717_v45, %v9721_v49  ;;  %v904_v58 = vrot.slane %v902_v43, 5  ;;  %v909_v59 = vrot.slane %v907_v51, 4  ;;  %v8342_v36 = vld [vmem:[#allocation6 + $0x4c4] ss:$8 sps:$4 sm:$0xff]   ;;  %v8340_v37 = vld [vmem:[#allocation6 + $0x4c0] ss:$8 sps:$4 sm:$0xff]  }
  0xc0   : > { %1665 = vmatpush1.bf16.msra.mxu0 %v8319_v2  ;;  %v899_v56 = vor.u32 %v898_v48, %v895_v47  ;;  %v912_v60 = vrot.slane %v910_v52, 5  ;;  %v918_v3 = vrot.slane %v916_v57, 5  ;;  %v352_v31 = vor.u32 %v350_v18, %v349_v26  ;;  %v8345_v38 = vld [vmem:[#allocation6 + $0x4d4] ss:$8 sps:$4 sm:$0xff]   ;;  %v8343_v42 = vld [vmem:[#allocation6 + $0x4d0] ss:$8 sps:$4 sm:$0xff]  }
  0xc1   : > { %1666 = vmatprep.subr.bf16.mxu0 %v8324_v7  ;;  %1633 = vmatprep.mubr.bf16.mxu0 %v9725_v53  ;;  %v353_v32 = vrot.slane %v349_v26, 4  ;;  %v8348_v47 = vld [vmem:[#allocation6 + $0x4e4] ss:$8 sps:$4 sm:$0xff]   ;;  %v8346_v51 = vld [vmem:[#allocation6 + $0x4e0] ss:$8 sps:$4 sm:$0xff]   ;;  %v7179_v63 = vcombine.high %v9701_v16, %v9717_v45 }
  0xc2   : > { %v900_v62 = vrot.slane %v899_v56, 4  ;;  %1634 = vmatmul.mubr.bf16.gmra.mrb[8].mxu0 %v9729_v54  ;;  %v913_v2 = vor.u32 %v912_v60, %v909_v59  ;;  %v8351_v52 = vld [vmem:[#allocation6 + $0x4f4] ss:$8 sps:$4 sm:$0xff]   ;;  %v8349_v60 = vld [vmem:[#allocation6 + $0x4f0] ss:$8 sps:$4 sm:$0xff]  }
  0xc3   : > { %v431_v34 = vsel %vm9572_vm13, %v353_v32, %v430_v29  ;;  %v440_v56 = vld [vmem:[#allocation2 + $0x90] sm:$0xff]  ;;  %v443_v57 = vld [vmem:[#allocation2 + $0x98] sm:$0x11] }
  0xc4   : > { %1667 = vmatpush1.bf16.msra.mxu0 %v8322_v30  ;;  %v9737_v7 = vsel %vm9628_vm3, %v900_v62, %v904_v58  ;;  %v914_v8 = vrot.slane %v913_v2, 4  ;;  %v8339_v30 = vld [vmem:[#allocation6 + $0x4b4] ss:$8 sps:$4 sm:$0xff]   ;;  %432 = vst [vmem:[#allocation2 + $0x88] sm:$0x11] %v431_v34  ;;  %v441_v58 = vsel %vm9566_vm12, %v9671_v11, %v440_v56  ;;  %v444_v59 = vsel %vm9572_vm13, %v345_v12, %v443_v57 }
  0xc5   : > { %1668 = vmatprep.subr.bf16.mxu0 %v8327_v33  ;;  %v428_v33 = vsel %vm9566_vm12, %v352_v31, %v427_v28  ;;  %442 = vst [vmem:[#allocation2 + $0x90] sm:$0xff] %v441_v58  ;;  %445 = vst [vmem:[#allocation2 + $0x98] sm:$0x11] %v444_v59  ;;  %v8352_v62 = vld [vmem:[#allocation6 + $0x500] ss:$8 sps:$4 sm:$0xff]   ;;  %v7174_v2 = vcombine.low %v9640_v9, %v9695_v1 }
  0xc6   : > { %v9741_v15 = vsel %vm9628_vm3, %v914_v8, %v918_v3  ;;  %429 = vst [vmem:[#allocation2 + $0x80] sm:$0xff] %v428_v33  ;;  %v8357_v11 = vld [vmem:[#allocation6 + $0x514] ss:$8 sps:$4 sm:$0xff]   ;;  %v8355_v17 = vld [vmem:[#allocation6 + $0x510] ss:$8 sps:$4 sm:$0xff]   ;;  %v7183_v33 = vcombine.high %v9721_v49, %v9737_v7 }
  0xc7   : > { %v9745_v19 = vcombine.high %v9737_v7, %v9741_v15  ;;  %v9749_v20 = vcombine.low %v9737_v7, %v9741_v15  ;;  %v8358_v31 = vld [vmem:[#allocation6 + $0x520] ss:$8 sps:$4 sm:$0xff]   ;;  %v8363_v32 = vld [vmem:[#allocation6 + $0x534] ss:$8 sps:$4 sm:$0xff]   ;;  %v8385_v56 = vld [vmem:[#allocation6 + $0x5b0] ss:$8 sps:$4 sm:$0xff]  }
  0xc8   : > { %1669 = vmatpush1.bf16.msra.mxu0 %v8325_v41  ;;  %v8390_v57 = vld [vmem:[#allocation6 + $0x5c4] ss:$8 sps:$4 sm:$0xff]   ;;  %v8388_v58 = vld [vmem:[#allocation6 + $0x5c0] ss:$8 sps:$4 sm:$0xff]   ;;  %v8391_v59 = vld [vmem:[#allocation6 + $0x5d0] ss:$8 sps:$4 sm:$0xff]  }
  0xc9   : > { %1670 = vmatprep.subr.bf16.mxu0 %v8330_v44  ;;  %1643 = vmatprep.mubr.bf16.mxu0 %v9745_v19 }
  0xca   : > { %1644 = vmatmul.mubr.bf16.gmra.mrb[12].mxu0 %v9749_v20 }
  0xcb   : > { %1686 = vmatprep.mubr.bf16.mxu0 %v7175_v24  ;;  %v603_v46 = vld [vmem:[#allocation2 + $0x88] sm:$0x11] }
  0xcc   : > { %1671 = vmatpush1.bf16.msra.mxu0 %v8328_v61  ;;  %v8354_v61 = vld [vmem:[#allocation6 + $0x504] ss:$8 sps:$4 sm:$0xff]   ;;  %v455_v10 = vld [vmem:[#allocation2 + $0x90] sm:$0x22]  ;;  %v606_v1 = vld [vmem:[#allocation2 + $0x98] sm:$0x11] }
  0xcd   : > { %1672 = vmatprep.subr.bf16.mxu0 %v8333_v0  ;;  %v454_v39 = vld [vmem:[#allocation2 + $0x80] sm:$0x22]  ;;  %v520_v40 = vld [vmem:[#allocation2 + $0x80] sm:$0x11]  ;;  %v534_v41 = vld [vmem:[#allocation2 + $0x80] sm:$0x88] }
  0xce   : > { %v7160_v43 = vrot.slane %v454_v39, 9  ;;  %v7170_v44 = vrot.slane %v534_v41, 11  ;;  %v7161_v18 = vrot.slane %v455_v10, 9  ;;  %v8360_v24 = vld [vmem:[#allocation6 + $0x524] ss:$8 sps:$4 sm:$0xff]  }
  0xcf   : > { %v8369_v39 = vld [vmem:[#allocation6 + $0x554] ss:$8 sps:$4 sm:$0xff]   ;;  %v8367_v41 = vld [vmem:[#allocation6 + $0x550] ss:$8 sps:$4 sm:$0xff]  }
  0xd0   : > { %1673 = vmatpush1.bf16.msra.mxu0 %v8331_v13  ;;  %v521_v48 = vsel %vm9572_vm13, %v7160_v43, %v520_v40  ;;  %v604_v50 = vsel %vm9604_vm0, %v7170_v44, %v603_v46  ;;  %v523_v13 = vld [vmem:[#allocation2 + $0x90] sm:$0x11]  ;;  %v8370_v44 = vld [vmem:[#allocation6 + $0x560] ss:$8 sps:$4 sm:$0xff]  }
  0xd1   : > { %1674 = vmatprep.subr.bf16.mxu0 %v8336_v14  ;;  %522 = vst [vmem:[#allocation2 + $0x80] sm:$0x11] %v521_v48  ;;  %605 = vst [vmem:[#allocation2 + $0x88] sm:$0x11] %v604_v50  ;;  %v535_v14 = vld [vmem:[#allocation2 + $0x90] sm:$0x88]  ;;  %v524_v28 = vsel %vm9572_vm13, %v7161_v18, %v523_v13 }
  0xd2   : > { %v7171_v9 = vrot.slane %v535_v14, 11  ;;  %525 = vst [vmem:[#allocation2 + $0x90] sm:$0x11] %v524_v28  ;;  %v8375_v46 = vld [vmem:[#allocation6 + $0x574] ss:$8 sps:$4 sm:$0xff]  }
  0xd3   : > { %v8381_v48 = vld [vmem:[#allocation6 + $0x594] ss:$8 sps:$4 sm:$0xff]   ;;  %v8379_v50 = vld [vmem:[#allocation6 + $0x590] ss:$8 sps:$4 sm:$0xff]   ;;  %v8408_v14 = vld [vmem:[#allocation6 + $0x24] ss:$8 sps:$4 sm:$0xff]  }
  0xd4   : > { %1675 = vmatpush1.bf16.msra.mxu0 %v8334_v25  ;;  %v607_v29 = vsel %vm9604_vm0, %v7171_v9, %v606_v1  ;;  %v8403_v13 = vld [vmem:[#allocation6 + $0x10] ss:$8 sps:$4 sm:$0xff]   ;;  %v8406_v9 = vld [vmem:[#allocation6 + $0x20] ss:$8 sps:$4 sm:$0xff]   ;;  %v8411_v1 = vld [vmem:[#allocation6 + $0x34] ss:$8 sps:$4 sm:$0xff]  }
  0xd5   : > { %1676 = vmatprep.subr.bf16.mxu0 %v8339_v30  ;;  %v7178_v30 = vcombine.low %v9701_v16, %v9717_v45  ;;  %608 = vst [vmem:[#allocation2 + $0x98] sm:$0x11] %v607_v29  ;;  %v7182_v45 = vcombine.low %v9721_v49, %v9737_v7  ;;  %v8373_v49 = vld [vmem:[#allocation6 + $0x570] ss:$8 sps:$4 sm:$0xff]   ;;  %v8378_v7 = vld [vmem:[#allocation6 + $0x584] ss:$8 sps:$4 sm:$0xff]  }
  0xd6   : > { %v8414_v28 = vld [vmem:[#allocation6 + $0x44] ss:$8 sps:$4 sm:$0xff]   ;;  %v8417_v29 = vld [vmem:[#allocation6 + $0x54] ss:$8 sps:$4 sm:$0xff]  }
  0xd8   : > { %1677 = vmatpush1.bf16.msra.mxu0 %v8337_v35  ;;  %v617_v0 = vld [vmem:[#allocation2 + $0x80] sm:$0xff]  ;;  %v753_v6 = vld [vmem:[#allocation2 + $0x88] sm:$0x11] }
  0xd9   : > { %1678 = vmatprep.subr.bf16.mxu0 %v8342_v36  ;;  %v921_v3 = vshrl.u32 %v617_v0, 16  ;;  %v924_v4 = vshll.u32 %v617_v0, 16  ;;  %v930_v26 = vshll.u32 %v753_v6, 16  ;;  %v8361_v36 = vld [vmem:[#allocation6 + $0x530] ss:$8 sps:$4 sm:$0xff]  }
  0xda   : > { %v618_v0 = vld [vmem:[#allocation2 + $0x90] sm:$0xff] }
  0xdb   : > { %v923_v12 = vrot.slane %v921_v3, 4  ;;  %v926_v8 = vrot.slane %v924_v4, 5  ;;  %v932_v35 = vrot.slane %v930_v26, 5  ;;  %v8402_v3 = vld [vmem:[#allocation6 + $0x4] ss:$8 sps:$4 sm:$0xff]   ;;  %v935_v4 = vshrl.u32 %v618_v0, 16 }
  0xdc   : > { %1679 = vmatpush1.bf16.msra.mxu0 %v8340_v37  ;;  %v8366_v37 = vld [vmem:[#allocation6 + $0x544] ss:$8 sps:$4 sm:$0xff]   ;;  %v8405_v6 = vld [vmem:[#allocation6 + $0x14] ss:$8 sps:$4 sm:$0xff]   ;;  %v8409_v26 = vld [vmem:[#allocation6 + $0x30] ss:$8 sps:$4 sm:$0xff]  }
  0xdd   : > { %1680 = vmatprep.subr.bf16.mxu0 %v8345_v38  ;;  %v927_v25 = vor.u32 %v926_v8, %v923_v12  ;;  %v8364_v38 = vld [vmem:[#allocation6 + $0x540] ss:$8 sps:$4 sm:$0xff]   ;;  %v754_v12 = vld [vmem:[#allocation2 + $0x98] sm:$0x11]  ;;  %v937_v8 = vrot.slane %v935_v4, 4 }
  0xde   : > { %v944_v18 = vshll.u32 %v754_v12, 16  ;;  %v8462_v12 = vld [vmem:[#allocation6 + $0x140] ss:$8 sps:$4 sm:$0xff]  }
  0xdf   : > { %v928_v34 = vrot.slane %v927_v25, 4 }
  0xe0   : > { %1681 = vmatpush1.bf16.msra.mxu0 %v8343_v42  ;;  %v8372_v42 = vld [vmem:[#allocation6 + $0x564] ss:$8 sps:$4 sm:$0xff]   ;;  %v946_v25 = vrot.slane %v944_v18, 5 }
  0xe1   : > { %1682 = vmatprep.subr.bf16.mxu0 %v8348_v47  ;;  %v9784_v16 = vsel %vm9628_vm3, %v928_v34, %v932_v35  ;;  %v8376_v47 = vld [vmem:[#allocation6 + $0x580] ss:$8 sps:$4 sm:$0xff]   ;;  %v9802_v34 = vld [vmem:[#allocation2 + $0x10] sm:$0xff]  ;;  %v8470_v18 = vld [vmem:[#allocation6 + $0x164] ss:$8 sps:$4 sm:$0xff]  }
  0xe2   : > { %v7187_v40 = vcombine.high %v9741_v15, %v9784_v16  ;;  %v7186_v43 = vcombine.low %v9741_v15, %v9784_v16  ;;  %v8382_v15 = vld [vmem:[#allocation6 + $0x5a0] ss:$8 sps:$4 sm:$0xff]  }
  0xe3   : > { %v9147_v35 = vld [vmem:[#allocation2] sm:$0xff] }
  0xe4   : > { %1683 = vmatpush1.bf16.msra.mxu0 %v8346_v51  ;;  %v8384_v51 = vld [vmem:[#allocation6 + $0x5a4] ss:$8 sps:$4 sm:$0xff]  }
  0xe5   : > { %1684 = vmatprep.subr.bf16.mxu0 %v8351_v52  ;;  %v8387_v52 = vld [vmem:[#allocation6 + $0x5b4] ss:$8 sps:$4 sm:$0xff]  }
  0xe8   : > { %1685 = vmatpush1.bf16.msra.mxu0 %v8349_v60  ;;  %v8396_v60 = vld [vmem:[#allocation6 + $0x5e4] ss:$8 sps:$4 sm:$0xff]  }
  0xe9   : > { %1727 = vmatprep.subr.bf16.mxu0 %v8354_v61  ;;  %v8394_v61 = vld [vmem:[#allocation6 + $0x5e0] ss:$8 sps:$4 sm:$0xff]  }
  0xeb   : > { %1687 = vmatmul.mubr.bf16.vlgmr.msra.gmra.mrb[0].mxu0 %v7174_v2  ;;  %v8397_v2 = vld [vmem:[#allocation6 + $0x5f0] ss:$8 sps:$4 sm:$0xff]  }
  0xec   : > { %1728 = vmatpush1.bf16.msra.mxu0 %v8352_v62  ;;  %1696 = vmatprep.mubr.bf16.mxu0 %v7179_v63  ;;  %v8399_v62 = vld [vmem:[#allocation6 + $0x5f4] ss:$8 sps:$4 sm:$0xff]   ;;  %v8400_v63 = vld [vmem:[#allocation6] ss:$8 sps:$4 sm:$0xff]  }
  0xed   : > { %1729 = vmatprep.subr.bf16.mxu0 %v8357_v11  ;;  %v938_v11 = vshll.u32 %v618_v0, 16  ;;  %v8461_v0 = vld [vmem:[#allocation6 + $0x134] ss:$8 sps:$4 sm:$0xff]  }
  0xef   : > { %v940_v10 = vrot.slane %v938_v11, 5  ;;  %v8459_v11 = vld [vmem:[#allocation6 + $0x130] ss:$8 sps:$4 sm:$0xff]  }
  0xf0   : > { %1730 = vmatpush1.bf16.msra.mxu0 %v8355_v17 }
  0xf1   : > { %1731 = vmatprep.subr.bf16.mxu0 %v8360_v24  ;;  %v941_v17 = vor.u32 %v940_v10, %v937_v8  ;;  %v8467_v8 = vld [vmem:[#allocation6 + $0x154] ss:$8 sps:$4 sm:$0xff]   ;;  %v9833_v10 = vld [vmem:[#allocation2 + $0x60] sm:$0xff] }
  0xf3   : > { %1697 = vmatmul.mubr.bf16.gmra.mrb[4].mxu0 %v7178_v30  ;;  %v942_v24 = vrot.slane %v941_v17, 4  ;;  %v8465_v17 = vld [vmem:[#allocation6 + $0x150] ss:$8 sps:$4 sm:$0xff]  }
  0xf4   : > { %1732 = vmatpush1.bf16.msra.mxu0 %v8358_v31  ;;  %1706 = vmatprep.mubr.bf16.mxu0 %v7183_v33  ;;  %v8415_v31 = vld [vmem:[#allocation6 + $0x50] ss:$8 sps:$4 sm:$0xff]   ;;  %v8423_v33 = vld [vmem:[#allocation6 + $0x74] ss:$8 sps:$4 sm:$0xff]  }
  0xf5   : > { %1733 = vmatprep.subr.bf16.mxu0 %v8363_v32 }
  0xf8   : > { %1734 = vmatpush1.bf16.msra.mxu0 %v8361_v36  ;;  %v7287_v36 = vcombine.high %v9147_v35, %v9802_v34 }
  0xf9   : > { %1735 = vmatprep.subr.bf16.mxu0 %v8366_v37  ;;  %v8421_v37 = vld [vmem:[#allocation6 + $0x70] ss:$8 sps:$4 sm:$0xff]  }
  0xfb   : > { %1707 = vmatmul.mubr.bf16.gmra.mrb[8].mxu0 %v7182_v45  ;;  %v8424_v45 = vld [vmem:[#allocation6 + $0x80] ss:$8 sps:$4 sm:$0xff]  }
  0xfc   : > { %1736 = vmatpush1.bf16.msra.mxu0 %v8364_v38  ;;  %1716 = vmatprep.mubr.bf16.mxu0 %v7187_v40  ;;  %v8429_v38 = vld [vmem:[#allocation6 + $0x94] ss:$8 sps:$4 sm:$0xff]   ;;  %v8430_v40 = vld [vmem:[#allocation6 + $0xa0] ss:$8 sps:$4 sm:$0xff]  }
  0xfd   : > { %1737 = vmatprep.subr.bf16.mxu0 %v8369_v39  ;;  %v8432_v39 = vld [vmem:[#allocation6 + $0xa4] ss:$8 sps:$4 sm:$0xff]  }
 0x100   : > { %1738 = vmatpush1.bf16.msra.mxu0 %v8367_v41  ;;  %v8435_v41 = vld [vmem:[#allocation6 + $0xb4] ss:$8 sps:$4 sm:$0xff]  }
 0x101   : > { %1739 = vmatprep.subr.bf16.mxu0 %v8372_v42  ;;  %v8433_v42 = vld [vmem:[#allocation6 + $0xb0] ss:$8 sps:$4 sm:$0xff]  }
 0x103   : > { %1717 = vmatmul.mubr.bf16.gmra.mrb[12].mxu0 %v7186_v43  ;;  %v8438_v43 = vld [vmem:[#allocation6 + $0xc4] ss:$8 sps:$4 sm:$0xff]  }
 0x104   : > { %1740 = vmatpush1.bf16.msra.mxu0 %v8370_v44  ;;  %1759 = vmatprep.mubr.bf16.mxu0 %v9707_v21  ;;  %v8393_v21 = vld [vmem:[#allocation6 + $0x5d4] ss:$8 sps:$4 sm:$0xff]   ;;  %v8436_v44 = vld [vmem:[#allocation6 + $0xc0] ss:$8 sps:$4 sm:$0xff]  }
 0x105   : > { %1741 = vmatprep.subr.bf16.mxu0 %v8375_v46  ;;  %v8441_v46 = vld [vmem:[#allocation6 + $0xd4] ss:$8 sps:$4 sm:$0xff]  }
 0x108   : > { %1742 = vmatpush1.bf16.msra.mxu0 %v8373_v49  ;;  %v8439_v49 = vld [vmem:[#allocation6 + $0xd0] ss:$8 sps:$4 sm:$0xff]  }
 0x109   : > { %1743 = vmatprep.subr.bf16.mxu0 %v8378_v7  ;;  %v8444_v7 = vld [vmem:[#allocation6 + $0xe4] ss:$8 sps:$4 sm:$0xff]  }
 0x10c   : > { %1744 = vmatpush1.bf16.msra.mxu0 %v8376_v47  ;;  %v8442_v47 = vld [vmem:[#allocation6 + $0xe0] ss:$8 sps:$4 sm:$0xff]  }
 0x10d   : > { %1745 = vmatprep.subr.bf16.mxu0 %v8381_v48  ;;  %v8447_v48 = vld [vmem:[#allocation6 + $0xf4] ss:$8 sps:$4 sm:$0xff]  }
 0x110   : > { %1746 = vmatpush1.bf16.msra.mxu0 %v8379_v50  ;;  %v8445_v50 = vld [vmem:[#allocation6 + $0xf0] ss:$8 sps:$4 sm:$0xff]  }
 0x111   : > { %1747 = vmatprep.subr.bf16.mxu0 %v8384_v51  ;;  %v8451_v51 = vld [vmem:[#allocation6 + $0x104] ss:$8 sps:$4 sm:$0xff]  }
 0x114   : > { %1748 = vmatpush1.bf16.msra.mxu0 %v8382_v15  ;;  %v7286_v15 = vcombine.low %v9147_v35, %v9802_v34  ;;  %v8493_v35 = vld [vmem:[#allocation6 + $0x1d4] ss:$8 sps:$4 sm:$0xff]  }
 0x115   : > { %1749 = vmatprep.subr.bf16.mxu0 %v8387_v52  ;;  %v8449_v52 = vld [vmem:[#allocation6 + $0x100] ss:$8 sps:$4 sm:$0xff]  }
 0x118   : > { %1750 = vmatpush1.bf16.msra.mxu0 %v8385_v56  ;;  %v8455_v56 = vld [vmem:[#allocation6 + $0x114] ss:$8 sps:$4 sm:$0xff]  }
 0x119   : > { %1751 = vmatprep.subr.bf16.mxu0 %v8390_v57  ;;  %v9806_v57 = vld [vmem:[#allocation2 + $0x20] sm:$0xff] }
 0x11c   : > { %1752 = vmatpush1.bf16.msra.mxu0 %v8388_v58  ;;  %v9808_v58 = vld [vmem:[#allocation2 + $0x30] sm:$0xff] }
 0x11d   : > { %1753 = vmatprep.subr.bf16.mxu0 %v8393_v21  ;;  %v9812_v21 = vcombine.high %v9806_v57, %v9808_v58 }
 0x120   : > { %1754 = vmatpush1.bf16.msra.mxu0 %v8391_v59  ;;  %v8453_v59 = vld [vmem:[#allocation6 + $0x110] ss:$8 sps:$4 sm:$0xff]  }
 0x121   : > { %1755 = vmatprep.subr.bf16.mxu0 %v8396_v60  ;;  %v8458_v60 = vld [vmem:[#allocation6 + $0x124] ss:$8 sps:$4 sm:$0xff]  }
 0x124   : > { %1756 = vmatpush1.bf16.msra.mxu0 %v8394_v61  ;;  %v9817_v61 = vcombine.low %v9806_v57, %v9808_v58 }
 0x125   : > { %1757 = vmatprep.subr.bf16.mxu0 %v8399_v62  ;;  %v8456_v62 = vld [vmem:[#allocation6 + $0x120] ss:$8 sps:$4 sm:$0xff]  }
 0x128   : > { %1758 = vmatpush1.bf16.msra.mxu0 %v8397_v2  ;;  %v9819_v2 = vld [vmem:[#allocation2 + $0x40] sm:$0xff] }
 0x129   : > { %2316 = vmatprep.subr.bf16.mxu0 %v8402_v3  ;;  %v9821_v3 = vld [vmem:[#allocation2 + $0x50] sm:$0xff] }
 0x12a   : > { %v9825_v4 = vcombine.high %v9819_v2, %v9821_v3 }
 0x12b   : > { %1760 = vmatmul.mubr.bf16.vlgmr.msra.gmra.mrb[0].mxu0 %v9711_v22  ;;  %v947_v22 = vsel %vm9628_vm3, %v942_v24, %v946_v25  ;;  %v8473_v24 = vld [vmem:[#allocation6 + $0x174] ss:$8 sps:$4 sm:$0xff]   ;;  %v7289_v25 = vcombine.high %v9802_v34, %v9806_v57 }
 0x12c   : > { %2317 = vmatpush1.bf16.msra.mxu0 %v8400_v63  ;;  %1769 = vmatprep.mubr.bf16.mxu0 %v9725_v53  ;;  %v8412_v53 = vld [vmem:[#allocation6 + $0x40] ss:$8 sps:$4 sm:$0xff]   ;;  %v7189_v30 = vcombine.high %v9784_v16, %v947_v22  ;;  %v7188_v32 = vcombine.low %v9784_v16, %v947_v22  ;;  %v8427_v16 = vld [vmem:[#allocation6 + $0x90] ss:$8 sps:$4 sm:$0xff]   ;;  %v8464_v63 = vld [vmem:[#allocation6 + $0x144] ss:$8 sps:$4 sm:$0xff]  }
 0x12d   : > { %2318 = vmatprep.subr.bf16.mxu0 %v8405_v6  ;;  %v9831_v6 = vcombine.low %v9819_v2, %v9821_v3  ;;  %v8474_v22 = vld [vmem:[#allocation6 + $0x180] ss:$8 sps:$4 sm:$0xff]  }
 0x130   : > { %2319 = vmatpush1.bf16.msra.mxu0 %v8403_v13  ;;  %v9835_v13 = vld [vmem:[#allocation2 + $0x70] sm:$0xff] }
 0x131   : > { %2320 = vmatprep.subr.bf16.mxu0 %v8408_v14  ;;  %v9839_v14 = vcombine.high %v9833_v10, %v9835_v13 }
 0x133   : > { %1770 = vmatmul.mubr.bf16.gmra.mrb[4].mxu0 %v9729_v54  ;;  %v8420_v54 = vld [vmem:[#allocation6 + $0x64] ss:$8 sps:$4 sm:$0xff]  }
 0x134   : > { %2321 = vmatpush1.bf16.msra.mxu0 %v8406_v9  ;;  %1779 = vmatprep.mubr.bf16.mxu0 %v9745_v19  ;;  %v8418_v19 = vld [vmem:[#allocation6 + $0x60] ss:$8 sps:$4 sm:$0xff]   ;;  %v9845_v9 = vcombine.low %v9833_v10, %v9835_v13 }
 0x135   : > { %2322 = vmatprep.subr.bf16.mxu0 %v8411_v1  ;;  %v8468_v1 = vld [vmem:[#allocation6 + $0x160] ss:$8 sps:$4 sm:$0xff]  }
 0x138   : > { %2323 = vmatpush1.bf16.msra.mxu0 %v8409_v26  ;;  %v8471_v26 = vld [vmem:[#allocation6 + $0x170] ss:$8 sps:$4 sm:$0xff]  }
 0x139   : > { %2324 = vmatprep.subr.bf16.mxu0 %v8414_v28  ;;  %v8476_v28 = vld [vmem:[#allocation6 + $0x184] ss:$8 sps:$4 sm:$0xff]  }
 0x13b   : > { %1780 = vmatmul.mubr.bf16.gmra.mrb[8].mxu0 %v9749_v20  ;;  %v8426_v20 = vld [vmem:[#allocation6 + $0x84] ss:$8 sps:$4 sm:$0xff]  }
 0x13c   : > { %2325 = vmatpush1.bf16.msra.mxu0 %v8412_v53  ;;  %1789 = vmatprep.mubr.bf16.mxu0 %v7189_v30  ;;  %v8479_v53 = vld [vmem:[#allocation6 + $0x194] ss:$8 sps:$4 sm:$0xff]   ;;  %v8482_v30 = vld [vmem:[#allocation6 + $0x1a4] ss:$8 sps:$4 sm:$0xff]  }
 0x13d   : > { %2326 = vmatprep.subr.bf16.mxu0 %v8417_v29  ;;  %v8477_v29 = vld [vmem:[#allocation6 + $0x190] ss:$8 sps:$4 sm:$0xff]  }
 0x140   : > { %2327 = vmatpush1.bf16.msra.mxu0 %v8415_v31  ;;  %v8480_v31 = vld [vmem:[#allocation6 + $0x1a0] ss:$8 sps:$4 sm:$0xff]  }
 0x141   : > { %2328 = vmatprep.subr.bf16.mxu0 %v8420_v54  ;;  %v8485_v54 = vld [vmem:[#allocation6 + $0x1b4] ss:$8 sps:$4 sm:$0xff]  }
 0x143   : > { %1790 = vmatmul.mubr.bf16.gmra.mrb[12].mxu0 %v7188_v32  ;;  %v8483_v32 = vld [vmem:[#allocation6 + $0x1b0] ss:$8 sps:$4 sm:$0xff]  }
 0x144   : > { %2329 = vmatpush1.bf16.msra.mxu0 %v8418_v19  ;;  %2348 = vmatprep.mubr.bf16.mxu0 %v7287_v36  ;;  %v8489_v19 = vld [vmem:[#allocation6 + $0x1c4] ss:$8 sps:$4 sm:$0xff]   ;;  %v8491_v36 = vld [vmem:[#allocation6 + $0x1d0] ss:$8 sps:$4 sm:$0xff]  }
 0x145   : > { %2330 = vmatprep.subr.bf16.mxu0 %v8423_v33  ;;  %v8487_v33 = vld [vmem:[#allocation6 + $0x1c0] ss:$8 sps:$4 sm:$0xff]  }
 0x148   : > { %2331 = vmatpush1.bf16.msra.mxu0 %v8421_v37  ;;  %v8497_v37 = vld [vmem:[#allocation6 + $0x1e4] ss:$8 sps:$4 sm:$0xff]  }
 0x149   : > { %2332 = vmatprep.subr.bf16.mxu0 %v8426_v20  ;;  %v8495_v20 = vld [vmem:[#allocation6 + $0x1e0] ss:$8 sps:$4 sm:$0xff]  }
 0x14c   : > { %2333 = vmatpush1.bf16.msra.mxu0 %v8424_v45  ;;  %v8501_v45 = vld [vmem:[#allocation6 + $0x1f4] ss:$8 sps:$4 sm:$0xff]  }
 0x14d   : > { %2334 = vmatprep.subr.bf16.mxu0 %v8429_v38  ;;  %v8499_v38 = vld [vmem:[#allocation6 + $0x1f0] ss:$8 sps:$4 sm:$0xff]  }
 0x150   : > { %2335 = vmatpush1.bf16.msra.mxu0 %v8427_v16  ;;  %v8505_v16 = vld [vmem:[#allocation6 + $0x204] ss:$8 sps:$4 sm:$0xff]  }
 0x151   : > { %2336 = vmatprep.subr.bf16.mxu0 %v8432_v39  ;;  %v7288_v39 = vcombine.low %v9802_v34, %v9806_v57  ;;  %v7297_v34 = vcombine.high %v9821_v3, %v9833_v10  ;;  %v8519_v57 = vld [vmem:[#allocation6 + $0x250] ss:$8 sps:$4 sm:$0xff]  }
 0x154   : > { %2337 = vmatpush1.bf16.msra.mxu0 %v8430_v40  ;;  %v8503_v40 = vld [vmem:[#allocation6 + $0x200] ss:$8 sps:$4 sm:$0xff]  }
 0x155   : > { %2338 = vmatprep.subr.bf16.mxu0 %v8435_v41  ;;  %v7293_v41 = vcombine.high %v9808_v58, %v9819_v2 }
 0x158   : > { %2339 = vmatpush1.bf16.msra.mxu0 %v8433_v42  ;;  %v8509_v42 = vld [vmem:[#allocation6 + $0x214] ss:$8 sps:$4 sm:$0xff]  }
 0x159   : > { %2340 = vmatprep.subr.bf16.mxu0 %v8438_v43  ;;  %v8507_v43 = vld [vmem:[#allocation6 + $0x210] ss:$8 sps:$4 sm:$0xff]  }
 0x15c   : > { %2341 = vmatpush1.bf16.msra.mxu0 %v8436_v44  ;;  %v8512_v44 = vld [vmem:[#allocation6 + $0x224] ss:$8 sps:$4 sm:$0xff]  }
 0x15d   : > { %2342 = vmatprep.subr.bf16.mxu0 %v8441_v46  ;;  %v7292_v46 = vcombine.low %v9808_v58, %v9819_v2  ;;  %v8524_v58 = vld [vmem:[#allocation6 + $0x264] ss:$8 sps:$4 sm:$0xff]  }
 0x15e   : > { %v8530_v2 = vld [vmem:[#allocation6 + $0x284] ss:$8 sps:$4 sm:$0xff]  }
 0x160   : > { %2343 = vmatpush1.bf16.msra.mxu0 %v8439_v49  ;;  %v8510_v49 = vld [vmem:[#allocation6 + $0x220] ss:$8 sps:$4 sm:$0xff]  }
 0x161   : > { %2344 = vmatprep.subr.bf16.mxu0 %v8444_v7  ;;  %v8515_v7 = vld [vmem:[#allocation6 + $0x234] ss:$8 sps:$4 sm:$0xff]  }
 0x164   : > { %2345 = vmatpush1.bf16.msra.mxu0 %v8442_v47  ;;  %v8513_v47 = vld [vmem:[#allocation6 + $0x230] ss:$8 sps:$4 sm:$0xff]  }
 0x165   : > { %2346 = vmatprep.subr.bf16.mxu0 %v8447_v48  ;;  %v8518_v48 = vld [vmem:[#allocation6 + $0x244] ss:$8 sps:$4 sm:$0xff]  }
 0x168   : > { %2347 = vmatpush1.bf16.msra.mxu0 %v8445_v50  ;;  %v7296_v50 = vcombine.low %v9821_v3, %v9833_v10  ;;  %v8528_v3 = vld [vmem:[#allocation6 + $0x280] ss:$8 sps:$4 sm:$0xff]   ;;  %v8539_v10 = vld [vmem:[#allocation6 + $0x2b4] ss:$8 sps:$4 sm:$0xff]  }
 0x169   : > { %2389 = vmatprep.subr.bf16.mxu0 %v8451_v51  ;;  %v8516_v51 = vld [vmem:[#allocation6 + $0x240] ss:$8 sps:$4 sm:$0xff]  }
 0x16b   : > { %2349 = vmatmul.mubr.bf16.vlgmr.msra.gmra.mrb[0].mxu0 %v7286_v15  ;;  %v9860_v15 = vld [vmem:[#allocation2 + $0x80] sm:$0xff] }
 0x16c   : > { %2390 = vmatpush1.bf16.msra.mxu0 %v8449_v52  ;;  %2358 = vmatprep.mubr.bf16.mxu0 %v9812_v21  ;;  %v7301_v52 = vcombine.high %v9835_v13, %v9860_v15 }
 0x16d   : > { %2391 = vmatprep.subr.bf16.mxu0 %v8455_v56  ;;  %v8521_v56 = vld [vmem:[#allocation6 + $0x254] ss:$8 sps:$4 sm:$0xff]  }
 0x170   : > { %2392 = vmatpush1.bf16.msra.mxu0 %v8453_v59  ;;  %v7300_v59 = vcombine.low %v9835_v13, %v9860_v15  ;;  %v8537_v13 = vld [vmem:[#allocation6 + $0x2b0] ss:$8 sps:$4 sm:$0xff]  }
 0x171   : > { %2393 = vmatprep.subr.bf16.mxu0 %v8458_v60  ;;  %v8522_v60 = vld [vmem:[#allocation6 + $0x260] ss:$8 sps:$4 sm:$0xff]  }
 0x173   : > { %2359 = vmatmul.mubr.bf16.gmra.mrb[4].mxu0 %v9817_v61 }
 0x174   : > { %2394 = vmatpush1.bf16.msra.mxu0 %v8456_v62  ;;  %2368 = vmatprep.mubr.bf16.mxu0 %v9825_v4  ;;  %v8527_v62 = vld [vmem:[#allocation6 + $0x274] ss:$8 sps:$4 sm:$0xff]  }
 0x175   : > { %2395 = vmatprep.subr.bf16.mxu0 %v8461_v0  ;;  %v8525_v0 = vld [vmem:[#allocation6 + $0x270] ss:$8 sps:$4 sm:$0xff]  }
 0x178   : > { %2396 = vmatpush1.bf16.msra.mxu0 %v8459_v11  ;;  %v8533_v11 = vld [vmem:[#allocation6 + $0x294] ss:$8 sps:$4 sm:$0xff]  }
 0x179   : > { %2397 = vmatprep.subr.bf16.mxu0 %v8464_v63  ;;  %v8531_v63 = vld [vmem:[#allocation6 + $0x290] ss:$8 sps:$4 sm:$0xff]  }
 0x17b   : > { %2369 = vmatmul.mubr.bf16.gmra.mrb[8].mxu0 %v9831_v6 }
 0x17c   : > { %2398 = vmatpush1.bf16.msra.mxu0 %v8462_v12  ;;  %2378 = vmatprep.mubr.bf16.mxu0 %v9839_v14  ;;  %v8536_v12 = vld [vmem:[#allocation6 + $0x2a4] ss:$8 sps:$4 sm:$0xff]  }
 0x17d   : > { %2399 = vmatprep.subr.bf16.mxu0 %v8467_v8  ;;  %v8534_v8 = vld [vmem:[#allocation6 + $0x2a0] ss:$8 sps:$4 sm:$0xff]  }
 0x180   : > { %2400 = vmatpush1.bf16.msra.mxu0 %v8465_v17  ;;  %v8542_v17 = vld [vmem:[#allocation6 + $0x2c4] ss:$8 sps:$4 sm:$0xff]  }
 0x181   : > { %2401 = vmatprep.subr.bf16.mxu0 %v8470_v18  ;;  %v8545_v18 = vld [vmem:[#allocation6 + $0x2d4] ss:$8 sps:$4 sm:$0xff]  }
 0x183   : > { %2379 = vmatmul.mubr.bf16.gmra.mrb[12].mxu0 %v9845_v9 }
 0x184   : > { %2402 = vmatpush1.bf16.msra.mxu0 %v8468_v1  ;;  %2421 = vmatprep.mubr.bf16.mxu0 %v7289_v25  ;;  %v8543_v1 = vld [vmem:[#allocation6 + $0x2d0] ss:$8 sps:$4 sm:$0xff]   ;;  %v8546_v25 = vld [vmem:[#allocation6 + $0x2e0] ss:$8 sps:$4 sm:$0xff]  }
 0x185   : > { %2403 = vmatprep.subr.bf16.mxu0 %v8473_v24  ;;  %v8548_v24 = vld [vmem:[#allocation6 + $0x2e4] ss:$8 sps:$4 sm:$0xff]  }
 0x188   : > { %2404 = vmatpush1.bf16.msra.mxu0 %v8471_v26  ;;  %v8551_v26 = vld [vmem:[#allocation6 + $0x2f4] ss:$8 sps:$4 sm:$0xff]  }
 0x189   : > { %2405 = vmatprep.subr.bf16.mxu0 %v8476_v28  ;;  %v8549_v28 = vld [vmem:[#allocation6 + $0x2f0] ss:$8 sps:$4 sm:$0xff]  }
 0x18c   : > { %2406 = vmatpush1.bf16.msra.mxu0 %v8474_v22  ;;  %v8554_v22 = vld [vmem:[#allocation6 + $0x604] ss:$8 sps:$4 sm:$0xff]  }
 0x18d   : > { %2407 = vmatprep.subr.bf16.mxu0 %v8479_v53  ;;  %v8552_v53 = vld [vmem:[#allocation6 + $0x600] ss:$8 sps:$4 sm:$0xff]  }
 0x190   : > { %2408 = vmatpush1.bf16.msra.mxu0 %v8477_v29  ;;  %v8557_v29 = vld [vmem:[#allocation6 + $0x614] ss:$8 sps:$4 sm:$0xff]  }
 0x191   : > { %2409 = vmatprep.subr.bf16.mxu0 %v8482_v30  ;;  %v8555_v30 = vld [vmem:[#allocation6 + $0x610] ss:$8 sps:$4 sm:$0xff]  }
 0x194   : > { %2410 = vmatpush1.bf16.msra.mxu0 %v8480_v31  ;;  %v8560_v31 = vld [vmem:[#allocation6 + $0x624] ss:$8 sps:$4 sm:$0xff]  }
 0x195   : > { %2411 = vmatprep.subr.bf16.mxu0 %v8485_v54  ;;  %v8558_v54 = vld [vmem:[#allocation6 + $0x620] ss:$8 sps:$4 sm:$0xff]  }
 0x198   : > { %2412 = vmatpush1.bf16.msra.mxu0 %v8483_v32  ;;  %v8563_v32 = vld [vmem:[#allocation6 + $0x634] ss:$8 sps:$4 sm:$0xff]  }
 0x199   : > { %2413 = vmatprep.subr.bf16.mxu0 %v8489_v19  ;;  %v8561_v19 = vld [vmem:[#allocation6 + $0x630] ss:$8 sps:$4 sm:$0xff]  }
 0x19c   : > { %2414 = vmatpush1.bf16.msra.mxu0 %v8487_v33  ;;  %v8566_v33 = vld [vmem:[#allocation6 + $0x644] ss:$8 sps:$4 sm:$0xff]  }
 0x19d   : > { %2415 = vmatprep.subr.bf16.mxu0 %v8493_v35  ;;  %v2535_v35 = vld [vmem:[#allocation2] sm:$0xee] }
 0x1a0   : > { %2416 = vmatpush1.bf16.msra.mxu0 %v8491_v36  ;;  %v9155_v36 = vld [vmem:[#allocation2 + $0x90] sm:$0xff] }
 0x1a1   : > { %2417 = vmatprep.subr.bf16.mxu0 %v8497_v37  ;;  %v7303_v37 = vcombine.high %v9860_v15, %v9155_v36 }
 0x1a4   : > { %2418 = vmatpush1.bf16.msra.mxu0 %v8495_v20  ;;  %v8569_v20 = vld [vmem:[#allocation6 + $0x654] ss:$8 sps:$4 sm:$0xff]  }
 0x1a5   : > { %2419 = vmatprep.subr.bf16.mxu0 %v8501_v45  ;;  %v7400_v45 = vrot.slane %v2535_v35, 9 }
 0x1a8   : > { %2420 = vmatpush1.bf16.msra.mxu0 %v8499_v38  ;;  %v9156_v38 = vld [vmem:[#allocation2 + $0x8] sm:$0x11] }
 0x1a9   : > { %2462 = vmatprep.subr.bf16.mxu0 %v8505_v16 }
 0x1ab   : > { %2422 = vmatmul.mubr.bf16.vlgmr.msra.gmra.mrb[0].mxu0 %v7288_v39  ;;  %v9157_v39 = vld [vmem:[#allocation2 + $0x18] sm:$0x11] }
 0x1ac   : > { %2463 = vmatpush1.bf16.msra.mxu0 %v8503_v40  ;;  %2431 = vmatprep.mubr.bf16.mxu0 %v7293_v41  ;;  %v2594_v40 = vrot.slane %v9157_v39, 5  ;;  %v8567_v41 = vld [vmem:[#allocation6 + $0x650] ss:$8 sps:$4 sm:$0xff]   ;;  %v8611_v39 = vld [vmem:[#allocation6 + $0x734] ss:$8 sps:$4 sm:$0xff]  }
 0x1ad   : > { %2464 = vmatprep.subr.bf16.mxu0 %v8509_v42  ;;  %v8572_v42 = vld [vmem:[#allocation6 + $0x664] ss:$8 sps:$4 sm:$0xff]  }
 0x1b0   : > { %2465 = vmatpush1.bf16.msra.mxu0 %v8507_v43 }
 0x1b1   : > { %2466 = vmatprep.subr.bf16.mxu0 %v8512_v44 }
 0x1b3   : > { %2432 = vmatmul.mubr.bf16.gmra.mrb[4].mxu0 %v7292_v46  ;;  %v7302_v46 = vcombine.low %v9860_v15, %v9155_v36  ;;  %v8584_v15 = vld [vmem:[#allocation6 + $0x6a4] ss:$8 sps:$4 sm:$0xff]  }
 0x1b4   : > { %2467 = vmatpush1.bf16.msra.mxu0 %v8510_v49  ;;  %2441 = vmatprep.mubr.bf16.mxu0 %v7297_v34  ;;  %v8570_v49 = vld [vmem:[#allocation6 + $0x660] ss:$8 sps:$4 sm:$0xff]   ;;  %v8575_v34 = vld [vmem:[#allocation6 + $0x674] ss:$8 sps:$4 sm:$0xff]  }
 0x1b5   : > { %2468 = vmatprep.subr.bf16.mxu0 %v8515_v7  ;;  %v8573_v7 = vld [vmem:[#allocation6 + $0x670] ss:$8 sps:$4 sm:$0xff]  }
 0x1b8   : > { %2469 = vmatpush1.bf16.msra.mxu0 %v8513_v47  ;;  %v8578_v47 = vld [vmem:[#allocation6 + $0x684] ss:$8 sps:$4 sm:$0xff]  }
 0x1b9   : > { %2470 = vmatprep.subr.bf16.mxu0 %v8518_v48  ;;  %v8576_v48 = vld [vmem:[#allocation6 + $0x680] ss:$8 sps:$4 sm:$0xff]  }
 0x1bb   : > { %2442 = vmatmul.mubr.bf16.gmra.mrb[8].mxu0 %v7296_v50  ;;  %v8581_v50 = vld [vmem:[#allocation6 + $0x694] ss:$8 sps:$4 sm:$0xff]  }
 0x1bc   : > { %2471 = vmatpush1.bf16.msra.mxu0 %v8516_v51  ;;  %2451 = vmatprep.mubr.bf16.mxu0 %v7301_v52  ;;  %v8579_v51 = vld [vmem:[#allocation6 + $0x690] ss:$8 sps:$4 sm:$0xff]   ;;  %v8582_v52 = vld [vmem:[#allocation6 + $0x6a0] ss:$8 sps:$4 sm:$0xff]  }
 0x1bd   : > { %2472 = vmatprep.subr.bf16.mxu0 %v8521_v56  ;;  %v8587_v56 = vld [vmem:[#allocation6 + $0x6b4] ss:$8 sps:$4 sm:$0xff]  }
 0x1c0   : > { %2473 = vmatpush1.bf16.msra.mxu0 %v8519_v57  ;;  %v8585_v57 = vld [vmem:[#allocation6 + $0x6b0] ss:$8 sps:$4 sm:$0xff]  }
 0x1c1   : > { %2474 = vmatprep.subr.bf16.mxu0 %v8524_v58  ;;  %v8590_v58 = vld [vmem:[#allocation6 + $0x6c4] ss:$8 sps:$4 sm:$0xff]  }
 0x1c3   : > { %2452 = vmatmul.mubr.bf16.gmra.mrb[12].mxu0 %v7300_v59  ;;  %v8588_v59 = vld [vmem:[#allocation6 + $0x6c0] ss:$8 sps:$4 sm:$0xff]  }
 0x1c4   : > { %2475 = vmatpush1.bf16.msra.mxu0 %v8522_v60  ;;  %2494 = vmatprep.mubr.bf16.mxu0 %v9812_v21  ;;  %v8540_v21 = vld [vmem:[#allocation6 + $0x2c0] ss:$8 sps:$4 sm:$0xff]   ;;  %v8593_v60 = vld [vmem:[#allocation6 + $0x6d4] ss:$8 sps:$4 sm:$0xff]  }
 0x1c5   : > { %2476 = vmatprep.subr.bf16.mxu0 %v8527_v62  ;;  %v8591_v62 = vld [vmem:[#allocation6 + $0x6d0] ss:$8 sps:$4 sm:$0xff]  }
 0x1c8   : > { %2477 = vmatpush1.bf16.msra.mxu0 %v8525_v0  ;;  %v8596_v0 = vld [vmem:[#allocation6 + $0x6e4] ss:$8 sps:$4 sm:$0xff]  }
 0x1c9   : > { %2478 = vmatprep.subr.bf16.mxu0 %v8530_v2  ;;  %v2537_v2 = vld [vmem:[#allocation2 + $0x20] sm:$0xee] }
 0x1cc   : > { %2479 = vmatpush1.bf16.msra.mxu0 %v8528_v3  ;;  %v2538_v3 = vld [vmem:[#allocation2 + $0x30] sm:$0xee] }
 0x1cd   : > { %2480 = vmatprep.subr.bf16.mxu0 %v8533_v11  ;;  %v8594_v11 = vld [vmem:[#allocation6 + $0x6e0] ss:$8 sps:$4 sm:$0xff]  }
 0x1d0   : > { %2481 = vmatpush1.bf16.msra.mxu0 %v8531_v63  ;;  %v8599_v63 = vld [vmem:[#allocation6 + $0x6f4] ss:$8 sps:$4 sm:$0xff]  }
 0x1d1   : > { %2482 = vmatprep.subr.bf16.mxu0 %v8536_v12  ;;  %v7402_v12 = vrot.slane %v2537_v2, 9  ;;  %v8624_v2 = vld [vmem:[#allocation6 + $0x780] ss:$8 sps:$4 sm:$0xff]  }
 0x1d4   : > { %2483 = vmatpush1.bf16.msra.mxu0 %v8534_v8  ;;  %v9158_v8 = vld [vmem:[#allocation2 + $0x28] sm:$0x11] }
 0x1d5   : > { %2484 = vmatprep.subr.bf16.mxu0 %v8539_v10  ;;  %v2598_v10 = vrot.slane %v9158_v8, 5  ;;  %v8635_v8 = vld [vmem:[#allocation6 + $0x7b4] ss:$8 sps:$4 sm:$0xff]  }
 0x1d8   : > { %2485 = vmatpush1.bf16.msra.mxu0 %v8537_v13  ;;  %v7403_v13 = vrot.slane %v2538_v3, 9  ;;  %v8629_v3 = vld [vmem:[#allocation6 + $0x794] ss:$8 sps:$4 sm:$0xff]  }
 0x1d9   : > { %2486 = vmatprep.subr.bf16.mxu0 %v8542_v17  ;;  %v9159_v17 = vld [vmem:[#allocation2 + $0x38] sm:$0x11] }
 0x1dc   : > { %2487 = vmatpush1.bf16.msra.mxu0 %v8540_v21  ;;  %v2602_v21 = vrot.slane %v9159_v17, 5  ;;  %v8636_v17 = vld [vmem:[#allocation6 + $0x7c0] ss:$8 sps:$4 sm:$0xff]  }
 0x1dd   : > { %2488 = vmatprep.subr.bf16.mxu0 %v8545_v18  ;;  %v8597_v18 = vld [vmem:[#allocation6 + $0x6f0] ss:$8 sps:$4 sm:$0xff]  }
 0x1e0   : > { %2489 = vmatpush1.bf16.msra.mxu0 %v8543_v1  ;;  %v8602_v1 = vld [vmem:[#allocation6 + $0x704] ss:$8 sps:$4 sm:$0xff]  }
 0x1e1   : > { %2490 = vmatprep.subr.bf16.mxu0 %v8548_v24  ;;  %v9890_v24 = vsel %vm9872_vm6, %v7402_v12, %v2598_v10  ;;  %v8630_v12 = vld [vmem:[#allocation6 + $0x7a0] ss:$8 sps:$4 sm:$0xff]   ;;  %v8633_v10 = vld [vmem:[#allocation6 + $0x7b0] ss:$8 sps:$4 sm:$0xff]  }
 0x1e4   : > { %2491 = vmatpush1.bf16.msra.mxu0 %v8546_v25  ;;  %v9894_v25 = vsel %vm9872_vm6, %v7403_v13, %v2602_v21  ;;  %v8638_v13 = vld [vmem:[#allocation6 + $0x7c4] ss:$8 sps:$4 sm:$0xff]   ;;  %v8641_v21 = vld [vmem:[#allocation6 + $0x7d4] ss:$8 sps:$4 sm:$0xff]  }
 0x1e5   : > { %2492 = vmatprep.subr.bf16.mxu0 %v8551_v26  ;;  %v2539_v26 = vld [vmem:[#allocation2 + $0x40] sm:$0xee] }
 0x1e8   : > { %2493 = vmatpush1.bf16.msra.mxu0 %v8549_v28  ;;  %v2540_v28 = vld [vmem:[#allocation2 + $0x50] sm:$0xee] }
 0x1e9   : > { %3261 = vmatprep.subr.bf16.mxu0 %v8554_v22 }
 0x1eb   : > { %2495 = vmatmul.mubr.bf16.vlgmr.msra.gmra.mrb[0].mxu0 %v9817_v61  ;;  %v2536_v61 = vld [vmem:[#allocation2 + $0x10] sm:$0xee] }
 0x1ec   : > { %3262 = vmatpush1.bf16.msra.mxu0 %v8552_v53  ;;  %2504 = vmatprep.mubr.bf16.mxu0 %v9825_v4  ;;  %v8564_v4 = vld [vmem:[#allocation6 + $0x640] ss:$8 sps:$4 sm:$0xff]   ;;  %v7401_v16 = vrot.slane %v2536_v61, 9  ;;  %v8603_v61 = vld [vmem:[#allocation6 + $0x710] ss:$8 sps:$4 sm:$0xff]  }
 0x1ed   : > { %3263 = vmatprep.subr.bf16.mxu0 %v8557_v29  ;;  %v8600_v53 = vld [vmem:[#allocation6 + $0x700] ss:$8 sps:$4 sm:$0xff]   ;;  %v9900_v29 = vcombine.high %v9890_v24, %v9894_v25 }
 0x1ee   : > { %v9883_v44 = vsel %vm9872_vm6, %v7401_v16, %v2594_v40 }
 0x1f0   : > { %3264 = vmatpush1.bf16.msra.mxu0 %v8555_v30  ;;  %v8605_v30 = vld [vmem:[#allocation6 + $0x714] ss:$8 sps:$4 sm:$0xff]  }
 0x1f1   : > { %3265 = vmatprep.subr.bf16.mxu0 %v8560_v31  ;;  %v7404_v31 = vrot.slane %v2539_v26, 9  ;;  %v8642_v26 = vld [vmem:[#allocation6 + $0x7e0] ss:$8 sps:$4 sm:$0xff]  }
 0x1f3   : > { %2505 = vmatmul.mubr.bf16.gmra.mrb[4].mxu0 %v9831_v6  ;;  %v2590_v6 = vrot.slane %v9156_v38, 5  ;;  %v9913_v38 = vcombine.low %v9890_v24, %v9894_v25 }
 0x1f4   : > { %3266 = vmatpush1.bf16.msra.mxu0 %v8558_v54  ;;  %2514 = vmatprep.mubr.bf16.mxu0 %v9839_v14  ;;  %v9160_v54 = vld [vmem:[#allocation2 + $0x48] sm:$0x11] }
 0x1f5   : > { %3267 = vmatprep.subr.bf16.mxu0 %v8563_v32  ;;  %v9879_v43 = vsel %vm9872_vm6, %v7400_v45, %v2590_v6  ;;  %v2606_v32 = vrot.slane %v9160_v54, 5  ;;  %v2542_v45 = vld [vmem:[#allocation2 + $0x70] sm:$0xee]  ;;  %v8606_v6 = vld [vmem:[#allocation6 + $0x720] ss:$8 sps:$4 sm:$0xff]  }
 0x1f6   : > { %v7410_v22 = vcombine.low %v9879_v43, %v9883_v44  ;;  %v8782_v14 = vld [vmem:[#allocation8 + $0x4c4] ss:$8 sps:$4 sm:$0xff]  }
 0x1f7   : > { %v9905_v36 = vsel %vm9872_vm6, %v7404_v31, %v2606_v32  ;;  %v8648_v31 = vld [vmem:[#allocation6 + $0x800] ss:$8 sps:$4 sm:$0xff]   ;;  %v8653_v32 = vld [vmem:[#allocation6 + $0x814] ss:$8 sps:$4 sm:$0xff]  }
 0x1f8   : > { %3268 = vmatpush1.bf16.msra.mxu0 %v8561_v19  ;;  %v7405_v19 = vrot.slane %v2540_v28, 9  ;;  %v8647_v28 = vld [vmem:[#allocation6 + $0x7f4] ss:$8 sps:$4 sm:$0xff]   ;;  %v7417_v54 = vcombine.high %v9894_v25, %v9905_v36 }
 0x1f9   : > { %3269 = vmatprep.subr.bf16.mxu0 %v8566_v33  ;;  %v9161_v33 = vld [vmem:[#allocation2 + $0x58] sm:$0x11] }
 0x1fa   : > { %v2610_v35 = vrot.slane %v9161_v33, 5  ;;  %v8656_v33 = vld [vmem:[#allocation6 + $0x824] ss:$8 sps:$4 sm:$0xff]  }
 0x1fb   : > { %2515 = vmatmul.mubr.bf16.gmra.mrb[8].mxu0 %v9845_v9  ;;  %v7411_v9 = vcombine.high %v9879_v43, %v9883_v44  ;;  %v7407_v43 = vrot.slane %v2542_v45, 9  ;;  %v9164_v45 = vld [vmem:[#allocation2 + $0x88] sm:$0x11] }
 0x1fc   : > { %3270 = vmatpush1.bf16.msra.mxu0 %v8564_v4  ;;  %2524 = vmatprep.mubr.bf16.mxu0 %v7303_v37  ;;  %v8608_v4 = vld [vmem:[#allocation6 + $0x724] ss:$8 sps:$4 sm:$0xff]   ;;  %v9909_v37 = vsel %vm9872_vm6, %v7405_v19, %v2610_v35  ;;  %v8651_v19 = vld [vmem:[#allocation6 + $0x810] ss:$8 sps:$4 sm:$0xff]  }
 0x1fd   : > { %3271 = vmatprep.subr.bf16.mxu0 %v8569_v20  ;;  %v2541_v20 = vld [vmem:[#allocation2 + $0x60] sm:$0xee]  ;;  %v9917_v16 = vcombine.high %v9905_v36, %v9909_v37 }
 0x1fe   : > { %v7406_v40 = vrot.slane %v2541_v20, 9  ;;  %v2543_v35 = vld [vmem:[#allocation2 + $0x80] sm:$0xee] }
 0x1ff   : > { %v7408_v20 = vrot.slane %v2543_v35, 9  ;;  %v8719_v35 = vld [vmem:[#allocation8 + $0x370] ss:$8 sps:$4 sm:$0xff]  }
 0x200   : > { %3272 = vmatpush1.bf16.msra.mxu0 %v8567_v41  ;;  %v9162_v41 = vld [vmem:[#allocation2 + $0x68] sm:$0x11] }
 0x201   : > { %3273 = vmatprep.subr.bf16.mxu0 %v8572_v42  ;;  %v2614_v42 = vrot.slane %v9162_v41, 5 }
 0x203   : > { %2525 = vmatmul.mubr.bf16.gmra.mrb[12].mxu0 %v7302_v46  ;;  %v9163_v46 = vld [vmem:[#allocation2 + $0x78] sm:$0x11] }
 0x204   : > { %3274 = vmatpush1.bf16.msra.mxu0 %v8570_v49  ;;  %3293 = vmatprep.mubr.bf16.mxu0 %v7411_v9  ;;  %v2618_v49 = vrot.slane %v9163_v46, 5  ;;  %v8609_v9 = vld [vmem:[#allocation6 + $0x730] ss:$8 sps:$4 sm:$0xff]  }
 0x205   : > { %3275 = vmatprep.subr.bf16.mxu0 %v8575_v34  ;;  %v8614_v34 = vld [vmem:[#allocation6 + $0x744] ss:$8 sps:$4 sm:$0xff]   ;;  %v8663_v46 = vld [vmem:[#allocation6 + $0x850] ss:$8 sps:$4 sm:$0xff]  }
 0x208   : > { %3276 = vmatpush1.bf16.msra.mxu0 %v8573_v7  ;;  %v9923_v7 = vsel %vm9872_vm6, %v7406_v40, %v2614_v42  ;;  %v8662_v40 = vld [vmem:[#allocation6 + $0x844] ss:$8 sps:$4 sm:$0xff]  }
 0x209   : > { %3277 = vmatprep.subr.bf16.mxu0 %v8578_v47  ;;  %v9927_v47 = vsel %vm9872_vm6, %v7407_v43, %v2618_v49  ;;  %v8665_v43 = vld [vmem:[#allocation6 + $0x854] ss:$8 sps:$4 sm:$0xff]   ;;  %v8668_v49 = vld [vmem:[#allocation6 + $0x864] ss:$8 sps:$4 sm:$0xff]  }
 0x20c   : > { %3278 = vmatpush1.bf16.msra.mxu0 %v8576_v48  ;;  %v9931_v48 = vcombine.low %v9905_v36, %v9909_v37 }
 0x20d   : > { %3279 = vmatprep.subr.bf16.mxu0 %v8581_v50  ;;  %v8612_v50 = vld [vmem:[#allocation6 + $0x740] ss:$8 sps:$4 sm:$0xff]  }
 0x210   : > { %3280 = vmatpush1.bf16.msra.mxu0 %v8579_v51  ;;  %v9935_v51 = vcombine.high %v9923_v7, %v9927_v47 }
 0x211   : > { %3281 = vmatprep.subr.bf16.mxu0 %v8584_v15  ;;  %v8617_v15 = vld [vmem:[#allocation6 + $0x754] ss:$8 sps:$4 sm:$0xff]  }
 0x214   : > { %3282 = vmatpush1.bf16.msra.mxu0 %v8582_v52  ;;  %v8615_v52 = vld [vmem:[#allocation6 + $0x750] ss:$8 sps:$4 sm:$0xff]  }
 0x215   : > { %3283 = vmatprep.subr.bf16.mxu0 %v8587_v56  ;;  %v8620_v56 = vld [vmem:[#allocation6 + $0x764] ss:$8 sps:$4 sm:$0xff]  }
 0x218   : > { %3284 = vmatpush1.bf16.msra.mxu0 %v8585_v57  ;;  %v9941_v57 = vcombine.low %v9923_v7, %v9927_v47 }
 0x219   : > { %3285 = vmatprep.subr.bf16.mxu0 %v8590_v58  ;;  %v8618_v58 = vld [vmem:[#allocation6 + $0x760] ss:$8 sps:$4 sm:$0xff]  }
 0x21c   : > { %3286 = vmatpush1.bf16.msra.mxu0 %v8588_v59  ;;  %v7413_v59 = vcombine.high %v9883_v44, %v9890_v24 }
 0x21d   : > { %3287 = vmatprep.subr.bf16.mxu0 %v8593_v60  ;;  %v8623_v60 = vld [vmem:[#allocation6 + $0x774] ss:$8 sps:$4 sm:$0xff]  }
 0x220   : > { %3288 = vmatpush1.bf16.msra.mxu0 %v8591_v62  ;;  %v8621_v62 = vld [vmem:[#allocation6 + $0x770] ss:$8 sps:$4 sm:$0xff]  }
 0x221   : > { %3289 = vmatprep.subr.bf16.mxu0 %v8596_v0  ;;  %v8626_v0 = vld [vmem:[#allocation6 + $0x784] ss:$8 sps:$4 sm:$0xff]  }
 0x224   : > { %3290 = vmatpush1.bf16.msra.mxu0 %v8594_v11  ;;  %v8627_v11 = vld [vmem:[#allocation6 + $0x790] ss:$8 sps:$4 sm:$0xff]  }
 0x225   : > { %3291 = vmatprep.subr.bf16.mxu0 %v8599_v63  ;;  %v8632_v63 = vld [vmem:[#allocation6 + $0x7a4] ss:$8 sps:$4 sm:$0xff]  }
 0x228   : > { %3292 = vmatpush1.bf16.msra.mxu0 %v8597_v18  ;;  %v8639_v18 = vld [vmem:[#allocation6 + $0x7d0] ss:$8 sps:$4 sm:$0xff]  }
 0x229   : > { %3334 = vmatprep.subr.bf16.mxu0 %v8602_v1  ;;  %v8644_v1 = vld [vmem:[#allocation6 + $0x7e4] ss:$8 sps:$4 sm:$0xff]  }
 0x22b   : > { %3294 = vmatmul.mubr.bf16.vlgmr.msra.gmra.mrb[0].mxu0 %v7410_v22  ;;  %v8645_v22 = vld [vmem:[#allocation6 + $0x7f0] ss:$8 sps:$4 sm:$0xff]  }
 0x22c   : > { %3335 = vmatpush1.bf16.msra.mxu0 %v8600_v53  ;;  %3303 = vmatprep.mubr.bf16.mxu0 %v9900_v29  ;;  %v8650_v53 = vld [vmem:[#allocation6 + $0x804] ss:$8 sps:$4 sm:$0xff]  }
 0x22d   : > { %3336 = vmatprep.subr.bf16.mxu0 %v8605_v30  ;;  %v7412_v30 = vcombine.low %v9883_v44, %v9890_v24  ;;  %v7421_v44 = vcombine.high %v9909_v37, %v9923_v7  ;;  %v8659_v24 = vld [vmem:[#allocation6 + $0x834] ss:$8 sps:$4 sm:$0xff]  }
 0x230   : > { %3337 = vmatpush1.bf16.msra.mxu0 %v8603_v61  ;;  %v7416_v61 = vcombine.low %v9894_v25, %v9905_v36  ;;  %v7420_v25 = vcombine.low %v9909_v37, %v9923_v7  ;;  %v8660_v36 = vld [vmem:[#allocation6 + $0x840] ss:$8 sps:$4 sm:$0xff]   ;;  %v8671_v37 = vld [vmem:[#allocation6 + $0x874] ss:$8 sps:$4 sm:$0xff]   ;;  %v8669_v7 = vld [vmem:[#allocation6 + $0x870] ss:$8 sps:$4 sm:$0xff]  }
 0x231   : > { %3338 = vmatprep.subr.bf16.mxu0 %v8608_v4  ;;  %v8654_v4 = vld [vmem:[#allocation6 + $0x820] ss:$8 sps:$4 sm:$0xff]  }
 0x233   : > { %3304 = vmatmul.mubr.bf16.gmra.mrb[4].mxu0 %v9913_v38 }
 0x234   : > { %3339 = vmatpush1.bf16.msra.mxu0 %v8606_v6  ;;  %3313 = vmatprep.mubr.bf16.mxu0 %v9917_v16  ;;  %v2622_v6 = vrot.slane %v9164_v45, 5  ;;  %v8728_v45 = vld [vmem:[#allocation8 + $0x3a0] ss:$8 sps:$4 sm:$0xff]  }
 0x235   : > { %3340 = vmatprep.subr.bf16.mxu0 %v8611_v39  ;;  %v8657_v39 = vld [vmem:[#allocation6 + $0x830] ss:$8 sps:$4 sm:$0xff]  }
 0x236   : > { %v9956_v41 = vsel %vm9872_vm6, %v7408_v20, %v2622_v6  ;;  %v8726_v20 = vld [vmem:[#allocation8 + $0x3a4] ss:$8 sps:$4 sm:$0xff]   ;;  %v8729_v6 = vld [vmem:[#allocation8 + $0x3b4] ss:$8 sps:$4 sm:$0xff]  }
 0x237   : > { %v7425_v42 = vcombine.high %v9927_v47, %v9956_v41 }
 0x238   : > { %3341 = vmatpush1.bf16.msra.mxu0 %v8609_v9  ;;  %v7424_v9 = vcombine.low %v9927_v47, %v9956_v41  ;;  %v8678_v47 = vld [vmem:[#allocation6 + $0x8a0] ss:$8 sps:$4 sm:$0xff]  }
 0x239   : > { %3342 = vmatprep.subr.bf16.mxu0 %v8614_v34  ;;  %v8666_v34 = vld [vmem:[#allocation6 + $0x860] ss:$8 sps:$4 sm:$0xff]  }
 0x23b   : > { %3314 = vmatmul.mubr.bf16.gmra.mrb[8].mxu0 %v9931_v48 }
 0x23c   : > { %3343 = vmatpush1.bf16.msra.mxu0 %v8612_v50  ;;  %3323 = vmatprep.mubr.bf16.mxu0 %v9935_v51  ;;  %v8674_v50 = vld [vmem:[#allocation6 + $0x884] ss:$8 sps:$4 sm:$0xff]  }
 0x23d   : > { %3344 = vmatprep.subr.bf16.mxu0 %v8617_v15  ;;  %v8672_v15 = vld [vmem:[#allocation6 + $0x880] ss:$8 sps:$4 sm:$0xff]  }
 0x240   : > { %3345 = vmatpush1.bf16.msra.mxu0 %v8615_v52  ;;  %v8677_v52 = vld [vmem:[#allocation6 + $0x894] ss:$8 sps:$4 sm:$0xff]  }
 0x241   : > { %3346 = vmatprep.subr.bf16.mxu0 %v8620_v56  ;;  %v8675_v56 = vld [vmem:[#allocation6 + $0x890] ss:$8 sps:$4 sm:$0xff]  }
 0x243   : > { %3324 = vmatmul.mubr.bf16.gmra.mrb[12].mxu0 %v9941_v57 }
 0x244   : > { %3347 = vmatpush1.bf16.msra.mxu0 %v8618_v58  ;;  %3366 = vmatprep.mubr.bf16.mxu0 %v7413_v59  ;;  %v8680_v58 = vld [vmem:[#allocation6 + $0x8a4] ss:$8 sps:$4 sm:$0xff]   ;;  %v8683_v59 = vld [vmem:[#allocation6 + $0x8b4] ss:$8 sps:$4 sm:$0xff]  }
 0x245   : > { %3348 = vmatprep.subr.bf16.mxu0 %v8623_v60  ;;  %v8681_v60 = vld [vmem:[#allocation6 + $0x8b0] ss:$8 sps:$4 sm:$0xff]  }
 0x248   : > { %3349 = vmatpush1.bf16.msra.mxu0 %v8621_v62  ;;  %v8686_v62 = vld [vmem:[#allocation6 + $0x8c4] ss:$8 sps:$4 sm:$0xff]  }
 0x249   : > { %3350 = vmatprep.subr.bf16.mxu0 %v8626_v0  ;;  %v8689_v0 = vld [vmem:[#allocation6 + $0x8d4] ss:$8 sps:$4 sm:$0xff]  }
 0x24c   : > { %3351 = vmatpush1.bf16.msra.mxu0 %v8624_v2  ;;  %v8687_v2 = vld [vmem:[#allocation6 + $0x8d0] ss:$8 sps:$4 sm:$0xff]  }
 0x24d   : > { %3352 = vmatprep.subr.bf16.mxu0 %v8629_v3  ;;  %v8692_v3 = vld [vmem:[#allocation6 + $0x8e4] ss:$8 sps:$4 sm:$0xff]  }
 0x250   : > { %3353 = vmatpush1.bf16.msra.mxu0 %v8627_v11  ;;  %v8690_v11 = vld [vmem:[#allocation6 + $0x8e0] ss:$8 sps:$4 sm:$0xff]  }
 0x251   : > { %3354 = vmatprep.subr.bf16.mxu0 %v8632_v63  ;;  %v8695_v63 = vld [vmem:[#allocation6 + $0x8f4] ss:$8 sps:$4 sm:$0xff]  }
 0x254   : > { %3355 = vmatpush1.bf16.msra.mxu0 %v8630_v12  ;;  %v8693_v12 = vld [vmem:[#allocation6 + $0x8f0] ss:$8 sps:$4 sm:$0xff]  }
 0x255   : > { %3356 = vmatprep.subr.bf16.mxu0 %v8635_v8  ;;  %v2544_v8 = vld [vmem:[#allocation2 + $0x90] sm:$0xee] }
 0x258   : > { %3357 = vmatpush1.bf16.msra.mxu0 %v8633_v10  ;;  %v7409_v10 = vrot.slane %v2544_v8, 9 }
 0x259   : > { %3358 = vmatprep.subr.bf16.mxu0 %v8638_v13  ;;  %v9165_v13 = vld [vmem:[#allocation2 + $0x98] sm:$0x11] }
 0x25c   : > { %3359 = vmatpush1.bf16.msra.mxu0 %v8636_v17  ;;  %v2626_v17 = vrot.slane %v9165_v13, 5 }
 0x25d   : > { %3360 = vmatprep.subr.bf16.mxu0 %v8641_v21 }
 0x25e   : > { %v2627_v21 = vsel %vm9872_vm6, %v7409_v10, %v2626_v17 }
 0x260   : > { %3361 = vmatpush1.bf16.msra.mxu0 %v8639_v18  ;;  %v7427_v18 = vcombine.high %v9956_v41, %v2627_v21 }
 0x261   : > { %3362 = vmatprep.subr.bf16.mxu0 %v8644_v1  ;;  %v8698_v1 = vld [vmem:[#allocation8 + $0x300] ss:$8 sps:$4 sm:$0xff]  }
 0x264   : > { %3363 = vmatpush1.bf16.msra.mxu0 %v8642_v26  ;;  %v8699_v26 = vld [vmem:[#allocation8 + $0x314] ss:$8 sps:$4 sm:$0xff]  }
 0x265   : > { %3364 = vmatprep.subr.bf16.mxu0 %v8647_v28  ;;  %v8701_v28 = vld [vmem:[#allocation8 + $0x310] ss:$8 sps:$4 sm:$0xff]  }
 0x268   : > { %3365 = vmatpush1.bf16.msra.mxu0 %v8645_v22  ;;  %v8705_v22 = vld [vmem:[#allocation8 + $0x334] ss:$8 sps:$4 sm:$0xff]  }
 0x269   : > { %3407 = vmatprep.subr.bf16.mxu0 %v8650_v53  ;;  %v8707_v53 = vld [vmem:[#allocation8 + $0x330] ss:$8 sps:$4 sm:$0xff]  }
 0x26b   : > { %3367 = vmatmul.mubr.bf16.vlgmr.msra.gmra.mrb[0].mxu0 %v7412_v30  ;;  %v8710_v30 = vld [vmem:[#allocation8 + $0x340] ss:$8 sps:$4 sm:$0xff]  }
 0x26c   : > { %3408 = vmatpush1.bf16.msra.mxu0 %v8648_v31  ;;  %3376 = vmatprep.mubr.bf16.mxu0 %v7417_v54  ;;  %v8711_v31 = vld [vmem:[#allocation8 + $0x354] ss:$8 sps:$4 sm:$0xff]   ;;  %v8713_v54 = vld [vmem:[#allocation8 + $0x350] ss:$8 sps:$4 sm:$0xff]  }
 0x26d   : > { %3409 = vmatprep.subr.bf16.mxu0 %v8653_v32  ;;  %v8714_v32 = vld [vmem:[#allocation8 + $0x364] ss:$8 sps:$4 sm:$0xff]  }
 0x270   : > { %3410 = vmatpush1.bf16.msra.mxu0 %v8651_v19  ;;  %v8716_v19 = vld [vmem:[#allocation8 + $0x360] ss:$8 sps:$4 sm:$0xff]  }
 0x271   : > { %3411 = vmatprep.subr.bf16.mxu0 %v8656_v33  ;;  %v8717_v33 = vld [vmem:[#allocation8 + $0x374] ss:$8 sps:$4 sm:$0xff]  }
 0x273   : > { %3377 = vmatmul.mubr.bf16.gmra.mrb[4].mxu0 %v7416_v61  ;;  %v8720_v61 = vld [vmem:[#allocation8 + $0x384] ss:$8 sps:$4 sm:$0xff]  }
 0x274   : > { %3412 = vmatpush1.bf16.msra.mxu0 %v8654_v4  ;;  %3386 = vmatprep.mubr.bf16.mxu0 %v7421_v44  ;;  %v8722_v4 = vld [vmem:[#allocation8 + $0x380] ss:$8 sps:$4 sm:$0xff]   ;;  %v8723_v44 = vld [vmem:[#allocation8 + $0x394] ss:$8 sps:$4 sm:$0xff]  }
 0x275   : > { %3413 = vmatprep.subr.bf16.mxu0 %v8659_v24  ;;  %v8725_v24 = vld [vmem:[#allocation8 + $0x390] ss:$8 sps:$4 sm:$0xff]  }
 0x278   : > { %3414 = vmatpush1.bf16.msra.mxu0 %v8657_v39  ;;  %v8731_v39 = vld [vmem:[#allocation8 + $0x3b0] ss:$8 sps:$4 sm:$0xff]  }
 0x279   : > { %3415 = vmatprep.subr.bf16.mxu0 %v8662_v40  ;;  %v8732_v40 = vld [vmem:[#allocation8 + $0x3c4] ss:$8 sps:$4 sm:$0xff]  }
 0x27b   : > { %3387 = vmatmul.mubr.bf16.gmra.mrb[8].mxu0 %v7420_v25  ;;  %v8735_v25 = vld [vmem:[#allocation8 + $0x3d4] ss:$8 sps:$4 sm:$0xff]  }
 0x27c   : > { %3416 = vmatpush1.bf16.msra.mxu0 %v8660_v36  ;;  %3396 = vmatprep.mubr.bf16.mxu0 %v7425_v42  ;;  %v8737_v36 = vld [vmem:[#allocation8 + $0x3d0] ss:$8 sps:$4 sm:$0xff]   ;;  %v8738_v42 = vld [vmem:[#allocation8 + $0x3e4] ss:$8 sps:$4 sm:$0xff]  }
 0x27d   : > { %3417 = vmatprep.subr.bf16.mxu0 %v8665_v43  ;;  %v8740_v43 = vld [vmem:[#allocation8 + $0x3e0] ss:$8 sps:$4 sm:$0xff]  }
 0x280   : > { %3418 = vmatpush1.bf16.msra.mxu0 %v8663_v46  ;;  %v8741_v46 = vld [vmem:[#allocation8 + $0x3f4] ss:$8 sps:$4 sm:$0xff]  }
 0x281   : > { %3419 = vmatprep.subr.bf16.mxu0 %v8668_v49  ;;  %v8743_v49 = vld [vmem:[#allocation8 + $0x3f0] ss:$8 sps:$4 sm:$0xff]  }
 0x283   : > { %3397 = vmatmul.mubr.bf16.gmra.mrb[12].mxu0 %v7424_v9  ;;  %v8746_v9 = vld [vmem:[#allocation8 + $0x404] ss:$8 sps:$4 sm:$0xff]  }
 0x284   : > { %3420 = vmatpush1.bf16.msra.mxu0 %v8666_v34  ;;  %3439 = vmatprep.mubr.bf16.mxu0 %v9900_v29  ;;  %v8684_v29 = vld [vmem:[#allocation6 + $0x8c0] ss:$8 sps:$4 sm:$0xff]  }
 0x285   : > { %3421 = vmatprep.subr.bf16.mxu0 %v8671_v37 }
 0x288   : > { %3422 = vmatpush1.bf16.msra.mxu0 %v8669_v7 }
 0x289   : > { %3423 = vmatprep.subr.bf16.mxu0 %v8674_v50 }
 0x28c   : > { %3424 = vmatpush1.bf16.msra.mxu0 %v8672_v15 }
 0x28d   : > { %3425 = vmatprep.subr.bf16.mxu0 %v8677_v52 }
 0x290   : > { %3426 = vmatpush1.bf16.msra.mxu0 %v8675_v56 }
 0x291   : > { %3427 = vmatprep.subr.bf16.mxu0 %v8680_v58 }
 0x294   : > { %3428 = vmatpush1.bf16.msra.mxu0 %v8678_v47 }
 0x295   : > { %3429 = vmatprep.subr.bf16.mxu0 %v8683_v59 }
 0x298   : > { %3430 = vmatpush1.bf16.msra.mxu0 %v8681_v60 }
 0x299   : > { %3431 = vmatprep.subr.bf16.mxu0 %v8686_v62 }
 0x29c   : > { %3432 = vmatpush1.bf16.msra.mxu0 %v8684_v29 }
 0x29d   : > { %3433 = vmatprep.subr.bf16.mxu0 %v8689_v0 }
 0x2a0   : > { %3434 = vmatpush1.bf16.msra.mxu0 %v8687_v2 }
 0x2a1   : > { %3435 = vmatprep.subr.bf16.mxu0 %v8692_v3 }
 0x2a4   : > { %3436 = vmatpush1.bf16.msra.mxu0 %v8690_v11 }
 0x2a5   : > { %3437 = vmatprep.subr.bf16.mxu0 %v8695_v63 }
 0x2a8   : > { %3438 = vmatpush1.bf16.msra.mxu0 %v8693_v12 }
 0x2ab   : > { %3440 = vmatmul.mubr.bf16.vlgmr.msra.gmra.mrb[0].mxu0 %v9913_v38  ;;  %v7426_v38 = vcombine.low %v9956_v41, %v2627_v21  ;;  %v8734_v41 = vld [vmem:[#allocation8 + $0x3c0] ss:$8 sps:$4 sm:$0xff]  }
 0x2ac   : > { %3449 = vmatprep.mubr.bf16.mxu0 %v9917_v16  ;;  %v8696_v16 = vld [vmem:[#allocation8 + $0x304] ss:$8 sps:$4 sm:$0xff]  }
 0x2ad   : > { %4951 = vmatprep.subr.bf16.mxu1 %v8696_v16 }
 0x2ae   : > { %4952 = vmatpush1.bf16.msra.mxu1 %v8698_v1 }
 0x2af   : > { %4953 = vmatprep.subr.bf16.mxu1 %v8699_v26 }
 0x2b2   : > { %4954 = vmatpush1.bf16.msra.mxu1 %v8701_v28 }
 0x2b3   : > { %3450 = vmatmul.mubr.bf16.gmra.mrb[4].mxu0 %v9931_v48  ;;  %v8702_v48 = vld [vmem:[#allocation8 + $0x324] ss:$8 sps:$4 sm:$0xff]  }
 0x2b4   : > { %3459 = vmatprep.mubr.bf16.mxu0 %v9935_v51  ;;  %v8704_v51 = vld [vmem:[#allocation8 + $0x320] ss:$8 sps:$4 sm:$0xff]   ;;  %4955 = vmatprep.subr.bf16.mxu1 %v8702_v48 }
 0x2b6   : > { %4956 = vmatpush1.bf16.msra.mxu1 %v8704_v51 }
 0x2b7   : > { %4957 = vmatprep.subr.bf16.mxu1 %v8705_v22 }
 0x2ba   : > { %4958 = vmatpush1.bf16.msra.mxu1 %v8707_v53 }
 0x2bb   : > { %3460 = vmatmul.mubr.bf16.gmra.mrb[8].mxu0 %v9941_v57  ;;  %v8708_v57 = vld [vmem:[#allocation8 + $0x344] ss:$8 sps:$4 sm:$0xff]  }
 0x2bc   : > { %3469 = vmatprep.mubr.bf16.mxu0 %v7427_v18  ;;  %4959 = vmatprep.subr.bf16.mxu1 %v8708_v57 }
 0x2be   : > { %4960 = vmatpush1.bf16.msra.mxu1 %v8710_v30 }
 0x2bf   : > { %4961 = vmatprep.subr.bf16.mxu1 %v8711_v31 }
 0x2c2   : > { %4962 = vmatpush1.bf16.msra.mxu1 %v8713_v54 }
 0x2c3   : > { %3470 = vmatmul.mubr.bf16.gmra.mrb[12].mxu0 %v7426_v38  ;;  %4963 = vmatprep.subr.bf16.mxu1 %v8714_v32 }
 0x2c6   : > { %4964 = vmatpush1.bf16.msra.mxu1 %v8716_v19 }
 0x2c7   : > { %4965 = vmatprep.subr.bf16.mxu1 %v8717_v33 }
 0x2ca   : > { %4966 = vmatpush1.bf16.msra.mxu1 %v8719_v35 }
 0x2cb   : > { %4967 = vmatprep.subr.bf16.mxu1 %v8720_v61 }
 0x2ce   : > { %4968 = vmatpush1.bf16.msra.mxu1 %v8722_v4 }
 0x2cf   : > { %4969 = vmatprep.subr.bf16.mxu1 %v8723_v44 }
 0x2d2   : > { %4970 = vmatpush1.bf16.msra.mxu1 %v8725_v24 }
 0x2d3   : > { %4971 = vmatprep.subr.bf16.mxu1 %v8726_v20 }
 0x2d6   : > { %4972 = vmatpush1.bf16.msra.mxu1 %v8728_v45 }
 0x2d7   : > { %4973 = vmatprep.subr.bf16.mxu1 %v8729_v6 }
 0x2da   : > { %4974 = vmatpush1.bf16.msra.mxu1 %v8731_v39 }
 0x2db   : > { %4975 = vmatprep.subr.bf16.mxu1 %v8732_v40 }
 0x2de   : > { %4976 = vmatpush1.bf16.msra.mxu1 %v8734_v41 }
 0x2df   : > { %4977 = vmatprep.subr.bf16.mxu1 %v8735_v25 }
 0x2e2   : > { %4978 = vmatpush1.bf16.msra.mxu1 %v8737_v36 }
 0x2e3   : > { %4979 = vmatprep.subr.bf16.mxu1 %v8738_v42 }
 0x2e6   : > { %4980 = vmatpush1.bf16.msra.mxu1 %v8740_v43 }
 0x2e7   : > { %4981 = vmatprep.subr.bf16.mxu1 %v8741_v46 }
 0x2ea   : > { %4982 = vmatpush1.bf16.msra.mxu1 %v8743_v49 }
 0x2eb   : > { %5024 = vmatprep.subr.bf16.mxu1 %v8746_v9 }
 0x37e   : > { %v9974_v34 = vpop.f32.mrb[0].mxu0 }
 0x37f   : > { %v9976_v37 = vpop.f32.mrb[1].mxu0  ;;  %v3522_v50 = vmul.f32 %v9974_v34, %v9974_v34 }
 0x380   : > { %v9978_v7 = vpop.f32.mrb[2].mxu0  ;;  %v3523_v58 = vmul.f32 %v9976_v37, %v9976_v37 }
 0x381   : > { %v3496_v15 = vadd.f32 %v9978_v7, %v9974_v34  ;;  %v3524_v52 = vmul.f32 %v9978_v7, %v9978_v7  ;;  %v9986_v56 = vpop.f32.mrb[3].mxu0 }
 0x382   : > { %v3509_v47 = vadd.f32 %v9986_v56, %v9976_v37  ;;  %v3525_v59 = vmul.f32 %v9986_v56, %v9986_v56 }
 0x383   : > { %v3538_v60 = vadd.f32 %v3524_v52, %v3522_v50 }
 0x384   : > { %v3551_v62 = vadd.f32 %v3525_v59, %v3523_v58 }
 0x386   : > { %v9994_v29 = vpop.f32.mrb[4].mxu0 }
 0x387   : > { %v3497_v0 = vadd.f32 %v3496_v15, %v9994_v29  ;;  %v3526_v2 = vmul.f32 %v9994_v29, %v9994_v29  ;;  %v9999_v3 = vpop.f32.mrb[5].mxu0 }
 0x388   : > { %v3510_v11 = vadd.f32 %v3509_v47, %v9999_v3  ;;  %v3527_v63 = vmul.f32 %v9999_v3, %v9999_v3  ;;  %v10004_v12 = vpop.f32.mrb[6].mxu0 }
 0x389   : > { %v3539_v8 = vadd.f32 %v3538_v60, %v3526_v2  ;;  %v3498_v10 = vadd.f32 %v3497_v0, %v10004_v12  ;;  %v3528_v13 = vmul.f32 %v10004_v12, %v10004_v12  ;;  %v10009_v17 = vpop.f32.mrb[7].mxu0 }
 0x38a   : > { %v3552_v21 = vadd.f32 %v3551_v62, %v3527_v63  ;;  %v3511_v18 = vadd.f32 %v3510_v11, %v10009_v17  ;;  %v3529_v38 = vmul.f32 %v10009_v17, %v10009_v17 }
 0x38b   : > { %v3540_v16 = vadd.f32 %v3539_v8, %v3528_v13 }
 0x38c   : > { %v3553_v1 = vadd.f32 %v3552_v21, %v3529_v38 }
 0x38e   : > { %v10014_v26 = vpop.f32.mrb[8].mxu0 }
 0x38f   : > { %v3499_v28 = vadd.f32 %v3498_v10, %v10014_v26  ;;  %v3530_v48 = vmul.f32 %v10014_v26, %v10014_v26  ;;  %v10019_v51 = vpop.f32.mrb[9].mxu0 }
 0x390   : > { %v3512_v22 = vadd.f32 %v3511_v18, %v10019_v51  ;;  %v3531_v53 = vmul.f32 %v10019_v51, %v10019_v51  ;;  %v10024_v57 = vpop.f32.mrb[10].mxu0 }
 0x391   : > { %v3541_v30 = vadd.f32 %v3540_v16, %v3530_v48  ;;  %v3500_v31 = vadd.f32 %v3499_v28, %v10024_v57  ;;  %v3532_v54 = vmul.f32 %v10024_v57, %v10024_v57  ;;  %v10029_v32 = vpop.f32.mrb[11].mxu0 }
 0x392   : > { %v3554_v19 = vadd.f32 %v3553_v1, %v3531_v53  ;;  %v3513_v33 = vadd.f32 %v3512_v22, %v10029_v32  ;;  %v3533_v35 = vmul.f32 %v10029_v32, %v10029_v32 }
 0x393   : > { %v3542_v61 = vadd.f32 %v3541_v30, %v3532_v54 }
 0x394   : > { %v3555_v4 = vadd.f32 %v3554_v19, %v3533_v35 }
 0x396   : > { %v10034_v44 = vpop.f32.mrb[12].mxu0 }
 0x397   : > { %v3501_v24 = vadd.f32 %v3500_v31, %v10034_v44  ;;  %v3534_v20 = vmul.f32 %v10034_v44, %v10034_v44  ;;  %v10039_v45 = vpop.f32.mrb[13].mxu0 }
 0x398   : > { %v3514_v6 = vadd.f32 %v3513_v33, %v10039_v45  ;;  %v3535_v39 = vmul.f32 %v10039_v45, %v10039_v45  ;;  %v10044_v40 = vpop.f32.mrb[14].mxu0 }
 0x399   : > { %v3543_v41 = vadd.f32 %v3542_v61, %v3534_v20  ;;  %v3502_v25 = vadd.f32 %v3501_v24, %v10044_v40  ;;  %v3536_v36 = vmul.f32 %v10044_v40, %v10044_v40  ;;  %v10049_v42 = vpop.f32.mrb[15].mxu0 }
 0x39a   : > { %v3556_v43 = vadd.f32 %v3555_v4, %v3535_v39  ;;  %v3515_v46 = vadd.f32 %v3514_v6, %v10049_v42  ;;  %v3537_v49 = vmul.f32 %v10049_v42, %v10049_v42 }
 0x39b   : > { %v3503_v9 = vrot.slane %v3502_v25, 4  ;;  %v3544_v50 = vadd.f32 %v3543_v41, %v3536_v36 }
 0x39c   : > { %v3516_v15 = vrot.slane %v3515_v46, 4  ;;  %v3557_v52 = vadd.f32 %v3556_v43, %v3537_v49 }
 0x39d   : > { %v3504_v58 = vadd.f32 %v3503_v9, %v3502_v25  ;;  %v3545_v47 = vrot.slane %v3544_v50, 4 }
 0x39e   : > { %v3517_v59 = vadd.f32 %v3516_v15, %v3515_v46  ;;  %v3558_v60 = vrot.slane %v3557_v52, 4 }
 0x39f   : > { %v3505_v62 = vrot.slane %v3504_v58, 2  ;;  %v3546_v0 = vadd.f32 %v3545_v47, %v3544_v50 }
 0x3a0   : > { %v3518_v2 = vrot.slane %v3517_v59, 2  ;;  %v3559_v11 = vadd.f32 %v3558_v60, %v3557_v52 }
 0x3a1   : > { %v3506_v63 = vadd.f32 %v3505_v62, %v3504_v58  ;;  %v3547_v8 = vrot.slane %v3546_v0, 2 }
 0x3a2   : > { %v3519_v10 = vadd.f32 %v3518_v2, %v3517_v59  ;;  %v3560_v13 = vrot.slane %v3559_v11, 2 }
 0x3a3   : > { %v3507_v21 = vrot.slane %v3506_v63, 1  ;;  %v3548_v18 = vadd.f32 %v3547_v8, %v3546_v0 }
 0x3a4   : > { %v3520_v38 = vrot.slane %v3519_v10, 1  ;;  %v3561_v16 = vadd.f32 %v3560_v13, %v3559_v11 }
 0x3a5   : > { %v3508_v1 = vadd.f32 %v3507_v21, %v3506_v63  ;;  %v3549_v28 = vrot.slane %v3548_v18, 1 }
 0x3a6   : > { %v3521_v48 = vadd.f32 %v3520_v38, %v3519_v10  ;;  %v3562_v22 = vrot.slane %v3561_v16, 1 }
 0x3a7   : > { %v3550_v53 = vadd.f32 %v3549_v28, %v3548_v18  ;;  %v3564_v30 = vmul.f32 0.015625, %v3508_v1 }
 0x3a8   : > { %v3563_v31 = vadd.f32 %v3562_v22, %v3561_v16  ;;  %v3565_v54 = vmul.f32 0.015625, %v3521_v48 }
 0x3a9   : > { %v3566_v19 = vmul.f32 0.015625, %v3550_v53  ;;  %v3568_v33 = vmul.f32 %v3564_v30, %v3564_v30  ;;  %v3574_v35 = vsub.f32 %v9974_v34, %v3564_v30  ;;  %v3576_v61 = vsub.f32 %v9978_v7, %v3564_v30 }
 0x3aa   : > { %v3578_v4 = vsub.f32 %v9994_v29, %v3564_v30  ;;  %v3580_v24 = vsub.f32 %v10004_v12, %v3564_v30  ;;  %v3582_v20 = vsub.f32 %v10014_v26, %v3564_v30  ;;  %v3584_v6 = vsub.f32 %v10024_v57, %v3564_v30 }
 0x3ab   : > { %v3570_v39 = vsub.f32 %v3566_v19, %v3568_v33  ;;  %v3586_v41 = vsub.f32 %v10034_v44, %v3564_v30  ;;  %v3588_v25 = vsub.f32 %v10044_v40, %v3564_v30  ;;  %v3567_v36 = vmul.f32 0.015625, %v3563_v31 }
 0x3ac   : > { %v3569_v43 = vmul.f32 %v3565_v54, %v3565_v54  ;;  %v3575_v46 = vsub.f32 %v9976_v37, %v3565_v54  ;;  %v3577_v34 = vsub.f32 %v9986_v56, %v3565_v54  ;;  %v3579_v7 = vsub.f32 %v9999_v3, %v3565_v54 }
 0x3ad   : > { %v3572_v29 = vmax.f32 %v3570_v39, 0.0  ;;  %v3581_v12 = vsub.f32 %v10009_v17, %v3565_v54  ;;  %v3583_v26 = vsub.f32 %v10019_v51, %v3565_v54  ;;  %v3585_v57 = vsub.f32 %v10029_v32, %v3565_v54 }
 0x3ae   : > { %v3571_v49 = vsub.f32 %v3567_v36, %v3569_v43  ;;  %v3587_v44 = vsub.f32 %v10039_v45, %v3565_v54  ;;  %v3589_v40 = vsub.f32 %v10049_v42, %v3565_v54 }
 0x3af   : > { %v3590_v9 = vadd.f32 1e-05, %v3572_v29 }
 0x3b0   : > { %v3573_v50 = vmax.f32 %v3571_v49, 0.0 }
 0x3b1   : > { %9138 = vrsqrt.f32 %v3590_v9 }
 0x3b2   : > { %v3591_v37 = vadd.f32 1e-05, %v3573_v50 }
 0x3b4   : > { %9140 = vrsqrt.f32 %v3591_v37 }
 0x3bb   : > { %v9139_v56 = vpop.eup %9138 }
 0x3bc   : > { %v3594_v15 = vmul.f32 %v9139_v56, %v3574_v35  ;;  %v3596_v3 = vmul.f32 %v9139_v56, %v3576_v61  ;;  %v3598_v52 = vmul.f32 %v9139_v56, %v3578_v4  ;;  %v3600_v58 = vmul.f32 %v9139_v56, %v3580_v24 }
 0x3bd   : > { %v3602_v17 = vmul.f32 %v9139_v56, %v3582_v20  ;;  %v3604_v47 = vmul.f32 %v9139_v56, %v3584_v6  ;;  %v3606_v51 = vmul.f32 %v9139_v56, %v3586_v41  ;;  %v3608_v59 = vmul.f32 %v9139_v56, %v3588_v25 }
 0x3be   : > { %v9141_v32 = vpop.eup %9140  ;;  %v3610_v60 = vmax.f32 %v3594_v15, 0.0  ;;  %v3612_v62 = vmax.f32 %v3596_v3, 0.0  ;;  %v3614_v45 = vmax.f32 %v3598_v52, 0.0  ;;  %v3616_v0 = vmax.f32 %v3600_v58, 0.0  ;;  %v3762_v52 = vld [vmem:[#allocation2 + $0x10] sm:$0xff]  ;;  %v3768_v58 = vld [vmem:[#allocation2 + $0x20] sm:$0xff] }
 0x3bf   : > { %v3618_v42 = vmax.f32 %v3602_v17, 0.0  ;;  %v3620_v2 = vmax.f32 %v3604_v47, 0.0  ;;  %v3622_v11 = vmax.f32 %v3606_v51, 0.0  ;;  %v3624_v63 = vmax.f32 %v3608_v59, 0.0 }
 0x3c0   : > { %v3595_v8 = vmul.f32 %v9141_v32, %v3575_v46  ;;  %v3597_v10 = vmul.f32 %v9141_v32, %v3577_v34  ;;  %v3599_v13 = vmul.f32 %v9141_v32, %v3579_v7  ;;  %v3601_v21 = vmul.f32 %v9141_v32, %v3581_v12 }
 0x3c1   : > { %v3603_v18 = vmul.f32 %v9141_v32, %v3583_v26  ;;  %v3605_v38 = vmul.f32 %v9141_v32, %v3585_v57  ;;  %v3607_v16 = vmul.f32 %v9141_v32, %v3587_v44  ;;  %v3609_v1 = vmul.f32 %v9141_v32, %v3589_v40  ;;  %v3774_v32 = vld [vmem:[#allocation2 + $0x30] sm:$0xff] }
 0x3c2   : > { %v3611_v28 = vmax.f32 %v3595_v8, 0.0  ;;  %v3613_v48 = vmax.f32 %v3597_v10, 0.0  ;;  %v3615_v22 = vmax.f32 %v3599_v13, 0.0  ;;  %v3617_v53 = vmax.f32 %v3601_v21, 0.0  ;;  %v3792_v13 = vld [vmem:[#allocation2 + $0x60] sm:$0xff] }
 0x3c3   : > { %v3619_v30 = vmax.f32 %v3603_v18, 0.0  ;;  %v3621_v31 = vmax.f32 %v3605_v38, 0.0  ;;  %v3623_v54 = vmax.f32 %v3607_v16, 0.0  ;;  %v3625_v19 = vmax.f32 %v3609_v1, 0.0  ;;  %v3810_v21 = vld [vmem:[#allocation2] sm:$0xff] }
 0x3c4   : > { %v7918_v33 = vpack.c.bf16 %v3611_v28, %v3610_v60  ;;  %v7919_v35 = vpack.c.bf16 %v3613_v48, %v3612_v62  ;;  %v7920_v61 = vpack.c.bf16 %v3615_v22, %v3614_v45  ;;  %v7921_v4 = vpack.c.bf16 %v3617_v53, %v3616_v0  ;;  %v3765_v18 = vld [vmem:[#allocation2 + $0x18] sm:$0x11]  ;;  %v3798_v48 = vld [vmem:[#allocation2 + $0x70] sm:$0xff]  ;;  %v3804_v22 = vld [vmem:[#allocation2 + $0x80] sm:$0xff] }
 0x3c5   : > { %v7922_v24 = vpack.c.bf16 %v3619_v30, %v3618_v42  ;;  %v7923_v20 = vpack.c.bf16 %v3621_v31, %v3620_v2  ;;  %v10070_v6 = vpack.c.bf16 %v3623_v54, %v3622_v11  ;;  %v10072_v39 = vpack.c.bf16 %v3625_v19, %v3624_v63  ;;  %v3780_v42 = vld [vmem:[#allocation2 + $0x40] sm:$0xff]  ;;  %v3786_v2 = vld [vmem:[#allocation2 + $0x50] sm:$0xff]  ;;  %v3807_v53 = vld [vmem:[#allocation2 + $0x88] sm:$0x11] }
 0x3c6   : > { %v3683_v41 = vshrl.u32 %v7918_v33, 16  ;;  %v3686_v25 = vshll.u32 %v7918_v33, 16  ;;  %v3691_v36 = vshrl.u32 %v7919_v35, 16  ;;  %v3694_v43 = vshll.u32 %v7919_v35, 16  ;;  %v3771_v30 = vld [vmem:[#allocation2 + $0x28] sm:$0x11] }
 0x3c7   : > { %v3699_v46 = vshrl.u32 %v7920_v61, 16  ;;  %v3702_v34 = vshll.u32 %v7920_v61, 16  ;;  %v3707_v7 = vshrl.u32 %v7921_v4, 16  ;;  %v3710_v29 = vshll.u32 %v7921_v4, 16  ;;  %v3813_v31 = vld [vmem:[#allocation2 + $0x8] sm:$0x11] }
 0x3c8   : > { %v3685_v12 = vrot.slane %v3683_v41, 7  ;;  %v10074_v26 = vrot.slane %v3691_v36, 7  ;;  %v3715_v57 = vshrl.u32 %v7922_v24, 16  ;;  %v3718_v49 = vshll.u32 %v7922_v24, 16  ;;  %v3777_v61 = vld [vmem:[#allocation2 + $0x38] sm:$0x11] }
 0x3c9   : > { %v10076_v44 = vrot.slane %v3699_v46, 7  ;;  %v10078_v40 = vrot.slane %v3707_v7, 7  ;;  %v3723_v9 = vshrl.u32 %v7923_v20, 16  ;;  %v3726_v50 = vshll.u32 %v7923_v20, 16  ;;  %v3783_v4 = vld [vmem:[#allocation2 + $0x48] sm:$0x11] }
 0x3ca   : > { %v3688_v37 = vor.u32 %v3686_v25, %v3685_v12  ;;  %v3689_v56 = vrot.slane %v3685_v12, 4  ;;  %v3696_v15 = vor.u32 %v3694_v43, %v10074_v26  ;;  %v3697_v3 = vrot.slane %v10074_v26, 4  ;;  %v3789_v25 = vld [vmem:[#allocation2 + $0x58] sm:$0x11]  ;;  %v3795_v36 = vld [vmem:[#allocation2 + $0x68] sm:$0x11] }
 0x3cb   : > { %v3704_v17 = vor.u32 %v3702_v34, %v10076_v44  ;;  %v3705_v47 = vrot.slane %v10076_v44, 4  ;;  %v3712_v51 = vor.u32 %v3710_v29, %v10078_v40  ;;  %v3713_v59 = vrot.slane %v10078_v40, 4  ;;  %v3801_v29 = vld [vmem:[#allocation2 + $0x78] sm:$0x11] }
 0x3cc   : > { %v10086_v60 = vrot.slane %v3715_v57, 7  ;;  %v10088_v62 = vrot.slane %v3723_v9, 7  ;;  %v3731_v45 = vshrl.u32 %v10070_v6, 16  ;;  %v3734_v0 = vshll.u32 %v10070_v6, 16  ;;  %v3819_v12 = vld [vmem:[#allocation2 + $0x98] sm:$0x11] }
 0x3cd   : > { %v3739_v11 = vshrl.u32 %v10072_v39, 16  ;;  %v3742_v63 = vshll.u32 %v10072_v39, 16  ;;  %v3763_v8 = vsel %vm9566_vm12, %v3688_v37, %v3762_v52  ;;  %v3769_v10 = vsel %vm9566_vm12, %v3696_v15, %v3768_v58  ;;  %v3816_v39 = vld [vmem:[#allocation2 + $0x90] sm:$0xff] }
 0x3ce   : > { %v3720_v38 = vor.u32 %v3718_v49, %v10086_v60  ;;  %v3721_v16 = vrot.slane %v10086_v60, 4  ;;  %v3728_v1 = vor.u32 %v3726_v50, %v10088_v62  ;;  %v3729_v28 = vrot.slane %v10088_v62, 4  ;;  %3764 = vst [vmem:[#allocation2 + $0x10] sm:$0xff] %v3763_v8  ;;  %3770 = vst [vmem:[#allocation2 + $0x20] sm:$0xff] %v3769_v10 }
 0x3cf   : > { %v3733_v54 = vrot.slane %v3731_v45, 7  ;;  %v3741_v19 = vrot.slane %v3739_v11, 7  ;;  %v3775_v33 = vsel %vm9566_vm12, %v3704_v17, %v3774_v32  ;;  %v3781_v35 = vsel %vm9566_vm12, %v3712_v51, %v3780_v42 }
 0x3d0   : > { %v3787_v24 = vsel %vm9566_vm12, %v3720_v38, %v3786_v2  ;;  %v3793_v20 = vsel %vm9566_vm12, %v3728_v1, %v3792_v13  ;;  %v3811_v6 = vsel %vm9566_vm12, %v3696_v15, %v3810_v21  ;;  %3776 = vst [vmem:[#allocation2 + $0x30] sm:$0xff] %v3775_v33  ;;  %3782 = vst [vmem:[#allocation2 + $0x40] sm:$0xff] %v3781_v35 }
 0x3d1   : > { %v3766_v41 = vsel %vm9572_vm13, %v3689_v56, %v3765_v18  ;;  %v3736_v43 = vor.u32 %v3734_v0, %v3733_v54  ;;  %v3737_v46 = vrot.slane %v3733_v54, 4  ;;  %v3744_v34 = vor.u32 %v3742_v63, %v3741_v19  ;;  %3788 = vst [vmem:[#allocation2 + $0x50] sm:$0xff] %v3787_v24  ;;  %3794 = vst [vmem:[#allocation2 + $0x60] sm:$0xff] %v3793_v20 }
 0x3d2   : > { %v3745_v7 = vrot.slane %v3741_v19, 4  ;;  %3812 = vst [vmem:[#allocation2] sm:$0xff] %v3811_v6  ;;  %3767 = vst [vmem:[#allocation2 + $0x18] sm:$0x11] %v3766_v41  ;;  %v3772_v26 = vsel %vm9572_vm13, %v3697_v3, %v3771_v30  ;;  %v3814_v57 = vsel %vm9572_vm13, %v3697_v3, %v3813_v31  ;;  %v3778_v49 = vsel %vm9572_vm13, %v3705_v47, %v3777_v61 }
 0x3d3   : > { %v3784_v44 = vsel %vm9572_vm13, %v3713_v59, %v3783_v4  ;;  %v3799_v40 = vsel %vm9566_vm12, %v3736_v43, %v3798_v48  ;;  %v3805_v9 = vsel %vm9566_vm12, %v3744_v34, %v3804_v22  ;;  %v3817_v37 = vsel %vm9566_vm12, %v3736_v43, %v3816_v39  ;;  %3773 = vst [vmem:[#allocation2 + $0x28] sm:$0x11] %v3772_v26 }
 0x3d4   : > { %v3808_v50 = vsel %vm9572_vm13, %v3745_v7, %v3807_v53  ;;  %3815 = vst [vmem:[#allocation2 + $0x8] sm:$0x11] %v3814_v57  ;;  %3779 = vst [vmem:[#allocation2 + $0x38] sm:$0x11] %v3778_v49  ;;  %v3790_v56 = vsel %vm9572_vm13, %v3721_v16, %v3789_v25  ;;  %v3796_v15 = vsel %vm9572_vm13, %v3729_v28, %v3795_v36 }
 0x3d5   : > { %3785 = vst [vmem:[#allocation2 + $0x48] sm:$0x11] %v3784_v44  ;;  %3806 = vst [vmem:[#allocation2 + $0x80] sm:$0xff] %v3805_v9  ;;  %v3802_v3 = vsel %vm9572_vm13, %v3737_v46, %v3801_v29  ;;  %v3820_v23 = vsel %vm9572_vm13, %v3737_v46, %v3819_v12  ;;  %v3823_v52 = vld [vmem:[#allocation2 + $0x10] sm:$0x22] }
 0x3d6   : > { %3809 = vst [vmem:[#allocation2 + $0x88] sm:$0x11] %v3808_v50  ;;  %3800 = vst [vmem:[#allocation2 + $0x70] sm:$0xff] %v3799_v40  ;;  %v3824_v58 = vld [vmem:[#allocation2 + $0x20] sm:$0x22]  ;;  %v7533_v47 = vrot.slane %v3823_v52, 9 }
 0x3d7   : > { %3818 = vst [vmem:[#allocation2 + $0x90] sm:$0xff] %v3817_v37  ;;  %v3875_v17 = vld [vmem:[#allocation2 + $0x10] sm:$0x11]  ;;  %3791 = vst [vmem:[#allocation2 + $0x58] sm:$0x11] %v3790_v56  ;;  %v7534_v51 = vrot.slane %v3824_v58, 9 }
 0x3d8   : > { %3797 = vst [vmem:[#allocation2 + $0x68] sm:$0x11] %v3796_v15  ;;  %3803 = vst [vmem:[#allocation2 + $0x78] sm:$0x11] %v3802_v3  ;;  %v3878_v59 = vld [vmem:[#allocation2 + $0x20] sm:$0x11]  ;;  %v3876_v2 = vsel %vm9572_vm13, %v7533_v47, %v3875_v17 }
 0x3d9   : > { %3821 = vst [vmem:[#allocation2 + $0x98] sm:$0x11] %v3820_v23  ;;  %v3903_v32 = vld [vmem:[#allocation2 + $0x10] sm:$0x88]  ;;  %v3904_v60 = vld [vmem:[#allocation2 + $0x20] sm:$0x88]  ;;  %v3879_v11 = vsel %vm9572_vm13, %v7534_v51, %v3878_v59 }
 0x3da   : > { %v7543_v62 = vrot.slane %v3903_v32, 11  ;;  %v3825_v45 = vld [vmem:[#allocation2 + $0x30] sm:$0x22]  ;;  %v3822_v0 = vld [vmem:[#allocation2] sm:$0x22]  ;;  %v7544_v13 = vrot.slane %v3904_v60, 11 }
 0x3db   : > { %v3872_v42 = vld [vmem:[#allocation2] sm:$0x11]  ;;  %v3902_v63 = vld [vmem:[#allocation2] sm:$0x88]  ;;  %v7532_v8 = vrot.slane %v3822_v0, 9  ;;  %v7535_v18 = vrot.slane %v3825_v45, 9 }
 0x3dc   : > { %3877 = vst [vmem:[#allocation2 + $0x10] sm:$0x11] %v3876_v2  ;;  %3880 = vst [vmem:[#allocation2 + $0x20] sm:$0x11] %v3879_v11  ;;  %v7542_v10 = vrot.slane %v3902_v63, 11 }
 0x3dd   : > { %v3955_v21 = vld [vmem:[#allocation2 + $0x18] sm:$0x11]  ;;  %v3952_v38 = vld [vmem:[#allocation2 + $0x8] sm:$0x11]  ;;  %v3881_v28 = vld [vmem:[#allocation2 + $0x30] sm:$0x11]  ;;  %v3873_v30 = vsel %vm9572_vm13, %v7532_v8, %v3872_v42 }
 0x3de   : > { %v3956_v16 = vsel %vm9604_vm0, %v7543_v62, %v3955_v21  ;;  %v3958_v1 = vld [vmem:[#allocation2 + $0x28] sm:$0x11]  ;;  %v3830_v48 = vld [vmem:[#allocation2 + $0x80] sm:$0x22]  ;;  %v3896_v22 = vld [vmem:[#allocation2 + $0x80] sm:$0x11]  ;;  %v3953_v31 = vsel %vm9604_vm0, %v7542_v10, %v3952_v38  ;;  %v3882_v19 = vsel %vm9572_vm13, %v7535_v18, %v3881_v28 }
 0x3df   : > { %v3910_v53 = vld [vmem:[#allocation2 + $0x80] sm:$0x88]  ;;  %3957 = vst [vmem:[#allocation2 + $0x18] sm:$0x11] %v3956_v16  ;;  %v3959_v54 = vsel %vm9604_vm0, %v7544_v13, %v3958_v1  ;;  %v7540_v33 = vrot.slane %v3830_v48, 9 }
 0x3e0   : > { %v7550_v35 = vrot.slane %v3910_v53, 11  ;;  %v3976_v61 = vld [vmem:[#allocation2 + $0x88] sm:$0x11]  ;;  %3874 = vst [vmem:[#allocation2] sm:$0x11] %v3873_v30 }
 0x3e1   : > { %3954 = vst [vmem:[#allocation2 + $0x8] sm:$0x11] %v3953_v31  ;;  %3960 = vst [vmem:[#allocation2 + $0x28] sm:$0x11] %v3959_v54  ;;  %v3905_v4 = vld [vmem:[#allocation2 + $0x30] sm:$0x88]  ;;  %v3897_v39 = vsel %vm9572_vm13, %v7540_v33, %v3896_v22 }
 0x3e2   : > { %3883 = vst [vmem:[#allocation2 + $0x30] sm:$0x11] %v3882_v19  ;;  %v7545_v24 = vrot.slane %v3905_v4, 11  ;;  %v3961_v20 = vld [vmem:[#allocation2 + $0x38] sm:$0x11]  ;;  %v3977_v41 = vsel %vm9604_vm0, %v7550_v35, %v3976_v61 }
 0x3e3   : > { %v3826_v6 = vld [vmem:[#allocation2 + $0x40] sm:$0x22]  ;;  %v3827_v25 = vld [vmem:[#allocation2 + $0x50] sm:$0x22]  ;;  %v3884_v43 = vld [vmem:[#allocation2 + $0x40] sm:$0x11] }
 0x3e4   : > { %v7536_v36 = vrot.slane %v3826_v6, 9  ;;  %3898 = vst [vmem:[#allocation2 + $0x80] sm:$0x11] %v3897_v39  ;;  %3978 = vst [vmem:[#allocation2 + $0x88] sm:$0x11] %v3977_v41  ;;  %v3962_v46 = vsel %vm9604_vm0, %v7545_v24, %v3961_v20  ;;  %v7537_v34 = vrot.slane %v3827_v25, 9 }
 0x3e5   : > { %v3887_v7 = vld [vmem:[#allocation2 + $0x50] sm:$0x11]  ;;  %v3906_v29 = vld [vmem:[#allocation2 + $0x40] sm:$0x88]  ;;  %3963 = vst [vmem:[#allocation2 + $0x38] sm:$0x11] %v3962_v46 }
 0x3e6   : > { %v10158_v12 = vld [vmem:[#allocation2 + $0x10] sm:$0xff]  ;;  %v10160_v26 = vld [vmem:[#allocation2 + $0x20] sm:$0xff]  ;;  %v3885_v57 = vsel %vm9572_vm13, %v7536_v36, %v3884_v43  ;;  %v7546_v44 = vrot.slane %v3906_v29, 11  ;;  %v3964_v56 = vld [vmem:[#allocation2 + $0x48] sm:$0x11]  ;;  %v3888_v3 = vsel %vm9572_vm13, %v7537_v34, %v3887_v7 }
 0x3e7   : > { %v3907_v49 = vld [vmem:[#allocation2 + $0x50] sm:$0x88]  ;;  %v4193_v40 = vshrl.u32 %v10158_v12, 16  ;;  %v4196_v9 = vshll.u32 %v10158_v12, 16  ;;  %v4207_v50 = vshrl.u32 %v10160_v26, 16  ;;  %v4210_v37 = vshll.u32 %v10160_v26, 16 }
 0x3e8   : > { %3886 = vst [vmem:[#allocation2 + $0x40] sm:$0x11] %v3885_v57  ;;  %v10168_v15 = vld [vmem:[#allocation2 + $0x18] sm:$0x11]  ;;  %v7547_v23 = vrot.slane %v3907_v49, 11  ;;  %v3965_v52 = vsel %vm9604_vm0, %v7546_v44, %v3964_v56  ;;  %v10176_v17 = vld [vmem:[#allocation2] sm:$0xff] }
 0x3e9   : > { %v10178_v47 = vld [vmem:[#allocation2 + $0x8] sm:$0x11]  ;;  %v4195_v59 = vrot.slane %v4193_v40, 4  ;;  %3889 = vst [vmem:[#allocation2 + $0x50] sm:$0x11] %v3888_v3  ;;  %v4179_v60 = vshrl.u32 %v10176_v17, 16 }
 0x3ea   : > { %v10180_v51 = vld [vmem:[#allocation2 + $0x28] sm:$0x11]  ;;  %3966 = vst [vmem:[#allocation2 + $0x48] sm:$0x11] %v3965_v52  ;;  %v4182_v62 = vshll.u32 %v10176_v17, 16  ;;  %v4188_v45 = vshll.u32 %v10178_v47, 16 }
 0x3eb   : > { %v4198_v0 = vrot.slane %v4196_v9, 5  ;;  %v4202_v42 = vshll.u32 %v10168_v15, 16  ;;  %v4209_v2 = vrot.slane %v4207_v50, 4  ;;  %v4212_v11 = vrot.slane %v4210_v37, 5  ;;  %v10189_v8 = vld [vmem:[#allocation2 + $0x30] sm:$0xff] }
 0x3ec   : > { %v4216_v63 = vshll.u32 %v10180_v51, 16  ;;  %v4181_v10 = vrot.slane %v4179_v60, 4  ;;  %v4184_v13 = vrot.slane %v4182_v62, 5  ;;  %v4190_v18 = vrot.slane %v4188_v45, 5  ;;  %v10191_v1 = vld [vmem:[#allocation2 + $0x38] sm:$0x11] }
 0x3ed   : > { %v4199_v21 = vor.u32 %v4198_v0, %v4195_v59  ;;  %v4204_v38 = vrot.slane %v4202_v42, 5  ;;  %v4213_v16 = vor.u32 %v4212_v11, %v4209_v2  ;;  %v4221_v53 = vshrl.u32 %v10189_v8, 16  ;;  %v3967_v30 = vld [vmem:[#allocation2 + $0x58] sm:$0x11]  ;;  %v3828_v6 = vld [vmem:[#allocation2 + $0x60] sm:$0x22] }
 0x3ee   : > { %v4185_v28 = vor.u32 %v4184_v13, %v4181_v10  ;;  %v4218_v22 = vrot.slane %v4216_v63, 5  ;;  %v4224_v19 = vshll.u32 %v10189_v8, 16  ;;  %v4230_v33 = vshll.u32 %v10191_v1, 16  ;;  %v8744_v39 = vld [vmem:[#allocation8 + $0x400] ss:$8 sps:$4 sm:$0xff]  }
 0x3ef   : > { %v4200_v48 = vrot.slane %v4199_v21, 4  ;;  %v10194_v31 = vld [vmem:[#allocation2 + $0x40] sm:$0xff]  ;;  %v4214_v54 = vrot.slane %v4213_v16, 4  ;;  %v3968_v35 = vsel %vm9604_vm0, %v7547_v23, %v3967_v30  ;;  %v4223_v24 = vrot.slane %v4221_v53, 4  ;;  %v3829_v57 = vld [vmem:[#allocation2 + $0x70] sm:$0x22] }
 0x3f0   : > { %v4186_v61 = vrot.slane %v4185_v28, 4  ;;  %3969 = vst [vmem:[#allocation2 + $0x58] sm:$0x11] %v3968_v35  ;;  %v4235_v20 = vshrl.u32 %v10194_v31, 16  ;;  %v4226_v41 = vrot.slane %v4224_v19, 5  ;;  %v10205_v25 = vld [vmem:[#allocation2 + $0x50] sm:$0xff] }
 0x3f1   : > { %v10202_v4 = vsel %vm9628_vm3, %v4200_v48, %v4204_v38  ;;  %v10207_v36 = vld [vmem:[#allocation2 + $0x48] sm:$0x11]  ;;  %v4238_v43 = vshll.u32 %v10194_v31, 16  ;;  %v10214_v34 = vsel %vm9628_vm3, %v4214_v54, %v4218_v22  ;;  %v4232_v7 = vrot.slane %v4230_v33, 5  ;;  %v3908_v49 = vld [vmem:[#allocation2 + $0x60] sm:$0x88] }
 0x3f2   : > { %v4191_v46 = vsel %vm9628_vm3, %v4186_v61, %v4190_v18  ;;  %v4237_v29 = vrot.slane %v4235_v20, 4  ;;  %v4227_v9 = vor.u32 %v4226_v41, %v4223_v24  ;;  %v8749_v50 = vld [vmem:[#allocation8 + $0x414] ss:$8 sps:$4 sm:$0xff]   ;;  %v4244_v3 = vshll.u32 %v10207_v36, 16  ;;  %v3890_v60 = vld [vmem:[#allocation2 + $0x60] sm:$0x11] }
 0x3f3   : > { %v7552_v44 = vcombine.low %v4191_v46, %v10202_v4  ;;  %v7553_v40 = vcombine.high %v4191_v46, %v10202_v4  ;;  %v4240_v37 = vrot.slane %v4238_v43, 5  ;;  %v3909_v56 = vld [vmem:[#allocation2 + $0x70] sm:$0x88]  ;;  %v4249_v23 = vshrl.u32 %v10205_v25, 16  ;;  %v3893_v42 = vld [vmem:[#allocation2 + $0x70] sm:$0x11] }
 0x3f4   : > { %v4252_v52 = vshll.u32 %v10205_v25, 16  ;;  %v7538_v59 = vrot.slane %v3828_v6, 9  ;;  %v4228_v62 = vrot.slane %v4227_v9, 4  ;;  %v7539_v0 = vrot.slane %v3829_v57, 9  ;;  %v3970_v21 = vld [vmem:[#allocation2 + $0x68] sm:$0x11] }
 0x3f5   : > { %4983 = vmatprep.mubr.bf16.mxu1 %v7553_v40  ;;  %v4241_v45 = vor.u32 %v4240_v37, %v4237_v29  ;;  %v7548_v2 = vrot.slane %v3908_v49, 11  ;;  %v4251_v11 = vrot.slane %v4249_v23, 4  ;;  %v7549_v13 = vrot.slane %v3909_v56, 11  ;;  %v8747_v38 = vld [vmem:[#allocation8 + $0x410] ss:$8 sps:$4 sm:$0xff]  }
 0x3f6   : > { %4984 = vmatmul.mubr.bf16.vlgmr.msra.gmra.mrb[0].mxu1 %v7552_v44  ;;  %v4254_v63 = vrot.slane %v4252_v52, 5  ;;  %v3891_v10 = vsel %vm9572_vm13, %v7538_v59, %v3890_v60  ;;  %v10225_v18 = vsel %vm9628_vm3, %v4228_v62, %v4232_v7  ;;  %v3894_v48 = vsel %vm9572_vm13, %v7539_v0, %v3893_v42  ;;  %v8752_v30 = vld [vmem:[#allocation8 + $0x424] ss:$8 sps:$4 sm:$0xff]   ;;  %v3973_v35 = vld [vmem:[#allocation2 + $0x78] sm:$0x11] }
 0x3f7   : > { %5025 = vmatpush1.bf16.msra.mxu1 %v8744_v39  ;;  %v10227_v16 = vld [vmem:[#allocation2 + $0x58] sm:$0x11]  ;;  %v4242_v28 = vrot.slane %v4241_v45, 4  ;;  %3892 = vst [vmem:[#allocation2 + $0x60] sm:$0x11] %v3891_v10  ;;  %v3971_v22 = vsel %vm9604_vm0, %v7548_v2, %v3970_v21  ;;  %v10235_v53 = vcombine.high %v10214_v34, %v10225_v18  ;;  %v4246_v54 = vrot.slane %v4244_v3, 5 }
 0x3f8   : > { %5026 = vmatprep.subr.bf16.mxu1 %v8749_v50  ;;  %v4255_v19 = vor.u32 %v4254_v63, %v4251_v11  ;;  %v4258_v33 = vshll.u32 %v10227_v16, 16  ;;  %3895 = vst [vmem:[#allocation2 + $0x70] sm:$0x11] %v3894_v48  ;;  %3972 = vst [vmem:[#allocation2 + $0x68] sm:$0x11] %v3971_v22  ;;  %v3974_v61 = vsel %vm9604_vm0, %v7549_v13, %v3973_v35  ;;  %v10296_v11 = vld [vmem:[#allocation2 + $0x80] sm:$0xff] }
 0x3f9   : > { %4993 = vmatprep.mubr.bf16.mxu1 %v10235_v53  ;;  %v10243_v24 = vsel %vm9628_vm3, %v4242_v28, %v4246_v54  ;;  %3975 = vst [vmem:[#allocation2 + $0x78] sm:$0x11] %v3974_v61  ;;  %v8750_v39 = vld [vmem:[#allocation8 + $0x420] ss:$8 sps:$4 sm:$0xff]   ;;  %v10247_v41 = vcombine.low %v10214_v34, %v10225_v18  ;;  %v7667_v43 = vcombine.high %v10176_v17, %v10158_v12  ;;  %v8755_v7 = vld [vmem:[#allocation8 + $0x434] ss:$8 sps:$4 sm:$0xff]  }
 0x3fa   : > { %v4256_v20 = vrot.slane %v4255_v19, 4  ;;  %v4260_v6 = vrot.slane %v4258_v33, 5  ;;  %v7666_v29 = vcombine.low %v10176_v17, %v10158_v12  ;;  %v10259_v57 = vcombine.high %v10160_v26, %v10189_v8  ;;  %v8753_v40 = vld [vmem:[#allocation8 + $0x430] ss:$8 sps:$4 sm:$0xff]   ;;  %v8758_v45 = vld [vmem:[#allocation8 + $0x444] ss:$8 sps:$4 sm:$0xff]  }
 0x3fb   : > { %5027 = vmatpush1.bf16.msra.mxu1 %v8747_v38  ;;  %v10263_v49 = vcombine.low %v10160_v26, %v10189_v8  ;;  %v10274_v50 = vcombine.high %v10194_v31, %v10205_v25  ;;  %v10278_v37 = vcombine.low %v10194_v31, %v10205_v25  ;;  %v5957_v10 = vrot.slane %v10178_v47, 5  ;;  %v8756_v13 = vld [vmem:[#allocation8 + $0x440] ss:$8 sps:$4 sm:$0xff]   ;;  %v8761_v33 = vld [vmem:[#allocation8 + $0x454] ss:$8 sps:$4 sm:$0xff]  }
 0x3fc   : > { %5028 = vmatprep.subr.bf16.mxu1 %v8752_v30  ;;  %v10253_v46 = vsel %vm9628_vm3, %v4256_v20, %v4260_v6  ;;  %v5961_v22 = vrot.slane %v10168_v15, 5  ;;  %v3831_v47 = vld [vmem:[#allocation2 + $0x90] sm:$0x22]  ;;  %v3911_v20 = vld [vmem:[#allocation2 + $0x90] sm:$0x88]  ;;  %v7558_v58 = vcombine.low %v10225_v18, %v10243_v24 }
 0x3fd   : > { %v10267_v44 = vcombine.high %v10243_v24, %v10253_v46  ;;  %v10317_v15 = vcombine.low %v10243_v24, %v10253_v46  ;;  %v5906_v6 = vld [vmem:[#allocation2 + $0x10] sm:$0xee]  ;;  %v8786_v56 = vld [vmem:[#allocation8 + $0x4e0] ss:$8 sps:$4 sm:$0xff]  }
 0x3fe   : > { %4994 = vmatmul.mubr.bf16.gmra.mrb[4].mxu1 %v10247_v41  ;;  %v10270_v9 = vld [vmem:[#allocation2 + $0x60] sm:$0xff]  ;;  %v8771_v3 = vld [vmem:[#allocation8 + $0x490] ss:$8 sps:$4 sm:$0xff]  }
 0x3ff   : > { %5029 = vmatpush1.bf16.msra.mxu1 %v8750_v39  ;;  %5003 = vmatprep.mubr.bf16.mxu1 %v10267_v44  ;;  %v10285_v23 = vld [vmem:[#allocation2 + $0x70] sm:$0xff]  ;;  %v10287_v52 = vld [vmem:[#allocation2 + $0x68] sm:$0x11]  ;;  %v4263_v59 = vshrl.u32 %v10270_v9, 16  ;;  %v4266_v60 = vshll.u32 %v10270_v9, 16 }
 0x400   : > { %5030 = vmatprep.subr.bf16.mxu1 %v8755_v7  ;;  %v4272_v0 = vshll.u32 %v10287_v52, 16  ;;  %v4277_v42 = vshrl.u32 %v10285_v23, 16  ;;  %v4280_v2 = vshll.u32 %v10285_v23, 16  ;;  %v10300_v63 = vcombine.high %v10270_v9, %v10285_v23  ;;  %v10303_v21 = vld [vmem:[#allocation2 + $0x78] sm:$0x11] }
 0x401   : > { %v4265_v38 = vrot.slane %v4263_v59, 4  ;;  %v4268_v28 = vrot.slane %v4266_v60, 5  ;;  %v10307_v48 = vcombine.low %v10270_v9, %v10285_v23  ;;  %v4286_v19 = vshll.u32 %v10303_v21, 16  ;;  %v3899_v60 = vld [vmem:[#allocation2 + $0x90] sm:$0x11] }
 0x402   : > { %v4279_v30 = vrot.slane %v4277_v42, 4  ;;  %v4282_v54 = vrot.slane %v4280_v2, 5  ;;  %v4274_v61 = vrot.slane %v4272_v0, 5  ;;  %v7541_v59 = vrot.slane %v3831_v47, 9  ;;  %v8904_v17 = vld [vmem:[#allocation8 + $0x140] ss:$8 sps:$4 sm:$0xff]  }
 0x403   : > { %5031 = vmatpush1.bf16.msra.mxu1 %v8753_v40  ;;  %v4269_v35 = vor.u32 %v4268_v28, %v4265_v38  ;;  %v7551_v42 = vrot.slane %v3911_v20, 11  ;;  %v3979_v40 = vld [vmem:[#allocation2 + $0x98] sm:$0x11]  ;;  %v4288_v0 = vrot.slane %v4286_v19, 5  ;;  %v5905_v28 = vld [vmem:[#allocation2] sm:$0xee] }
 0x404   : > { %5032 = vmatprep.subr.bf16.mxu1 %v8758_v45  ;;  %v4283_v7 = vor.u32 %v4282_v54, %v4279_v30  ;;  %v8759_v45 = vld [vmem:[#allocation8 + $0x450] ss:$8 sps:$4 sm:$0xff]   ;;  %v3900_v62 = vsel %vm9572_vm13, %v7541_v59, %v3899_v60  ;;  %v7780_v54 = vrot.slane %v5905_v28, 9  ;;  %v7781_v47 = vrot.slane %v5906_v6, 9  ;;  %v5909_v59 = vld [vmem:[#allocation2 + $0x40] sm:$0xee] }
 0x405   : > { %v4270_v2 = vrot.slane %v4269_v35, 4  ;;  %v3980_v30 = vsel %vm9604_vm0, %v7551_v42, %v3979_v40  ;;  %v8764_v35 = vld [vmem:[#allocation8 + $0x464] ss:$8 sps:$4 sm:$0xff]   ;;  %3901 = vst [vmem:[#allocation2 + $0x90] sm:$0x11] %v3900_v62  ;;  %v5965_v20 = vrot.slane %v10180_v51, 5  ;;  %v7555_v51 = vcombine.high %v10202_v4, %v10214_v34 }
 0x406   : > { %5004 = vmatmul.mubr.bf16.gmra.mrb[8].mxu1 %v10317_v15  ;;  %v4284_v39 = vrot.slane %v4283_v7, 4  ;;  %3981 = vst [vmem:[#allocation2 + $0x98] sm:$0x11] %v3980_v30  ;;  %v5969_v7 = vrot.slane %v10191_v1, 5  ;;  %v10338_v5 = vsel %vm9872_vm6, %v7780_v54, %v5957_v10  ;;  %v5910_v1 = vld [vmem:[#allocation2 + $0x50] sm:$0xee] }
 0x407   : > { %5033 = vmatpush1.bf16.msra.mxu1 %v8756_v13  ;;  %v10328_v19 = vsel %vm9628_vm3, %v4270_v2, %v4274_v61  ;;  %v5907_v13 = vld [vmem:[#allocation2 + $0x20] sm:$0xee]  ;;  %v5908_v61 = vld [vmem:[#allocation2 + $0x30] sm:$0xee]  ;;  %v7784_v2 = vrot.slane %v5909_v59, 9  ;;  %v7785_v54 = vrot.slane %v5910_v1, 9 }
 0x408   : > { %v10334_v27 = vsel %vm9628_vm3, %v4284_v39, %v4288_v0  ;;  %5034 = vmatprep.subr.bf16.mxu1 %v8761_v33  ;;  %v10352_v33 = vsel %vm9872_vm6, %v7781_v47, %v5961_v22  ;;  %v7782_v10 = vrot.slane %v5907_v13, 9  ;;  %v7783_v39 = vrot.slane %v5908_v61, 9  ;;  %v8762_v60 = vld [vmem:[#allocation8 + $0x460] ss:$8 sps:$4 sm:$0xff]   ;;  %v8767_v30 = vld [vmem:[#allocation8 + $0x474] ss:$8 sps:$4 sm:$0xff]  }
 0x409   : > { %v10342_v62 = vcombine.high %v10328_v19, %v10334_v27  ;;  %v10348_v6 = vcombine.low %v10328_v19, %v10334_v27  ;;  %v5973_v0 = vrot.slane %v10207_v36, 5  ;;  %v5911_v28 = vld [vmem:[#allocation2 + $0x60] sm:$0xee]  ;;  %v5977_v47 = vrot.slane %v10227_v16, 5  ;;  %v5912_v61 = vld [vmem:[#allocation2 + $0x70] sm:$0xee] }
 0x40a   : > { %v10362_v22 = vsel %vm9872_vm6, %v7782_v10, %v5965_v20  ;;  %v5981_v20 = vrot.slane %v10287_v52, 5  ;;  %v7786_v59 = vrot.slane %v5911_v28, 9  ;;  %v7787_v10 = vrot.slane %v5912_v61, 9  ;;  %v5914_v42 = vld [vmem:[#allocation2 + $0x90] sm:$0xee] }
 0x40b   : > { %5013 = vmatprep.mubr.bf16.mxu1 %v10342_v62  ;;  %5035 = vmatpush1.bf16.msra.mxu1 %v8759_v45  ;;  %v10366_v45 = vsel %vm9872_vm6, %v7783_v39, %v5969_v7  ;;  %v10387_v16 = vsel %vm9872_vm6, %v7785_v54, %v5977_v47  ;;  %v8765_v39 = vld [vmem:[#allocation8 + $0x470] ss:$8 sps:$4 sm:$0xff]   ;;  %v5985_v1 = vrot.slane %v10303_v21, 5  ;;  %v8773_v40 = vld [vmem:[#allocation8 + $0x494] ss:$8 sps:$4 sm:$0xff]  }
 0x40c   : > { %5036 = vmatprep.subr.bf16.mxu1 %v8764_v35  ;;  %v10371_v13 = vcombine.high %v10362_v22, %v10366_v45  ;;  %v10375_v36 = vcombine.low %v10362_v22, %v10366_v45  ;;  %v10379_v35 = vsel %vm9872_vm6, %v7784_v2, %v5973_v0  ;;  %v10383_v7 = vld [vmem:[#allocation2 + $0x90] sm:$0xff]  ;;  %v8770_v2 = vld [vmem:[#allocation8 + $0x484] ss:$8 sps:$4 sm:$0xff]  }
 0x40d   : > { %v10395_v0 = vld [vmem:[#allocation2 + $0x88] sm:$0x11]  ;;  %v10401_v28 = vcombine.high %v10379_v35, %v10387_v16  ;;  %v10405_v47 = vcombine.low %v10379_v35, %v10387_v16  ;;  %v10424_v61 = vsel %vm9872_vm6, %v7787_v10, %v5985_v1  ;;  %v8779_v10 = vld [vmem:[#allocation8 + $0x4b4] ss:$8 sps:$4 sm:$0xff]  }
 0x40e   : > { %5014 = vmatmul.mubr.bf16.gmra.mrb[12].mxu1 %v10348_v6  ;;  %v5989_v38 = vrot.slane %v10395_v0, 5 }
 0x40f   : > { %5037 = vmatpush1.bf16.msra.mxu1 %v8762_v60  ;;  %5056 = vmatprep.mubr.bf16.mxu1 %v7555_v51  ;;  %v10409_v51 = vsel %vm9872_vm6, %v7786_v59, %v5981_v20  ;;  %v5913_v60 = vld [vmem:[#allocation2 + $0x80] sm:$0xee]  ;;  %v7789_v20 = vrot.slane %v5914_v42, 9 }
 0x410   : > { %5038 = vmatprep.subr.bf16.mxu1 %v8767_v30  ;;  %v10411_v30 = vld [vmem:[#allocation2 + $0x98] sm:$0x11]  ;;  %v8768_v59 = vld [vmem:[#allocation8 + $0x480] ss:$8 sps:$4 sm:$0xff]   ;;  %v7788_v21 = vrot.slane %v5913_v60, 9  ;;  %v10429_v54 = vcombine.high %v10409_v51, %v10424_v61  ;;  %v10433_v52 = vcombine.low %v10409_v51, %v10424_v61 }
 0x411   : > { %v8788_v42 = vld [vmem:[#allocation8 + $0x4e4] ss:$8 sps:$4 sm:$0xff]  }
 0x412   : > { %v10438_v1 = vsel %vm9872_vm6, %v7788_v21, %v5989_v38  ;;  %v8776_v38 = vld [vmem:[#allocation8 + $0x4a4] ss:$8 sps:$4 sm:$0xff]   ;;  %v8774_v21 = vld [vmem:[#allocation8 + $0x4a0] ss:$8 sps:$4 sm:$0xff]  }
 0x413   : > { %5039 = vmatpush1.bf16.msra.mxu1 %v8765_v39  ;;  %v5993_v39 = vrot.slane %v10411_v30, 5 }
 0x414   : > { %5040 = vmatprep.subr.bf16.mxu1 %v8770_v2  ;;  %v8777_v2 = vld [vmem:[#allocation8 + $0x4b0] ss:$8 sps:$4 sm:$0xff]  }
 0x415   : > { %v10446_v60 = vsel %vm9872_vm6, %v7789_v20, %v5993_v39  ;;  %v8780_v20 = vld [vmem:[#allocation8 + $0x4c0] ss:$8 sps:$4 sm:$0xff]   ;;  %v8783_v39 = vld [vmem:[#allocation8 + $0x4d0] ss:$8 sps:$4 sm:$0xff]  }
 0x417   : > { %5041 = vmatpush1.bf16.msra.mxu1 %v8768_v59  ;;  %v8785_v59 = vld [vmem:[#allocation8 + $0x4d4] ss:$8 sps:$4 sm:$0xff]  }
 0x418   : > { %5042 = vmatprep.subr.bf16.mxu1 %v8773_v40  ;;  %v8791_v40 = vld [vmem:[#allocation8 + $0x4f4] ss:$8 sps:$4 sm:$0xff]  }
 0x41b   : > { %5043 = vmatpush1.bf16.msra.mxu1 %v8771_v3  ;;  %v8789_v3 = vld [vmem:[#allocation8 + $0x4f0] ss:$8 sps:$4 sm:$0xff]  }
 0x41c   : > { %5044 = vmatprep.subr.bf16.mxu1 %v8776_v38  ;;  %v8794_v38 = vld [vmem:[#allocation8 + $0x504] ss:$8 sps:$4 sm:$0xff]  }
 0x41f   : > { %5045 = vmatpush1.bf16.msra.mxu1 %v8774_v21  ;;  %v4291_v21 = vshrl.u32 %v10296_v11, 16 }
 0x420   : > { %5046 = vmatprep.subr.bf16.mxu1 %v8779_v10  ;;  %v4294_v10 = vshll.u32 %v10296_v11, 16 }
 0x423   : > { %5047 = vmatpush1.bf16.msra.mxu1 %v8777_v2  ;;  %v8792_v2 = vld [vmem:[#allocation8 + $0x500] ss:$8 sps:$4 sm:$0xff]  }
 0x424   : > { %5048 = vmatprep.subr.bf16.mxu1 %v8782_v14  ;;  %v7554_v14 = vcombine.low %v10202_v4, %v10214_v34  ;;  %v8803_v4 = vld [vmem:[#allocation8 + $0x534] ss:$8 sps:$4 sm:$0xff]   ;;  %v4300_v34 = vshll.u32 %v10395_v0, 16 }
 0x425   : > { %v8809_v0 = vld [vmem:[#allocation8 + $0x554] ss:$8 sps:$4 sm:$0xff]  }
 0x427   : > { %5049 = vmatpush1.bf16.msra.mxu1 %v8780_v20  ;;  %v8797_v20 = vld [vmem:[#allocation8 + $0x514] ss:$8 sps:$4 sm:$0xff]  }
 0x428   : > { %5050 = vmatprep.subr.bf16.mxu1 %v8785_v59  ;;  %v7559_v59 = vcombine.high %v10225_v18, %v10243_v24  ;;  %v8804_v18 = vld [vmem:[#allocation8 + $0x540] ss:$8 sps:$4 sm:$0xff]   ;;  %v7562_v24 = vcombine.low %v10253_v46, %v10328_v19 }
 0x42b   : > { %5051 = vmatpush1.bf16.msra.mxu1 %v8783_v39  ;;  %v8795_v39 = vld [vmem:[#allocation8 + $0x510] ss:$8 sps:$4 sm:$0xff]  }
 0x42c   : > { %5052 = vmatprep.subr.bf16.mxu1 %v8788_v42  ;;  %v4293_v42 = vrot.slane %v4291_v21, 4 }
 0x42f   : > { %5053 = vmatpush1.bf16.msra.mxu1 %v8786_v56  ;;  %v4296_v56 = vrot.slane %v4294_v10, 5  ;;  %v8801_v10 = vld [vmem:[#allocation8 + $0x530] ss:$8 sps:$4 sm:$0xff]  }
 0x430   : > { %5054 = vmatprep.subr.bf16.mxu1 %v8791_v40  ;;  %v8800_v40 = vld [vmem:[#allocation8 + $0x524] ss:$8 sps:$4 sm:$0xff]  }
 0x431   : > { %v4297_v32 = vor.u32 %v4296_v56, %v4293_v42  ;;  %v8810_v42 = vld [vmem:[#allocation8 + $0x560] ss:$8 sps:$4 sm:$0xff]  }
 0x433   : > { %5055 = vmatpush1.bf16.msra.mxu1 %v8789_v3  ;;  %v8798_v3 = vld [vmem:[#allocation8 + $0x520] ss:$8 sps:$4 sm:$0xff]   ;;  %v4298_v21 = vrot.slane %v4297_v32, 4  ;;  %v8807_v32 = vld [vmem:[#allocation8 + $0x550] ss:$8 sps:$4 sm:$0xff]  }
 0x434   : > { %5097 = vmatprep.subr.bf16.mxu1 %v8794_v38  ;;  %v7563_v38 = vcombine.high %v10253_v46, %v10328_v19  ;;  %v8813_v46 = vld [vmem:[#allocation8 + $0x570] ss:$8 sps:$4 sm:$0xff]   ;;  %v8818_v19 = vld [vmem:[#allocation8 + $0x584] ss:$8 sps:$4 sm:$0xff]  }
 0x436   : > { %5057 = vmatmul.mubr.bf16.vlgmr.msra.gmra.mrb[0].mxu1 %v7554_v14  ;;  %v4302_v14 = vrot.slane %v4300_v34, 5  ;;  %v8824_v34 = vld [vmem:[#allocation8 + $0x5a4] ss:$8 sps:$4 sm:$0xff]  }
 0x437   : > { %5066 = vmatprep.mubr.bf16.mxu1 %v7559_v59  ;;  %5098 = vmatpush1.bf16.msra.mxu1 %v8792_v2  ;;  %v8806_v2 = vld [vmem:[#allocation8 + $0x544] ss:$8 sps:$4 sm:$0xff]  }
 0x438   : > { %5099 = vmatprep.subr.bf16.mxu1 %v8797_v20  ;;  %v10465_v20 = vsel %vm9628_vm3, %v4298_v21, %v4302_v14  ;;  %v8812_v59 = vld [vmem:[#allocation8 + $0x564] ss:$8 sps:$4 sm:$0xff]   ;;  %v8825_v21 = vld [vmem:[#allocation8 + $0x5b0] ss:$8 sps:$4 sm:$0xff]  }
 0x439   : > { %v7566_v56 = vcombine.low %v10334_v27, %v10465_v20  ;;  %v8831_v14 = vld [vmem:[#allocation8 + $0x5d0] ss:$8 sps:$4 sm:$0xff]  }
 0x43b   : > { %5100 = vmatpush1.bf16.msra.mxu1 %v8795_v39  ;;  %v8815_v39 = vld [vmem:[#allocation8 + $0x574] ss:$8 sps:$4 sm:$0xff]  }
 0x43c   : > { %5101 = vmatprep.subr.bf16.mxu1 %v8800_v40  ;;  %v8816_v40 = vld [vmem:[#allocation8 + $0x580] ss:$8 sps:$4 sm:$0xff]  }
 0x43e   : > { %5067 = vmatmul.mubr.bf16.gmra.mrb[4].mxu1 %v7558_v58  ;;  %v7567_v58 = vcombine.high %v10334_v27, %v10465_v20  ;;  %v8827_v27 = vld [vmem:[#allocation8 + $0x5b4] ss:$8 sps:$4 sm:$0xff]  }
 0x43f   : > { %5076 = vmatprep.mubr.bf16.mxu1 %v7563_v38  ;;  %5102 = vmatpush1.bf16.msra.mxu1 %v8798_v3  ;;  %v8821_v3 = vld [vmem:[#allocation8 + $0x594] ss:$8 sps:$4 sm:$0xff]   ;;  %v8822_v38 = vld [vmem:[#allocation8 + $0x5a0] ss:$8 sps:$4 sm:$0xff]  }
 0x440   : > { %5103 = vmatprep.subr.bf16.mxu1 %v8803_v4  ;;  %v8819_v4 = vld [vmem:[#allocation8 + $0x590] ss:$8 sps:$4 sm:$0xff]  }
 0x443   : > { %5104 = vmatpush1.bf16.msra.mxu1 %v8801_v10  ;;  %v8830_v10 = vld [vmem:[#allocation8 + $0x5c4] ss:$8 sps:$4 sm:$0xff]  }
 0x444   : > { %5105 = vmatprep.subr.bf16.mxu1 %v8806_v2  ;;  %v8833_v2 = vld [vmem:[#allocation8 + $0x5d4] ss:$8 sps:$4 sm:$0xff]  }
 0x446   : > { %5077 = vmatmul.mubr.bf16.gmra.mrb[8].mxu1 %v7562_v24  ;;  %v8834_v24 = vld [vmem:[#allocation8 + $0x5e0] ss:$8 sps:$4 sm:$0xff]  }
 0x447   : > { %5086 = vmatprep.mubr.bf16.mxu1 %v7567_v58  ;;  %5106 = vmatpush1.bf16.msra.mxu1 %v8804_v18  ;;  %v8836_v18 = vld [vmem:[#allocation8 + $0x5e4] ss:$8 sps:$4 sm:$0xff]   ;;  %v8837_v58 = vld [vmem:[#allocation8 + $0x5f0] ss:$8 sps:$4 sm:$0xff]  }
 0x448   : > { %5107 = vmatprep.subr.bf16.mxu1 %v8809_v0  ;;  %v8839_v0 = vld [vmem:[#allocation8 + $0x5f4] ss:$8 sps:$4 sm:$0xff]  }
 0x44b   : > { %5108 = vmatpush1.bf16.msra.mxu1 %v8807_v32  ;;  %v8842_v32 = vld [vmem:[#allocation8 + $0x4] ss:$8 sps:$4 sm:$0xff]  }
 0x44c   : > { %5109 = vmatprep.subr.bf16.mxu1 %v8812_v59  ;;  %v4305_v59 = vshrl.u32 %v10383_v7, 16 }
 0x44e   : > { %5087 = vmatmul.mubr.bf16.gmra.mrb[12].mxu1 %v7566_v56  ;;  %v8840_v56 = vld [vmem:[#allocation8] ss:$8 sps:$4 sm:$0xff]  }
 0x44f   : > { %5110 = vmatpush1.bf16.msra.mxu1 %v8810_v42  ;;  %5129 = vmatprep.mubr.bf16.mxu1 %v10235_v53  ;;  %v8828_v53 = vld [vmem:[#allocation8 + $0x5c0] ss:$8 sps:$4 sm:$0xff]   ;;  %v4308_v42 = vshll.u32 %v10383_v7, 16 }
 0x450   : > { %5111 = vmatprep.subr.bf16.mxu1 %v8815_v39  ;;  %v8845_v39 = vld [vmem:[#allocation8 + $0x14] ss:$8 sps:$4 sm:$0xff]  }
 0x453   : > { %5112 = vmatpush1.bf16.msra.mxu1 %v8813_v46  ;;  %v4307_v46 = vrot.slane %v4305_v59, 4  ;;  %v8868_v59 = vld [vmem:[#allocation8 + $0x90] ss:$8 sps:$4 sm:$0xff]  }
 0x454   : > { %5113 = vmatprep.subr.bf16.mxu1 %v8818_v19  ;;  %v4310_v19 = vrot.slane %v4308_v42, 5  ;;  %v8873_v42 = vld [vmem:[#allocation8 + $0xa4] ss:$8 sps:$4 sm:$0xff]  }
 0x457   : > { %5114 = vmatpush1.bf16.msra.mxu1 %v8816_v40  ;;  %v8843_v40 = vld [vmem:[#allocation8 + $0x10] ss:$8 sps:$4 sm:$0xff]  }
 0x458   : > { %5115 = vmatprep.subr.bf16.mxu1 %v8821_v3  ;;  %v8848_v3 = vld [vmem:[#allocation8 + $0x24] ss:$8 sps:$4 sm:$0xff]  }
 0x45b   : > { %5116 = vmatpush1.bf16.msra.mxu1 %v8819_v4  ;;  %v4311_v4 = vor.u32 %v4310_v19, %v4307_v46  ;;  %v8879_v46 = vld [vmem:[#allocation8 + $0xc4] ss:$8 sps:$4 sm:$0xff]   ;;  %v8882_v19 = vld [vmem:[#allocation8 + $0xd4] ss:$8 sps:$4 sm:$0xff]  }
 0x45c   : > { %5117 = vmatprep.subr.bf16.mxu1 %v8824_v34  ;;  %v8846_v34 = vld [vmem:[#allocation8 + $0x20] ss:$8 sps:$4 sm:$0xff]  }
 0x45f   : > { %5118 = vmatpush1.bf16.msra.mxu1 %v8822_v38  ;;  %v8851_v38 = vld [vmem:[#allocation8 + $0x34] ss:$8 sps:$4 sm:$0xff]  }
 0x460   : > { %5119 = vmatprep.subr.bf16.mxu1 %v8827_v27  ;;  %v4314_v27 = vshll.u32 %v10411_v30, 16  ;;  %v8858_v30 = vld [vmem:[#allocation8 + $0x60] ss:$8 sps:$4 sm:$0xff]  }
 0x463   : > { %5120 = vmatpush1.bf16.msra.mxu1 %v8825_v21  ;;  %v4312_v21 = vrot.slane %v4311_v4, 4  ;;  %v8883_v4 = vld [vmem:[#allocation8 + $0xe0] ss:$8 sps:$4 sm:$0xff]  }
 0x464   : > { %5121 = vmatprep.subr.bf16.mxu1 %v8830_v10  ;;  %v4316_v10 = vrot.slane %v4314_v27, 5  ;;  %v8892_v27 = vld [vmem:[#allocation8 + $0x104] ss:$8 sps:$4 sm:$0xff]  }
 0x467   : > { %5122 = vmatpush1.bf16.msra.mxu1 %v8828_v53  ;;  %v4317_v53 = vsel %vm9628_vm3, %v4312_v21, %v4316_v10  ;;  %v8890_v21 = vld [vmem:[#allocation8 + $0x100] ss:$8 sps:$4 sm:$0xff]   ;;  %v8898_v10 = vld [vmem:[#allocation8 + $0x124] ss:$8 sps:$4 sm:$0xff]  }
 0x468   : > { %5123 = vmatprep.subr.bf16.mxu1 %v8833_v2  ;;  %v8852_v2 = vld [vmem:[#allocation8 + $0x40] ss:$8 sps:$4 sm:$0xff]  }
 0x46b   : > { %5124 = vmatpush1.bf16.msra.mxu1 %v8831_v14  ;;  %v8857_v14 = vld [vmem:[#allocation8 + $0x54] ss:$8 sps:$4 sm:$0xff]  }
 0x46c   : > { %5125 = vmatprep.subr.bf16.mxu1 %v8836_v18  ;;  %v7569_v18 = vcombine.high %v10465_v20, %v4317_v53 }
 0x46f   : > { %5126 = vmatpush1.bf16.msra.mxu1 %v8834_v24  ;;  %v7568_v24 = vcombine.low %v10465_v20, %v4317_v53  ;;  %v8871_v20 = vld [vmem:[#allocation8 + $0xa0] ss:$8 sps:$4 sm:$0xff]  }
 0x470   : > { %5127 = vmatprep.subr.bf16.mxu1 %v8839_v0  ;;  %v8862_v0 = vld [vmem:[#allocation8 + $0x70] ss:$8 sps:$4 sm:$0xff]   ;;  %v8896_v53 = vld [vmem:[#allocation8 + $0x120] ss:$8 sps:$4 sm:$0xff]  }
 0x473   : > { %5128 = vmatpush1.bf16.msra.mxu1 %v8837_v58  ;;  %v8865_v58 = vld [vmem:[#allocation8 + $0x80] ss:$8 sps:$4 sm:$0xff]  }
 0x474   : > { %5686 = vmatprep.subr.bf16.mxu1 %v8842_v32  ;;  %v8870_v32 = vld [vmem:[#allocation8 + $0x94] ss:$8 sps:$4 sm:$0xff]  }
 0x476   : > { %5130 = vmatmul.mubr.bf16.vlgmr.msra.gmra.mrb[0].mxu1 %v10247_v41  ;;  %v8849_v41 = vld [vmem:[#allocation8 + $0x30] ss:$8 sps:$4 sm:$0xff]  }
 0x477   : > { %5139 = vmatprep.mubr.bf16.mxu1 %v10267_v44  ;;  %5687 = vmatpush1.bf16.msra.mxu1 %v8840_v56  ;;  %v8854_v44 = vld [vmem:[#allocation8 + $0x44] ss:$8 sps:$4 sm:$0xff]   ;;  %v8876_v56 = vld [vmem:[#allocation8 + $0xb4] ss:$8 sps:$4 sm:$0xff]  }
 0x478   : > { %5688 = vmatprep.subr.bf16.mxu1 %v8845_v39  ;;  %v8874_v39 = vld [vmem:[#allocation8 + $0xb0] ss:$8 sps:$4 sm:$0xff]  }
 0x47b   : > { %5689 = vmatpush1.bf16.msra.mxu1 %v8843_v40  ;;  %v8880_v40 = vld [vmem:[#allocation8 + $0xd0] ss:$8 sps:$4 sm:$0xff]  }
 0x47c   : > { %5690 = vmatprep.subr.bf16.mxu1 %v8848_v3  ;;  %v8885_v3 = vld [vmem:[#allocation8 + $0xe4] ss:$8 sps:$4 sm:$0xff]  }
 0x47e   : > { %5140 = vmatmul.mubr.bf16.gmra.mrb[4].mxu1 %v10317_v15  ;;  %v8855_v15 = vld [vmem:[#allocation8 + $0x50] ss:$8 sps:$4 sm:$0xff]  }
 0x47f   : > { %5149 = vmatprep.mubr.bf16.mxu1 %v10342_v62  ;;  %5691 = vmatpush1.bf16.msra.mxu1 %v8846_v34  ;;  %v8860_v62 = vld [vmem:[#allocation8 + $0x64] ss:$8 sps:$4 sm:$0xff]   ;;  %v8888_v34 = vld [vmem:[#allocation8 + $0xf4] ss:$8 sps:$4 sm:$0xff]  }
 0x480   : > { %5692 = vmatprep.subr.bf16.mxu1 %v8851_v38  ;;  %v8886_v38 = vld [vmem:[#allocation8 + $0xf0] ss:$8 sps:$4 sm:$0xff]  }
 0x483   : > { %5693 = vmatpush1.bf16.msra.mxu1 %v8849_v41  ;;  %v8895_v41 = vld [vmem:[#allocation8 + $0x114] ss:$8 sps:$4 sm:$0xff]  }
 0x484   : > { %5694 = vmatprep.subr.bf16.mxu1 %v8854_v44  ;;  %v8893_v44 = vld [vmem:[#allocation8 + $0x110] ss:$8 sps:$4 sm:$0xff]  }
 0x486   : > { %5150 = vmatmul.mubr.bf16.gmra.mrb[8].mxu1 %v10348_v6  ;;  %v8867_v6 = vld [vmem:[#allocation8 + $0x84] ss:$8 sps:$4 sm:$0xff]  }
 0x487   : > { %5159 = vmatprep.mubr.bf16.mxu1 %v7569_v18  ;;  %5695 = vmatpush1.bf16.msra.mxu1 %v8852_v2  ;;  %v8902_v2 = vld [vmem:[#allocation8 + $0x134] ss:$8 sps:$4 sm:$0xff]   ;;  %v8906_v18 = vld [vmem:[#allocation8 + $0x144] ss:$8 sps:$4 sm:$0xff]  }
 0x488   : > { %5696 = vmatprep.subr.bf16.mxu1 %v8857_v14  ;;  %v8900_v14 = vld [vmem:[#allocation8 + $0x130] ss:$8 sps:$4 sm:$0xff]  }
 0x48b   : > { %5697 = vmatpush1.bf16.msra.mxu1 %v8855_v15  ;;  %v8908_v15 = vld [vmem:[#allocation8 + $0x150] ss:$8 sps:$4 sm:$0xff]  }
 0x48c   : > { %5698 = vmatprep.subr.bf16.mxu1 %v8860_v62  ;;  %v8914_v62 = vld [vmem:[#allocation8 + $0x164] ss:$8 sps:$4 sm:$0xff]  }
 0x48e   : > { %5160 = vmatmul.mubr.bf16.gmra.mrb[12].mxu1 %v7568_v24  ;;  %v8918_v24 = vld [vmem:[#allocation8 + $0x174] ss:$8 sps:$4 sm:$0xff]  }
 0x48f   : > { %5699 = vmatpush1.bf16.msra.mxu1 %v8858_v30  ;;  %5718 = vmatprep.mubr.bf16.mxu1 %v7667_v43  ;;  %v8877_v43 = vld [vmem:[#allocation8 + $0xc0] ss:$8 sps:$4 sm:$0xff]  }
 0x490   : > { %5700 = vmatprep.subr.bf16.mxu1 %v8864_v55  ;;  %v8912_v30 = vld [vmem:[#allocation8 + $0x160] ss:$8 sps:$4 sm:$0xff]   ;;  %v10814_v55 = vcombine.high %v10158_v12, %v10160_v26 }
 0x493   : > { %5701 = vmatpush1.bf16.msra.mxu1 %v8862_v0  ;;  %v8916_v0 = vld [vmem:[#allocation8 + $0x170] ss:$8 sps:$4 sm:$0xff]  }
 0x494   : > { %5702 = vmatprep.subr.bf16.mxu1 %v8867_v6  ;;  %v8921_v6 = vld [vmem:[#allocation8 + $0x184] ss:$8 sps:$4 sm:$0xff]  }
 0x497   : > { %5703 = vmatpush1.bf16.msra.mxu1 %v8865_v58  ;;  %v8919_v58 = vld [vmem:[#allocation8 + $0x180] ss:$8 sps:$4 sm:$0xff]  }
 0x498   : > { %5704 = vmatprep.subr.bf16.mxu1 %v8870_v32  ;;  %v8924_v32 = vld [vmem:[#allocation8 + $0x194] ss:$8 sps:$4 sm:$0xff]  }
 0x49b   : > { %5705 = vmatpush1.bf16.msra.mxu1 %v8868_v59  ;;  %v8922_v59 = vld [vmem:[#allocation8 + $0x190] ss:$8 sps:$4 sm:$0xff]  }
 0x49c   : > { %5706 = vmatprep.subr.bf16.mxu1 %v8873_v42  ;;  %v8927_v42 = vld [vmem:[#allocation8 + $0x1a4] ss:$8 sps:$4 sm:$0xff]  }
 0x49f   : > { %5707 = vmatpush1.bf16.msra.mxu1 %v8871_v20  ;;  %v8925_v20 = vld [vmem:[#allocation8 + $0x1a0] ss:$8 sps:$4 sm:$0xff]  }
 0x4a0   : > { %5708 = vmatprep.subr.bf16.mxu1 %v8876_v56  ;;  %v8930_v56 = vld [vmem:[#allocation8 + $0x1b4] ss:$8 sps:$4 sm:$0xff]  }
 0x4a3   : > { %5709 = vmatpush1.bf16.msra.mxu1 %v8874_v39  ;;  %v8928_v39 = vld [vmem:[#allocation8 + $0x1b0] ss:$8 sps:$4 sm:$0xff]  }
 0x4a4   : > { %5710 = vmatprep.subr.bf16.mxu1 %v8879_v46  ;;  %v8933_v46 = vld [vmem:[#allocation8 + $0x1c4] ss:$8 sps:$4 sm:$0xff]  }
 0x4a7   : > { %5711 = vmatpush1.bf16.msra.mxu1 %v8877_v43  ;;  %v8931_v43 = vld [vmem:[#allocation8 + $0x1c0] ss:$8 sps:$4 sm:$0xff]  }
 0x4a8   : > { %5712 = vmatprep.subr.bf16.mxu1 %v8882_v19  ;;  %v8936_v19 = vld [vmem:[#allocation8 + $0x1d4] ss:$8 sps:$4 sm:$0xff]  }
 0x4ab   : > { %5713 = vmatpush1.bf16.msra.mxu1 %v8880_v40  ;;  %v8934_v40 = vld [vmem:[#allocation8 + $0x1d0] ss:$8 sps:$4 sm:$0xff]  }
 0x4ac   : > { %5714 = vmatprep.subr.bf16.mxu1 %v8885_v3  ;;  %v8939_v3 = vld [vmem:[#allocation8 + $0x1e4] ss:$8 sps:$4 sm:$0xff]  }
 0x4af   : > { %5715 = vmatpush1.bf16.msra.mxu1 %v8883_v4  ;;  %v8937_v4 = vld [vmem:[#allocation8 + $0x1e0] ss:$8 sps:$4 sm:$0xff]  }
 0x4b0   : > { %5716 = vmatprep.subr.bf16.mxu1 %v8888_v34  ;;  %v8942_v34 = vld [vmem:[#allocation8 + $0x1f4] ss:$8 sps:$4 sm:$0xff]  }
 0x4b3   : > { %5717 = vmatpush1.bf16.msra.mxu1 %v8886_v38  ;;  %v8940_v38 = vld [vmem:[#allocation8 + $0x1f0] ss:$8 sps:$4 sm:$0xff]  }
 0x4b4   : > { %5759 = vmatprep.subr.bf16.mxu1 %v8892_v27  ;;  %v8946_v27 = vld [vmem:[#allocation8 + $0x204] ss:$8 sps:$4 sm:$0xff]  }
 0x4b6   : > { %5719 = vmatmul.mubr.bf16.vlgmr.msra.gmra.mrb[0].mxu1 %v7666_v29  ;;  %v8910_v29 = vld [vmem:[#allocation8 + $0x154] ss:$8 sps:$4 sm:$0xff]  }
 0x4b7   : > { %5728 = vmatprep.mubr.bf16.mxu1 %v10259_v57  ;;  %5760 = vmatpush1.bf16.msra.mxu1 %v8890_v21  ;;  %v8944_v21 = vld [vmem:[#allocation8 + $0x200] ss:$8 sps:$4 sm:$0xff]  }
 0x4b8   : > { %5761 = vmatprep.subr.bf16.mxu1 %v8895_v41  ;;  %v8949_v41 = vld [vmem:[#allocation8 + $0x214] ss:$8 sps:$4 sm:$0xff]  }
 0x4bb   : > { %5762 = vmatpush1.bf16.msra.mxu1 %v8893_v44  ;;  %v10815_v44 = vcombine.low %v10158_v12, %v10160_v26  ;;  %v10818_v12 = vcombine.high %v10205_v25, %v10270_v9  ;;  %v8953_v26 = vld [vmem:[#allocation8 + $0x230] ss:$8 sps:$4 sm:$0xff]  }
 0x4bc   : > { %5763 = vmatprep.subr.bf16.mxu1 %v8898_v10  ;;  %v10816_v10 = vcombine.high %v10189_v8, %v10194_v31 }
 0x4be   : > { %5729 = vmatmul.mubr.bf16.gmra.mrb[4].mxu1 %v10263_v49 }
 0x4bf   : > { %5738 = vmatprep.mubr.bf16.mxu1 %v10274_v50  ;;  %5764 = vmatpush1.bf16.msra.mxu1 %v8896_v53  ;;  %v8947_v53 = vld [vmem:[#allocation8 + $0x210] ss:$8 sps:$4 sm:$0xff]  }
 0x4c0   : > { %5765 = vmatprep.subr.bf16.mxu1 %v8902_v2  ;;  %v8952_v2 = vld [vmem:[#allocation8 + $0x224] ss:$8 sps:$4 sm:$0xff]  }
 0x4c3   : > { %5766 = vmatpush1.bf16.msra.mxu1 %v8900_v14  ;;  %v8950_v14 = vld [vmem:[#allocation8 + $0x220] ss:$8 sps:$4 sm:$0xff]  }
 0x4c4   : > { %5767 = vmatprep.subr.bf16.mxu1 %v8906_v18  ;;  %v8955_v18 = vld [vmem:[#allocation8 + $0x234] ss:$8 sps:$4 sm:$0xff]  }
 0x4c6   : > { %5739 = vmatmul.mubr.bf16.gmra.mrb[8].mxu1 %v10278_v37 }
 0x4c7   : > { %5748 = vmatprep.mubr.bf16.mxu1 %v10300_v63  ;;  %5768 = vmatpush1.bf16.msra.mxu1 %v8904_v17  ;;  %v10817_v17 = vcombine.low %v10189_v8, %v10194_v31  ;;  %v10820_v8 = vcombine.high %v10285_v23, %v10296_v11  ;;  %v8960_v31 = vld [vmem:[#allocation8 + $0x250] ss:$8 sps:$4 sm:$0xff]  }
 0x4c8   : > { %5769 = vmatprep.subr.bf16.mxu1 %v8910_v29  ;;  %v8958_v29 = vld [vmem:[#allocation8 + $0x244] ss:$8 sps:$4 sm:$0xff]  }
 0x4cb   : > { %5770 = vmatpush1.bf16.msra.mxu1 %v8908_v15  ;;  %v8956_v15 = vld [vmem:[#allocation8 + $0x240] ss:$8 sps:$4 sm:$0xff]  }
 0x4cc   : > { %5771 = vmatprep.subr.bf16.mxu1 %v8914_v62  ;;  %v8962_v62 = vld [vmem:[#allocation8 + $0x254] ss:$8 sps:$4 sm:$0xff]  }
 0x4ce   : > { %5749 = vmatmul.mubr.bf16.gmra.mrb[12].mxu1 %v10307_v48 }
 0x4cf   : > { %5772 = vmatpush1.bf16.msra.mxu1 %v8912_v30  ;;  %5791 = vmatprep.mubr.bf16.mxu1 %v10814_v55  ;;  %v10819_v30 = vcombine.low %v10205_v25, %v10270_v9  ;;  %v8964_v55 = vld [vmem:[#allocation8 + $0x260] ss:$8 sps:$4 sm:$0xff]   ;;  %v8967_v25 = vld [vmem:[#allocation8 + $0x270] ss:$8 sps:$4 sm:$0xff]   ;;  %v8972_v9 = vld [vmem:[#allocation8 + $0x284] ss:$8 sps:$4 sm:$0xff]  }
 0x4d0   : > { %5773 = vmatprep.subr.bf16.mxu1 %v8918_v24  ;;  %v8966_v24 = vld [vmem:[#allocation8 + $0x264] ss:$8 sps:$4 sm:$0xff]  }
 0x4d3   : > { %5774 = vmatpush1.bf16.msra.mxu1 %v8916_v0  ;;  %v8969_v0 = vld [vmem:[#allocation8 + $0x274] ss:$8 sps:$4 sm:$0xff]  }
 0x4d4   : > { %5775 = vmatprep.subr.bf16.mxu1 %v8921_v6  ;;  %v10821_v6 = vcombine.low %v10285_v23, %v10296_v11  ;;  %v8979_v23 = vld [vmem:[#allocation8 + $0x2b0] ss:$8 sps:$4 sm:$0xff]  }
 0x4d7   : > { %5776 = vmatpush1.bf16.msra.mxu1 %v8919_v58  ;;  %v8970_v58 = vld [vmem:[#allocation8 + $0x280] ss:$8 sps:$4 sm:$0xff]  }
 0x4d8   : > { %5777 = vmatprep.subr.bf16.mxu1 %v8924_v32  ;;  %v8975_v32 = vld [vmem:[#allocation8 + $0x294] ss:$8 sps:$4 sm:$0xff]  }
 0x4db   : > { %5778 = vmatpush1.bf16.msra.mxu1 %v8922_v59  ;;  %v8973_v59 = vld [vmem:[#allocation8 + $0x290] ss:$8 sps:$4 sm:$0xff]  }
 0x4dc   : > { %5779 = vmatprep.subr.bf16.mxu1 %v8927_v42  ;;  %v8978_v42 = vld [vmem:[#allocation8 + $0x2a4] ss:$8 sps:$4 sm:$0xff]  }
 0x4df   : > { %5780 = vmatpush1.bf16.msra.mxu1 %v8925_v20  ;;  %v8976_v20 = vld [vmem:[#allocation8 + $0x2a0] ss:$8 sps:$4 sm:$0xff]  }
 0x4e0   : > { %5781 = vmatprep.subr.bf16.mxu1 %v8930_v56  ;;  %v8981_v56 = vld [vmem:[#allocation8 + $0x2b4] ss:$8 sps:$4 sm:$0xff]  }
 0x4e3   : > { %5782 = vmatpush1.bf16.msra.mxu1 %v8928_v39  ;;  %v8984_v39 = vld [vmem:[#allocation8 + $0x2c4] ss:$8 sps:$4 sm:$0xff]  }
 0x4e4   : > { %5783 = vmatprep.subr.bf16.mxu1 %v8933_v46  ;;  %v8987_v46 = vld [vmem:[#allocation8 + $0x2d4] ss:$8 sps:$4 sm:$0xff]  }
 0x4e7   : > { %5784 = vmatpush1.bf16.msra.mxu1 %v8931_v43  ;;  %v8985_v43 = vld [vmem:[#allocation8 + $0x2d0] ss:$8 sps:$4 sm:$0xff]  }
 0x4e8   : > { %5785 = vmatprep.subr.bf16.mxu1 %v8936_v19  ;;  %v8990_v19 = vld [vmem:[#allocation8 + $0x2e4] ss:$8 sps:$4 sm:$0xff]  }
 0x4eb   : > { %5786 = vmatpush1.bf16.msra.mxu1 %v8934_v40  ;;  %v8988_v40 = vld [vmem:[#allocation8 + $0x2e0] ss:$8 sps:$4 sm:$0xff]  }
 0x4ec   : > { %5787 = vmatprep.subr.bf16.mxu1 %v8939_v3  ;;  %v8993_v3 = vld [vmem:[#allocation8 + $0x2f4] ss:$8 sps:$4 sm:$0xff]  }
 0x4ef   : > { %5788 = vmatpush1.bf16.msra.mxu1 %v8937_v4  ;;  %v8991_v4 = vld [vmem:[#allocation8 + $0x2f0] ss:$8 sps:$4 sm:$0xff]  }
 0x4f0   : > { %5789 = vmatprep.subr.bf16.mxu1 %v8942_v34  ;;  %v8996_v34 = vld [vmem:[#allocation8 + $0x604] ss:$8 sps:$4 sm:$0xff]  }
 0x4f3   : > { %5790 = vmatpush1.bf16.msra.mxu1 %v8940_v38  ;;  %v8994_v38 = vld [vmem:[#allocation8 + $0x600] ss:$8 sps:$4 sm:$0xff]  }
 0x4f4   : > { %5832 = vmatprep.subr.bf16.mxu1 %v8946_v27  ;;  %v8999_v27 = vld [vmem:[#allocation8 + $0x614] ss:$8 sps:$4 sm:$0xff]  }
 0x4f6   : > { %5792 = vmatmul.mubr.bf16.vlgmr.msra.gmra.mrb[0].mxu1 %v10815_v44  ;;  %v9000_v44 = vld [vmem:[#allocation8 + $0x620] ss:$8 sps:$4 sm:$0xff]  }
 0x4f7   : > { %5801 = vmatprep.mubr.bf16.mxu1 %v10816_v10  ;;  %5833 = vmatpush1.bf16.msra.mxu1 %v8944_v21  ;;  %v8997_v21 = vld [vmem:[#allocation8 + $0x610] ss:$8 sps:$4 sm:$0xff]   ;;  %v9005_v10 = vld [vmem:[#allocation8 + $0x634] ss:$8 sps:$4 sm:$0xff]  }
 0x4f8   : > { %5834 = vmatprep.subr.bf16.mxu1 %v8949_v41  ;;  %v9002_v41 = vld [vmem:[#allocation8 + $0x624] ss:$8 sps:$4 sm:$0xff]  }
 0x4fb   : > { %5835 = vmatpush1.bf16.msra.mxu1 %v8947_v53  ;;  %v9003_v53 = vld [vmem:[#allocation8 + $0x630] ss:$8 sps:$4 sm:$0xff]  }
 0x4fc   : > { %5836 = vmatprep.subr.bf16.mxu1 %v8952_v2  ;;  %v9008_v2 = vld [vmem:[#allocation8 + $0x644] ss:$8 sps:$4 sm:$0xff]  }
 0x4fe   : > { %5802 = vmatmul.mubr.bf16.gmra.mrb[4].mxu1 %v10817_v17  ;;  %v9017_v17 = vld [vmem:[#allocation8 + $0x674] ss:$8 sps:$4 sm:$0xff]  }
 0x4ff   : > { %5811 = vmatprep.mubr.bf16.mxu1 %v10818_v12  ;;  %5837 = vmatpush1.bf16.msra.mxu1 %v8950_v14  ;;  %v10822_v14 = vcombine.high %v10296_v11, %v10383_v7  ;;  %v10823_v12 = vcombine.low %v10296_v11, %v10383_v7  ;;  %v9029_v11 = vld [vmem:[#allocation8 + $0x6b4] ss:$8 sps:$4 sm:$0xff]   ;;  %v9027_v7 = vld [vmem:[#allocation8 + $0x6b0] ss:$8 sps:$4 sm:$0xff]  }
 0x500   : > { %5838 = vmatprep.subr.bf16.mxu1 %v8955_v18  ;;  %v9009_v18 = vld [vmem:[#allocation8 + $0x650] ss:$8 sps:$4 sm:$0xff]  }
 0x503   : > { %5839 = vmatpush1.bf16.msra.mxu1 %v8953_v26  ;;  %v9015_v26 = vld [vmem:[#allocation8 + $0x670] ss:$8 sps:$4 sm:$0xff]  }
 0x504   : > { %5840 = vmatprep.subr.bf16.mxu1 %v8958_v29  ;;  %v9020_v29 = vld [vmem:[#allocation8 + $0x684] ss:$8 sps:$4 sm:$0xff]  }
 0x506   : > { %5812 = vmatmul.mubr.bf16.gmra.mrb[8].mxu1 %v10819_v30  ;;  %v9021_v30 = vld [vmem:[#allocation8 + $0x690] ss:$8 sps:$4 sm:$0xff]  }
 0x507   : > { %5821 = vmatprep.mubr.bf16.mxu1 %v10820_v8  ;;  %5841 = vmatpush1.bf16.msra.mxu1 %v8956_v15  ;;  %v9018_v15 = vld [vmem:[#allocation8 + $0x680] ss:$8 sps:$4 sm:$0xff]   ;;  %v9026_v8 = vld [vmem:[#allocation8 + $0x6a4] ss:$8 sps:$4 sm:$0xff]  }
 0x508   : > { %5842 = vmatprep.subr.bf16.mxu1 %v8962_v62  ;;  %v9023_v62 = vld [vmem:[#allocation8 + $0x694] ss:$8 sps:$4 sm:$0xff]  }
 0x50b   : > { %5843 = vmatpush1.bf16.msra.mxu1 %v8960_v31  ;;  %v9024_v31 = vld [vmem:[#allocation8 + $0x6a0] ss:$8 sps:$4 sm:$0xff]  }
 0x50c   : > { %5844 = vmatprep.subr.bf16.mxu1 %v8966_v24  ;;  %v9032_v24 = vld [vmem:[#allocation8 + $0x6c4] ss:$8 sps:$4 sm:$0xff]  }
 0x50e   : > { %5822 = vmatmul.mubr.bf16.gmra.mrb[12].mxu1 %v10821_v6  ;;  %v9033_v6 = vld [vmem:[#allocation8 + $0x6d0] ss:$8 sps:$4 sm:$0xff]  }
 0x50f   : > { %5845 = vmatpush1.bf16.msra.mxu1 %v8964_v55  ;;  %5864 = vmatprep.mubr.bf16.mxu1 %v10259_v57  ;;  %v8982_v57 = vld [vmem:[#allocation8 + $0x2c0] ss:$8 sps:$4 sm:$0xff]  }
 0x510   : > { %5846 = vmatprep.subr.bf16.mxu1 %v8969_v0  ;;  %v9030_v55 = vld [vmem:[#allocation8 + $0x6c0] ss:$8 sps:$4 sm:$0xff]   ;;  %v9035_v0 = vld [vmem:[#allocation8 + $0x6d4] ss:$8 sps:$4 sm:$0xff]  }
 0x513   : > { %5847 = vmatpush1.bf16.msra.mxu1 %v8967_v25  ;;  %v9038_v25 = vld [vmem:[#allocation8 + $0x6e4] ss:$8 sps:$4 sm:$0xff]  }
 0x514   : > { %5848 = vmatprep.subr.bf16.mxu1 %v8972_v9  ;;  %v9036_v9 = vld [vmem:[#allocation8 + $0x6e0] ss:$8 sps:$4 sm:$0xff]  }
 0x517   : > { %5849 = vmatpush1.bf16.msra.mxu1 %v8970_v58  ;;  %v9041_v58 = vld [vmem:[#allocation8 + $0x6f4] ss:$8 sps:$4 sm:$0xff]  }
 0x518   : > { %5850 = vmatprep.subr.bf16.mxu1 %v8975_v32  ;;  %v9039_v32 = vld [vmem:[#allocation8 + $0x6f0] ss:$8 sps:$4 sm:$0xff]  }
 0x51b   : > { %5851 = vmatpush1.bf16.msra.mxu1 %v8973_v59  ;;  %v9044_v59 = vld [vmem:[#allocation8 + $0x704] ss:$8 sps:$4 sm:$0xff]  }
 0x51c   : > { %5852 = vmatprep.subr.bf16.mxu1 %v8978_v42  ;;  %v9042_v42 = vld [vmem:[#allocation8 + $0x700] ss:$8 sps:$4 sm:$0xff]  }
 0x51f   : > { %5853 = vmatpush1.bf16.msra.mxu1 %v8976_v20  ;;  %v9047_v20 = vld [vmem:[#allocation8 + $0x714] ss:$8 sps:$4 sm:$0xff]  }
 0x520   : > { %5854 = vmatprep.subr.bf16.mxu1 %v8981_v56  ;;  %v10825_v56 = vcombine.low %v10338_v5, %v10352_v33 }
 0x523   : > { %5855 = vmatpush1.bf16.msra.mxu1 %v8979_v23  ;;  %v9045_v23 = vld [vmem:[#allocation8 + $0x710] ss:$8 sps:$4 sm:$0xff]  }
 0x524   : > { %5856 = vmatprep.subr.bf16.mxu1 %v8984_v39  ;;  %v9050_v39 = vld [vmem:[#allocation8 + $0x724] ss:$8 sps:$4 sm:$0xff]  }
 0x527   : > { %5857 = vmatpush1.bf16.msra.mxu1 %v8982_v57  ;;  %v9048_v57 = vld [vmem:[#allocation8 + $0x720] ss:$8 sps:$4 sm:$0xff]  }
 0x528   : > { %5858 = vmatprep.subr.bf16.mxu1 %v8987_v46  ;;  %v9053_v46 = vld [vmem:[#allocation8 + $0x734] ss:$8 sps:$4 sm:$0xff]  }
 0x52b   : > { %5859 = vmatpush1.bf16.msra.mxu1 %v8985_v43  ;;  %v9051_v43 = vld [vmem:[#allocation8 + $0x730] ss:$8 sps:$4 sm:$0xff]  }
 0x52c   : > { %5860 = vmatprep.subr.bf16.mxu1 %v8990_v19  ;;  %v9056_v19 = vld [vmem:[#allocation8 + $0x744] ss:$8 sps:$4 sm:$0xff]  }
 0x52f   : > { %5861 = vmatpush1.bf16.msra.mxu1 %v8988_v40  ;;  %v9059_v40 = vld [vmem:[#allocation8 + $0x754] ss:$8 sps:$4 sm:$0xff]  }
 0x530   : > { %5862 = vmatprep.subr.bf16.mxu1 %v8993_v3  ;;  %v9057_v3 = vld [vmem:[#allocation8 + $0x750] ss:$8 sps:$4 sm:$0xff]  }
 0x533   : > { %5863 = vmatpush1.bf16.msra.mxu1 %v8991_v4  ;;  %v9062_v4 = vld [vmem:[#allocation8 + $0x764] ss:$8 sps:$4 sm:$0xff]  }
 0x534   : > { %6628 = vmatprep.subr.bf16.mxu1 %v8996_v34  ;;  %v9060_v34 = vld [vmem:[#allocation8 + $0x760] ss:$8 sps:$4 sm:$0xff]  }
 0x536   : > { %5865 = vmatmul.mubr.bf16.vlgmr.msra.gmra.mrb[0].mxu1 %v10263_v49  ;;  %v9006_v49 = vld [vmem:[#allocation8 + $0x640] ss:$8 sps:$4 sm:$0xff]  }
 0x537   : > { %5874 = vmatprep.mubr.bf16.mxu1 %v10274_v50  ;;  %6629 = vmatpush1.bf16.msra.mxu1 %v8994_v38  ;;  %v9011_v50 = vld [vmem:[#allocation8 + $0x654] ss:$8 sps:$4 sm:$0xff]  }
 0x538   : > { %6630 = vmatprep.subr.bf16.mxu1 %v8999_v27  ;;  %v9065_v38 = vld [vmem:[#allocation8 + $0x774] ss:$8 sps:$4 sm:$0xff]   ;;  %v10826_v27 = vcombine.high %v10352_v33, %v10362_v22 }
 0x53b   : > { %6631 = vmatpush1.bf16.msra.mxu1 %v8997_v21  ;;  %v9063_v21 = vld [vmem:[#allocation8 + $0x770] ss:$8 sps:$4 sm:$0xff]  }
 0x53c   : > { %6632 = vmatprep.subr.bf16.mxu1 %v9002_v41  ;;  %v9068_v41 = vld [vmem:[#allocation8 + $0x784] ss:$8 sps:$4 sm:$0xff]  }
 0x53e   : > { %5875 = vmatmul.mubr.bf16.gmra.mrb[4].mxu1 %v10278_v37  ;;  %v9014_v37 = vld [vmem:[#allocation8 + $0x664] ss:$8 sps:$4 sm:$0xff]  }
 0x53f   : > { %5884 = vmatprep.mubr.bf16.mxu1 %v10300_v63  ;;  %6633 = vmatpush1.bf16.msra.mxu1 %v9000_v44  ;;  %v9012_v63 = vld [vmem:[#allocation8 + $0x660] ss:$8 sps:$4 sm:$0xff]  }
 0x540   : > { %6634 = vmatprep.subr.bf16.mxu1 %v9005_v10  ;;  %v9066_v44 = vld [vmem:[#allocation8 + $0x780] ss:$8 sps:$4 sm:$0xff]   ;;  %v9071_v10 = vld [vmem:[#allocation8 + $0x794] ss:$8 sps:$4 sm:$0xff]  }
 0x543   : > { %6635 = vmatpush1.bf16.msra.mxu1 %v9003_v53  ;;  %v9069_v53 = vld [vmem:[#allocation8 + $0x790] ss:$8 sps:$4 sm:$0xff]  }
 0x544   : > { %6636 = vmatprep.subr.bf16.mxu1 %v9008_v2  ;;  %v9074_v2 = vld [vmem:[#allocation8 + $0x7a4] ss:$8 sps:$4 sm:$0xff]  }
 0x546   : > { %5885 = vmatmul.mubr.bf16.gmra.mrb[8].mxu1 %v10307_v48  ;;  %v10824_v48 = vcombine.high %v10338_v5, %v10352_v33  ;;  %v9054_v5 = vld [vmem:[#allocation8 + $0x740] ss:$8 sps:$4 sm:$0xff]  }
 0x547   : > { %5894 = vmatprep.mubr.bf16.mxu1 %v10822_v14  ;;  %6637 = vmatpush1.bf16.msra.mxu1 %v9006_v49  ;;  %v9072_v49 = vld [vmem:[#allocation8 + $0x7a0] ss:$8 sps:$4 sm:$0xff]   ;;  %v9075_v14 = vld [vmem:[#allocation8 + $0x7b0] ss:$8 sps:$4 sm:$0xff]  }
 0x548   : > { %6638 = vmatprep.subr.bf16.mxu1 %v9011_v50  ;;  %v9077_v50 = vld [vmem:[#allocation8 + $0x7b4] ss:$8 sps:$4 sm:$0xff]  }
 0x54b   : > { %6639 = vmatpush1.bf16.msra.mxu1 %v9009_v18  ;;  %v9080_v18 = vld [vmem:[#allocation8 + $0x7c4] ss:$8 sps:$4 sm:$0xff]  }
 0x54c   : > { %6640 = vmatprep.subr.bf16.mxu1 %v9014_v37  ;;  %v9078_v37 = vld [vmem:[#allocation8 + $0x7c0] ss:$8 sps:$4 sm:$0xff]  }
 0x54e   : > { %5895 = vmatmul.mubr.bf16.gmra.mrb[12].mxu1 %v10823_v12  ;;  %v9086_v12 = vld [vmem:[#allocation8 + $0x7e4] ss:$8 sps:$4 sm:$0xff]  }
 0x54f   : > { %6641 = vmatpush1.bf16.msra.mxu1 %v9012_v63  ;;  %6660 = vmatprep.mubr.bf16.mxu1 %v10824_v48  ;;  %v9083_v63 = vld [vmem:[#allocation8 + $0x7d4] ss:$8 sps:$4 sm:$0xff]   ;;  %v9084_v48 = vld [vmem:[#allocation8 + $0x7e0] ss:$8 sps:$4 sm:$0xff]  }
 0x550   : > { %6642 = vmatprep.subr.bf16.mxu1 %v9017_v17  ;;  %v9081_v17 = vld [vmem:[#allocation8 + $0x7d0] ss:$8 sps:$4 sm:$0xff]  }
 0x553   : > { %6643 = vmatpush1.bf16.msra.mxu1 %v9015_v26  ;;  %v9089_v26 = vld [vmem:[#allocation8 + $0x7f4] ss:$8 sps:$4 sm:$0xff]  }
 0x554   : > { %6644 = vmatprep.subr.bf16.mxu1 %v9020_v29  ;;  %v9087_v29 = vld [vmem:[#allocation8 + $0x7f0] ss:$8 sps:$4 sm:$0xff]  }
 0x557   : > { %6645 = vmatpush1.bf16.msra.mxu1 %v9018_v15  ;;  %v9092_v15 = vld [vmem:[#allocation8 + $0x804] ss:$8 sps:$4 sm:$0xff]  }
 0x558   : > { %6646 = vmatprep.subr.bf16.mxu1 %v9023_v62  ;;  %v9090_v62 = vld [vmem:[#allocation8 + $0x800] ss:$8 sps:$4 sm:$0xff]  }
 0x55b   : > { %6647 = vmatpush1.bf16.msra.mxu1 %v9021_v30  ;;  %v9095_v30 = vld [vmem:[#allocation8 + $0x814] ss:$8 sps:$4 sm:$0xff]  }
 0x55c   : > { %6648 = vmatprep.subr.bf16.mxu1 %v9026_v8  ;;  %v10827_v8 = vcombine.low %v10352_v33, %v10362_v22  ;;  %v10830_v33 = vcombine.high %v10387_v16, %v10409_v51  ;;  %v9099_v22 = vld [vmem:[#allocation8 + $0x830] ss:$8 sps:$4 sm:$0xff]  }
 0x55f   : > { %6649 = vmatpush1.bf16.msra.mxu1 %v9024_v31  ;;  %v10828_v31 = vcombine.high %v10366_v45, %v10379_v35 }
 0x560   : > { %6650 = vmatprep.subr.bf16.mxu1 %v9029_v11  ;;  %v9093_v11 = vld [vmem:[#allocation8 + $0x810] ss:$8 sps:$4 sm:$0xff]  }
 0x563   : > { %6651 = vmatpush1.bf16.msra.mxu1 %v9027_v7  ;;  %v9098_v7 = vld [vmem:[#allocation8 + $0x824] ss:$8 sps:$4 sm:$0xff]  }
 0x564   : > { %6652 = vmatprep.subr.bf16.mxu1 %v9032_v24  ;;  %v9096_v24 = vld [vmem:[#allocation8 + $0x820] ss:$8 sps:$4 sm:$0xff]  }
 0x567   : > { %6653 = vmatpush1.bf16.msra.mxu1 %v9030_v55  ;;  %v9101_v55 = vld [vmem:[#allocation8 + $0x834] ss:$8 sps:$4 sm:$0xff]  }
 0x568   : > { %6654 = vmatprep.subr.bf16.mxu1 %v9035_v0  ;;  %v10829_v0 = vcombine.low %v10366_v45, %v10379_v35  ;;  %v10832_v45 = vcombine.high %v10424_v61, %v10438_v1  ;;  %v9105_v35 = vld [vmem:[#allocation8 + $0x850] ss:$8 sps:$4 sm:$0xff]  }
 0x56b   : > { %6655 = vmatpush1.bf16.msra.mxu1 %v9033_v6  ;;  %v9104_v6 = vld [vmem:[#allocation8 + $0x844] ss:$8 sps:$4 sm:$0xff]  }
 0x56c   : > { %6656 = vmatprep.subr.bf16.mxu1 %v9038_v25  ;;  %v9102_v25 = vld [vmem:[#allocation8 + $0x840] ss:$8 sps:$4 sm:$0xff]  }
 0x56f   : > { %6657 = vmatpush1.bf16.msra.mxu1 %v9036_v9  ;;  %v9107_v9 = vld [vmem:[#allocation8 + $0x854] ss:$8 sps:$4 sm:$0xff]  }
 0x570   : > { %6658 = vmatprep.subr.bf16.mxu1 %v9041_v58  ;;  %v10831_v58 = vcombine.low %v10387_v16, %v10409_v51  ;;  %v9111_v16 = vld [vmem:[#allocation8 + $0x870] ss:$8 sps:$4 sm:$0xff]   ;;  %v9116_v51 = vld [vmem:[#allocation8 + $0x884] ss:$8 sps:$4 sm:$0xff]  }
 0x573   : > { %6659 = vmatpush1.bf16.msra.mxu1 %v9039_v32  ;;  %v9110_v32 = vld [vmem:[#allocation8 + $0x864] ss:$8 sps:$4 sm:$0xff]  }
 0x574   : > { %6701 = vmatprep.subr.bf16.mxu1 %v9044_v59  ;;  %v9108_v59 = vld [vmem:[#allocation8 + $0x860] ss:$8 sps:$4 sm:$0xff]  }
 0x576   : > { %6661 = vmatmul.mubr.bf16.vlgmr.msra.gmra.mrb[0].mxu1 %v10825_v56  ;;  %v9114_v56 = vld [vmem:[#allocation8 + $0x880] ss:$8 sps:$4 sm:$0xff]  }
 0x577   : > { %6670 = vmatprep.mubr.bf16.mxu1 %v10371_v13  ;;  %6702 = vmatpush1.bf16.msra.mxu1 %v9042_v42  ;;  %v9113_v42 = vld [vmem:[#allocation8 + $0x874] ss:$8 sps:$4 sm:$0xff]  }
 0x578   : > { %6703 = vmatprep.subr.bf16.mxu1 %v9047_v20  ;;  %v10833_v20 = vcombine.low %v10424_v61, %v10438_v1  ;;  %v9123_v61 = vld [vmem:[#allocation8 + $0x8b0] ss:$8 sps:$4 sm:$0xff]  }
 0x57b   : > { %6704 = vmatpush1.bf16.msra.mxu1 %v9045_v23  ;;  %v9119_v23 = vld [vmem:[#allocation8 + $0x894] ss:$8 sps:$4 sm:$0xff]  }
 0x57c   : > { %6705 = vmatprep.subr.bf16.mxu1 %v9050_v39  ;;  %v9117_v39 = vld [vmem:[#allocation8 + $0x890] ss:$8 sps:$4 sm:$0xff]  }
 0x57e   : > { %6671 = vmatmul.mubr.bf16.gmra.mrb[4].mxu1 %v10375_v36 }
 0x57f   : > { %6680 = vmatprep.mubr.bf16.mxu1 %v10401_v28  ;;  %6706 = vmatpush1.bf16.msra.mxu1 %v9048_v57  ;;  %v9122_v57 = vld [vmem:[#allocation8 + $0x8a4] ss:$8 sps:$4 sm:$0xff]  }
 0x580   : > { %6707 = vmatprep.subr.bf16.mxu1 %v9053_v46  ;;  %v9120_v46 = vld [vmem:[#allocation8 + $0x8a0] ss:$8 sps:$4 sm:$0xff]  }
 0x583   : > { %6708 = vmatpush1.bf16.msra.mxu1 %v9051_v43  ;;  %v9125_v43 = vld [vmem:[#allocation8 + $0x8b4] ss:$8 sps:$4 sm:$0xff]  }
 0x584   : > { %6709 = vmatprep.subr.bf16.mxu1 %v9056_v19  ;;  %v9128_v19 = vld [vmem:[#allocation8 + $0x8c4] ss:$8 sps:$4 sm:$0xff]  }
 0x586   : > { %6681 = vmatmul.mubr.bf16.gmra.mrb[8].mxu1 %v10405_v47 }
 0x587   : > { %6690 = vmatprep.mubr.bf16.mxu1 %v10429_v54  ;;  %6710 = vmatpush1.bf16.msra.mxu1 %v9054_v5  ;;  %v9131_v5 = vld [vmem:[#allocation8 + $0x8d4] ss:$8 sps:$4 sm:$0xff]  }
 0x588   : > { %6711 = vmatprep.subr.bf16.mxu1 %v9059_v40  ;;  %v9129_v40 = vld [vmem:[#allocation8 + $0x8d0] ss:$8 sps:$4 sm:$0xff]  }
 0x58b   : > { %6712 = vmatpush1.bf16.msra.mxu1 %v9057_v3  ;;  %v9134_v3 = vld [vmem:[#allocation8 + $0x8e4] ss:$8 sps:$4 sm:$0xff]  }
 0x58c   : > { %6713 = vmatprep.subr.bf16.mxu1 %v9062_v4  ;;  %v9132_v4 = vld [vmem:[#allocation8 + $0x8e0] ss:$8 sps:$4 sm:$0xff]  }
 0x58e   : > { %6691 = vmatmul.mubr.bf16.gmra.mrb[12].mxu1 %v10433_v52 }
 0x58f   : > { %6714 = vmatpush1.bf16.msra.mxu1 %v9060_v34  ;;  %6733 = vmatprep.mubr.bf16.mxu1 %v10826_v27  ;;  %v9137_v34 = vld [vmem:[#allocation8 + $0x8f4] ss:$8 sps:$4 sm:$0xff]   ;;  %v10834_v27 = vcombine.high %v10438_v1, %v10446_v60 }
 0x590   : > { %6715 = vmatprep.subr.bf16.mxu1 %v9065_v38  ;;  %v9135_v38 = vld [vmem:[#allocation8 + $0x8f0] ss:$8 sps:$4 sm:$0xff]  }
 0x593   : > { %6716 = vmatpush1.bf16.msra.mxu1 %v9063_v21  ;;  %v10835_v21 = vcombine.low %v10438_v1, %v10446_v60 }
 0x594   : > { %6717 = vmatprep.subr.bf16.mxu1 %v9068_v41 }
 0x597   : > { %6718 = vmatpush1.bf16.msra.mxu1 %v9066_v44 }
 0x598   : > { %6719 = vmatprep.subr.bf16.mxu1 %v9071_v10 }
 0x59b   : > { %6720 = vmatpush1.bf16.msra.mxu1 %v9069_v53 }
 0x59c   : > { %6721 = vmatprep.subr.bf16.mxu1 %v9074_v2 }
 0x59f   : > { %6722 = vmatpush1.bf16.msra.mxu1 %v9072_v49 }
 0x5a0   : > { %6723 = vmatprep.subr.bf16.mxu1 %v9077_v50 }
 0x5a3   : > { %6724 = vmatpush1.bf16.msra.mxu1 %v9075_v14 }
 0x5a4   : > { %6725 = vmatprep.subr.bf16.mxu1 %v9080_v18 }
 0x5a7   : > { %6726 = vmatpush1.bf16.msra.mxu1 %v9078_v37 }
 0x5a8   : > { %6727 = vmatprep.subr.bf16.mxu1 %v9083_v63 }
 0x5ab   : > { %6728 = vmatpush1.bf16.msra.mxu1 %v9081_v17 }
 0x5ac   : > { %6729 = vmatprep.subr.bf16.mxu1 %v9086_v12 }
 0x5af   : > { %6730 = vmatpush1.bf16.msra.mxu1 %v9084_v48 }
 0x5b0   : > { %6731 = vmatprep.subr.bf16.mxu1 %v9089_v26 }
 0x5b3   : > { %6732 = vmatpush1.bf16.msra.mxu1 %v9087_v29 }
 0x5b4   : > { %6774 = vmatprep.subr.bf16.mxu1 %v9092_v15 }
 0x5b6   : > { %6734 = vmatmul.mubr.bf16.vlgmr.msra.gmra.mrb[0].mxu1 %v10827_v8 }
 0x5b7   : > { %6743 = vmatprep.mubr.bf16.mxu1 %v10828_v31  ;;  %6775 = vmatpush1.bf16.msra.mxu1 %v9090_v62 }
 0x5b8   : > { %6776 = vmatprep.subr.bf16.mxu1 %v9095_v30 }
 0x5bb   : > { %6777 = vmatpush1.bf16.msra.mxu1 %v9093_v11 }
 0x5bc   : > { %6778 = vmatprep.subr.bf16.mxu1 %v9098_v7 }
 0x5be   : > { %6744 = vmatmul.mubr.bf16.gmra.mrb[4].mxu1 %v10829_v0 }
 0x5bf   : > { %6753 = vmatprep.mubr.bf16.mxu1 %v10830_v33  ;;  %6779 = vmatpush1.bf16.msra.mxu1 %v9096_v24 }
 0x5c0   : > { %6780 = vmatprep.subr.bf16.mxu1 %v9101_v55 }
 0x5c3   : > { %6781 = vmatpush1.bf16.msra.mxu1 %v9099_v22 }
 0x5c4   : > { %6782 = vmatprep.subr.bf16.mxu1 %v9104_v6 }
 0x5c6   : > { %6754 = vmatmul.mubr.bf16.gmra.mrb[8].mxu1 %v10831_v58 }
 0x5c7   : > { %6763 = vmatprep.mubr.bf16.mxu1 %v10832_v45  ;;  %6783 = vmatpush1.bf16.msra.mxu1 %v9102_v25 }
 0x5c8   : > { %6784 = vmatprep.subr.bf16.mxu1 %v9107_v9 }
 0x5cb   : > { %6785 = vmatpush1.bf16.msra.mxu1 %v9105_v35 }
 0x5cc   : > { %6786 = vmatprep.subr.bf16.mxu1 %v9110_v32 }
 0x5ce   : > { %6764 = vmatmul.mubr.bf16.gmra.mrb[12].mxu1 %v10833_v20 }
 0x5cf   : > { %6787 = vmatpush1.bf16.msra.mxu1 %v9108_v59  ;;  %6806 = vmatprep.mubr.bf16.mxu1 %v10371_v13  ;;  %v9126_v13 = vld [vmem:[#allocation8 + $0x8c0] ss:$8 sps:$4 sm:$0xff]  }
 0x5d0   : > { %6788 = vmatprep.subr.bf16.mxu1 %v9113_v42 }
 0x5d3   : > { %6789 = vmatpush1.bf16.msra.mxu1 %v9111_v16 }
 0x5d4   : > { %6790 = vmatprep.subr.bf16.mxu1 %v9116_v51 }
 0x5d7   : > { %6791 = vmatpush1.bf16.msra.mxu1 %v9114_v56 }
 0x5d8   : > { %6792 = vmatprep.subr.bf16.mxu1 %v9119_v23 }
 0x5db   : > { %6793 = vmatpush1.bf16.msra.mxu1 %v9117_v39 }
 0x5dc   : > { %6794 = vmatprep.subr.bf16.mxu1 %v9122_v57 }
 0x5df   : > { %6795 = vmatpush1.bf16.msra.mxu1 %v9120_v46 }
 0x5e0   : > { %6796 = vmatprep.subr.bf16.mxu1 %v9125_v43 }
 0x5e3   : > { %6797 = vmatpush1.bf16.msra.mxu1 %v9123_v61 }
 0x5e4   : > { %6798 = vmatprep.subr.bf16.mxu1 %v9128_v19 }
 0x5e7   : > { %6799 = vmatpush1.bf16.msra.mxu1 %v9126_v13 }
 0x5e8   : > { %6800 = vmatprep.subr.bf16.mxu1 %v9131_v5 }
 0x5eb   : > { %6801 = vmatpush1.bf16.msra.mxu1 %v9129_v40 }
 0x5ec   : > { %6802 = vmatprep.subr.bf16.mxu1 %v9134_v3 }
 0x5ef   : > { %6803 = vmatpush1.bf16.msra.mxu1 %v9132_v4 }
 0x5f0   : > { %6804 = vmatprep.subr.bf16.mxu1 %v9137_v34 }
 0x5f3   : > { %6805 = vmatpush1.bf16.msra.mxu1 %v9135_v38 }
 0x5f6   : > { %6807 = vmatmul.mubr.bf16.vlgmr.msra.gmra.mrb[0].mxu1 %v10375_v36 }
 0x5f7   : > { %6816 = vmatprep.mubr.bf16.mxu1 %v10401_v28 }
 0x5fe   : > { %6817 = vmatmul.mubr.bf16.gmra.mrb[4].mxu1 %v10405_v47 }
 0x5ff   : > { %6826 = vmatprep.mubr.bf16.mxu1 %v10429_v54 }
 0x606   : > { %6827 = vmatmul.mubr.bf16.gmra.mrb[8].mxu1 %v10433_v52 }
 0x607   : > { %6836 = vmatprep.mubr.bf16.mxu1 %v10834_v27 }
 0x60e   : > { %6837 = vmatmul.mubr.bf16.gmra.mrb[12].mxu1 %v10835_v21 }
 0x6c9   : > { %v10582_v41 = vpop.f32.mrb[0].mxu1 }
 0x6ca   : > { %v10584_v44 = vpop.f32.mrb[1].mxu1  ;;  %v6889_v28 = vmul.f32 %v10582_v41, %v10582_v41 }
 0x6cb   : > { %v10586_v36 = vpop.f32.mrb[2].mxu1  ;;  %v6890_v1 = vmul.f32 %v10584_v44, %v10584_v44 }
 0x6cc   : > { %v6863_v52 = vadd.f32 %v10586_v36, %v10582_v41  ;;  %v6891_v54 = vmul.f32 %v10586_v36, %v10586_v36  ;;  %v10594_v47 = vpop.f32.mrb[3].mxu1 }
 0x6cd   : > { %v6876_v60 = vadd.f32 %v10594_v47, %v10584_v44  ;;  %v6892_v10 = vmul.f32 %v10594_v47, %v10594_v47 }
 0x6ce   : > { %v6905_v53 = vadd.f32 %v6891_v54, %v6889_v28 }
 0x6cf   : > { %v6918_v2 = vadd.f32 %v6892_v10, %v6890_v1 }
 0x6d1   : > { %v10602_v49 = vpop.f32.mrb[4].mxu1 }
 0x6d2   : > { %v6864_v50 = vadd.f32 %v6863_v52, %v10602_v49  ;;  %v6893_v14 = vmul.f32 %v10602_v49, %v10602_v49  ;;  %v10607_v18 = vpop.f32.mrb[5].mxu1 }
 0x6d3   : > { %v6877_v37 = vadd.f32 %v6876_v60, %v10607_v18  ;;  %v6894_v63 = vmul.f32 %v10607_v18, %v10607_v18  ;;  %v10612_v17 = vpop.f32.mrb[6].mxu1 }
 0x6d4   : > { %v6906_v12 = vadd.f32 %v6905_v53, %v6893_v14  ;;  %v6865_v48 = vadd.f32 %v6864_v50, %v10612_v17  ;;  %v6895_v26 = vmul.f32 %v10612_v17, %v10612_v17  ;;  %v10617_v29 = vpop.f32.mrb[7].mxu1 }
 0x6d5   : > { %v6919_v15 = vadd.f32 %v6918_v2, %v6894_v63  ;;  %v6878_v62 = vadd.f32 %v6877_v37, %v10617_v29  ;;  %v6896_v30 = vmul.f32 %v10617_v29, %v10617_v29 }
 0x6d6   : > { %v6907_v8 = vadd.f32 %v6906_v12, %v6895_v26 }
 0x6d7   : > { %v6920_v31 = vadd.f32 %v6919_v15, %v6896_v30 }
 0x6d9   : > { %v10622_v11 = vpop.f32.mrb[8].mxu1 }
 0x6da   : > { %v6866_v7 = vadd.f32 %v6865_v48, %v10622_v11  ;;  %v6897_v24 = vmul.f32 %v10622_v11, %v10622_v11  ;;  %v10627_v55 = vpop.f32.mrb[9].mxu1 }
 0x6db   : > { %v6879_v0 = vadd.f32 %v6878_v62, %v10627_v55  ;;  %v6898_v33 = vmul.f32 %v10627_v55, %v10627_v55  ;;  %v10632_v22 = vpop.f32.mrb[10].mxu1 }
 0x6dc   : > { %v6908_v6 = vadd.f32 %v6907_v8, %v6897_v24  ;;  %v6867_v25 = vadd.f32 %v6866_v7, %v10632_v22  ;;  %v6899_v9 = vmul.f32 %v10632_v22, %v10632_v22  ;;  %v10637_v58 = vpop.f32.mrb[11].mxu1 }
 0x6dd   : > { %v6921_v45 = vadd.f32 %v6920_v31, %v6898_v33  ;;  %v6880_v35 = vadd.f32 %v6879_v0, %v10637_v58  ;;  %v6900_v32 = vmul.f32 %v10637_v58, %v10637_v58 }
 0x6de   : > { %v6909_v59 = vadd.f32 %v6908_v6, %v6899_v9 }
 0x6df   : > { %v6922_v42 = vadd.f32 %v6921_v45, %v6900_v32 }
 0x6e1   : > { %v10642_v20 = vpop.f32.mrb[12].mxu1 }
 0x6e2   : > { %v6868_v16 = vadd.f32 %v6867_v25, %v10642_v20  ;;  %v6901_v51 = vmul.f32 %v10642_v20, %v10642_v20  ;;  %v10647_v56 = vpop.f32.mrb[13].mxu1 }
 0x6e3   : > { %v6881_v23 = vadd.f32 %v6880_v35, %v10647_v56  ;;  %v6902_v39 = vmul.f32 %v10647_v56, %v10647_v56  ;;  %v10652_v57 = vpop.f32.mrb[14].mxu1 }
 0x6e4   : > { %v6910_v46 = vadd.f32 %v6909_v59, %v6901_v51  ;;  %v6869_v43 = vadd.f32 %v6868_v16, %v10652_v57  ;;  %v6903_v61 = vmul.f32 %v10652_v57, %v10652_v57  ;;  %v10657_v19 = vpop.f32.mrb[15].mxu1 }
 0x6e5   : > { %v6923_v13 = vadd.f32 %v6922_v42, %v6902_v39  ;;  %v6882_v5 = vadd.f32 %v6881_v23, %v10657_v19  ;;  %v6904_v40 = vmul.f32 %v10657_v19, %v10657_v19 }
 0x6e6   : > { %v6870_v3 = vrot.slane %v6869_v43, 4  ;;  %v6911_v4 = vadd.f32 %v6910_v46, %v6903_v61  ;;  %v6977_v46 = vld [vmem:[%s9532_s30] sm:$0xff] }
 0x6e7   : > { %v6883_v34 = vrot.slane %v6882_v5, 4  ;;  %v6924_v38 = vadd.f32 %v6923_v13, %v6904_v40  ;;  %v6981_v61 = vld [vmem:[%s9532_s30 + $0x20] sm:$0xff] }
 0x6e8   : > { %v6871_v27 = vadd.f32 %v6870_v3, %v6869_v43  ;;  %v6912_v21 = vrot.slane %v6911_v4, 4  ;;  %v6985_v13 = vld [vmem:[%s9532_s30 + $0x40] sm:$0xff]  ;;  %v6987_v3 = vld [vmem:[%s9532_s30 + $0x50] sm:$0xff] }
 0x6e9   : > { %v6884_v28 = vadd.f32 %v6883_v34, %v6882_v5  ;;  %v6925_v52 = vrot.slane %v6924_v38, 4  ;;  %v6991_v34 = vld [vmem:[%s9532_s30 + $0x70] sm:$0xff] }
 0x6ea   : > { %v6872_v54 = vrot.slane %v6871_v27, 2  ;;  %v6913_v1 = vadd.f32 %v6912_v21, %v6911_v4  ;;  %v6989_v4 = vld [vmem:[%s9532_s30 + $0x60] sm:$0xff] }
 0x6eb   : > { %v6885_v60 = vrot.slane %v6884_v28, 2  ;;  %v6926_v10 = vadd.f32 %v6925_v52, %v6924_v38 }
 0x6ec   : > { %v6873_v53 = vadd.f32 %v6872_v54, %v6871_v27  ;;  %v6914_v2 = vrot.slane %v6913_v1, 2 }
 0x6ed   : > { %v6886_v50 = vadd.f32 %v6885_v60, %v6884_v28  ;;  %v6927_v14 = vrot.slane %v6926_v10, 2 }
 0x6ee   : > { %v6874_v37 = vrot.slane %v6873_v53, 1  ;;  %v6915_v63 = vadd.f32 %v6914_v2, %v6913_v1  ;;  %v6980_v2 = vld [vmem:[%s9532_s30 + $0x18] sm:$0xff] }
 0x6ef   : > { %v6887_v12 = vrot.slane %v6886_v50, 1  ;;  %v6928_v48 = vadd.f32 %v6927_v14, %v6926_v10 }
 0x6f0   : > { %v6875_v26 = vadd.f32 %v6874_v37, %v6873_v53  ;;  %v6916_v15 = vrot.slane %v6915_v63, 1  ;;  %v6978_v53 = vld [vmem:[%s9532_s30 + $0x8] sm:$0xff] }
 0x6f1   : > { %v6888_v62 = vadd.f32 %v6887_v12, %v6886_v50  ;;  %v6929_v30 = vrot.slane %v6928_v48, 1  ;;  %v6982_v12 = vld [vmem:[%s9532_s30 + $0x28] sm:$0xff] }
 0x6f2   : > { %v6917_v8 = vadd.f32 %v6916_v15, %v6915_v63  ;;  %v6931_v31 = vmul.f32 0.015625, %v6875_v26  ;;  %v6986_v26 = vld [vmem:[%s9532_s30 + $0x48] sm:$0xff] }
 0x6f3   : > { %v6930_v7 = vadd.f32 %v6929_v30, %v6928_v48  ;;  %v10662_v24 = vmul.f32 0.015625, %v6888_v62  ;;  %v6984_v48 = vld [vmem:[%s9532_s30 + $0x38] sm:$0xff] }
 0x6f4   : > { %v6933_v0 = vmul.f32 0.015625, %v6917_v8  ;;  %v6935_v33 = vmul.f32 %v6931_v31, %v6931_v31  ;;  %v6941_v6 = vsub.f32 %v10582_v41, %v6931_v31  ;;  %v6943_v25 = vsub.f32 %v10586_v36, %v6931_v31 }
 0x6f5   : > { %v6945_v9 = vsub.f32 %v10602_v49, %v6931_v31  ;;  %v6947_v45 = vsub.f32 %v10612_v17, %v6931_v31  ;;  %v6949_v35 = vsub.f32 %v10622_v11, %v6931_v31  ;;  %v6951_v32 = vsub.f32 %v10632_v22, %v6931_v31 }
 0x6f6   : > { %v6937_v59 = vsub.f32 %v6933_v0, %v6935_v33  ;;  %v6953_v42 = vsub.f32 %v10642_v20, %v6931_v31  ;;  %v6955_v16 = vsub.f32 %v10652_v57, %v6931_v31  ;;  %v6934_v51 = vmul.f32 0.015625, %v6930_v7  ;;  %v6988_v31 = vld [vmem:[%s9532_s30 + $0x58] sm:$0xff]  ;;  %v6990_v7 = vld [vmem:[%s9532_s30 + $0x68] sm:$0xff] }
 0x6f7   : > { %v6936_v23 = vmul.f32 %v10662_v24, %v10662_v24  ;;  %v6942_v41 = vsub.f32 %v10584_v44, %v10662_v24  ;;  %v6944_v36 = vsub.f32 %v10594_v47, %v10662_v24  ;;  %v6946_v49 = vsub.f32 %v10607_v18, %v10662_v24 }
 0x6f8   : > { %v6939_v17 = vmax.f32 %v6937_v59, 0.0  ;;  %v6948_v11 = vsub.f32 %v10617_v29, %v10662_v24  ;;  %v6950_v22 = vsub.f32 %v10627_v55, %v10662_v24  ;;  %v6952_v44 = vsub.f32 %v10637_v58, %v10662_v24  ;;  %v6979_v55 = vld [vmem:[%s9532_s30 + $0x10] sm:$0xff] }
 0x6f9   : > { %v6938_v20 = vsub.f32 %v6934_v51, %v6936_v23  ;;  %v6954_v47 = vsub.f32 %v10647_v56, %v10662_v24  ;;  %v6956_v18 = vsub.f32 %v10657_v19, %v10662_v24  ;;  %v6983_v58 = vld [vmem:[%s9532_s30 + $0x30] sm:$0xff]  ;;  %v6992_v24 = vld [vmem:[%s9532_s30 + $0x78] sm:$0xff] }
 0x6fa   : > { %v6957_v39 = vadd.f32 1e-05, %v6939_v17 }
 0x6fb   : > { %v6940_v57 = vmax.f32 %v6938_v20, 0.0 }
 0x6fc   : > { %9142 = vrsqrt.f32 %v6957_v39 }
 0x6fd   : > { %v6958_v29 = vadd.f32 1e-05, %v6940_v57 }
 0x6ff   : > { %9144 = vrsqrt.f32 %v6958_v29 }
 0x706   : > { %v9143_v43 = vpop.eup %9142 }
 0x707   : > { %v6961_v5 = vmul.f32 %v9143_v43, %v6941_v6  ;;  %v6963_v56 = vmul.f32 %v9143_v43, %v6943_v25  ;;  %v6965_v40 = vmul.f32 %v9143_v43, %v6945_v9  ;;  %v6967_v19 = vmul.f32 %v9143_v43, %v6947_v45 }
 0x708   : > { %v6969_v38 = vmul.f32 %v9143_v43, %v6949_v35  ;;  %v6971_v27 = vmul.f32 %v9143_v43, %v6951_v32  ;;  %v6973_v21 = vmul.f32 %v9143_v43, %v6953_v42  ;;  %v6975_v28 = vmul.f32 %v9143_v43, %v6955_v16 }
 0x709   : > { %v9145_v52 = vpop.eup %9144  ;;  %v6993_v54 = vadd.f32 %v6977_v46, %v6961_v5  ;;  %v6995_v1 = vadd.f32 %v6979_v55, %v6963_v56  ;;  %v6997_v60 = vadd.f32 %v6981_v61, %v6965_v40  ;;  %v6999_v10 = vadd.f32 %v6983_v58, %v6967_v19 }
 0x70a   : > { %v7001_v50 = vadd.f32 %v6985_v13, %v6969_v38  ;;  %v7003_v14 = vadd.f32 %v6987_v3, %v6971_v27  ;;  %v7005_v37 = vadd.f32 %v6989_v4, %v6973_v21  ;;  %v7007_v63 = vadd.f32 %v6991_v34, %v6975_v28 }
 0x70b   : > { %7009 = vst [vmem:[%s10706_s20] sm:$0xff] %v6993_v54  ;;  %7011 = vst [vmem:[%s10706_s20 + $0x10] sm:$0xff] %v6995_v1  ;;  %v6962_v15 = vmul.f32 %v9145_v52, %v6942_v41  ;;  %v6964_v62 = vmul.f32 %v9145_v52, %v6944_v36  ;;  %v6966_v30 = vmul.f32 %v9145_v52, %v6946_v49 }
 0x70c   : > { %7013 = vst [vmem:[%s10706_s20 + $0x20] sm:$0xff] %v6997_v60  ;;  %7015 = vst [vmem:[%s10706_s20 + $0x30] sm:$0xff] %v6999_v10  ;;  %v6968_v8 = vmul.f32 %v9145_v52, %v6948_v11  ;;  %v6970_v0 = vmul.f32 %v9145_v52, %v6950_v22  ;;  %v6972_v33 = vmul.f32 %v9145_v52, %v6952_v44 }
 0x70d   : > { %7017 = vst [vmem:[%s10706_s20 + $0x40] sm:$0xff] %v7001_v50  ;;  %7019 = vst [vmem:[%s10706_s20 + $0x50] sm:$0xff] %v7003_v14  ;;  %v6974_v6 = vmul.f32 %v9145_v52, %v6954_v47  ;;  %v6976_v25 = vmul.f32 %v9145_v52, %v6956_v18  ;;  %v6994_v9 = vadd.f32 %v6978_v53, %v6962_v15 }
 0x70e   : > { %7021 = vst [vmem:[%s10706_s20 + $0x60] sm:$0xff] %v7005_v37  ;;  %7023 = vst [vmem:[%s10706_s20 + $0x70] sm:$0xff] %v7007_v63  ;;  %v6996_v45 = vadd.f32 %v6980_v2, %v6964_v62  ;;  %v6998_v35 = vadd.f32 %v6982_v12, %v6966_v30  ;;  %v7000_v32 = vadd.f32 %v6984_v48, %v6968_v8 }
 0x70f   : > { %v7002_v59 = vadd.f32 %v6986_v26, %v6970_v0  ;;  %v7004_v42 = vadd.f32 %v6988_v31, %v6972_v33  ;;  %v7006_v16 = vadd.f32 %v6990_v7, %v6974_v6  ;;  %v7008_v51 = vadd.f32 %v6992_v24, %v6976_v25  ;;  %7010 = vst [vmem:[%s10706_s20 + $0x8] sm:$0xff] %v6994_v9 }
 0x710   : > { %7012 = vst [vmem:[%s10706_s20 + $0x18] sm:$0xff] %v6996_v45  ;;  %7014 = vst [vmem:[%s10706_s20 + $0x28] sm:$0xff] %v6998_v35 }
 0x711   : > { %7016 = vst [vmem:[%s10706_s20 + $0x38] sm:$0xff] %v7000_v32  ;;  %7018 = vst [vmem:[%s10706_s20 + $0x48] sm:$0xff] %v7002_v59 }
 0x712   : > { %7020 = vst [vmem:[%s10706_s20 + $0x58] sm:$0xff] %v7004_v42  ;;  %7022 = vst [vmem:[%s10706_s20 + $0x68] sm:$0xff] %v7006_v16 }
 0x713   : > { %7024 = vst [vmem:[%s10706_s20 + $0x78] sm:$0xff] %v7008_v51 }
 0x714   : > { %9265 = shalt.err (!%p9262_p2)
}
 0x715   : > { %s9266_s25 = scalar_lea.hbm %s10723_s26, 2048  ;;  %s9270_s21 = scalar_lea.hbm %s10780_s3, 4096 }
 0x716   : > { %p9267_p13 = scmp.ne.s32.totalorder %s10723_s26, %s9266_s25  ;;  %p9271_p4 = scmp.lt.u32.totalorder %s10723_s26, %s10780_s3 }
 0x717   : > { %p9272_p5 = scmp.lt.u32.totalorder %s9270_s21, %s9266_s25  ;;  %p9274_p11 = scmp.lt.u32.totalorder %s9266_s25, %s10723_s26 }
 0x718   : > { %p9268_p6 = pnand %p9267_p13, %p10836_p0 }
 0x719   : > { %p9273_p8 = por %p9272_p5, %p9271_p4 }
 0x71a   : > { %p9269_p10 = pneg %p9268_p6 }
 0x71b   : > { %p9275_p1 = por %p9274_p11, %p9273_p8 }
 0x71d   : > { %p9276_p3 = pnand %p9275_p1, %p9269_p10 }
 0x71f   : > { %9279 = shalt.err (!%p9276_p3)
}
 0x720   : > { %s9332_s30 = smov 256   ;;  %s9333_s18 = smov 16  }
 0x721   : > { %8193 = dma.vmem_to_hbm [thread:$0]  (%p10836_p0), %s10725_s17, 2048, %s10723_s26, %s7026_s27, %s9332_s30, %s9332_s30, %s9333_s18  }
 0x722 PF: > { %s7054_s20 = sand.u32 1, %s9310_s12   ;;  %p10837_p7 = scmp.ne.s32.totalorder %s10785_s19, 0 }
 0x723   : > { %p10838_p9 = scmp.ge.s32.totalorder %s9322_s15, 2  ;;  %s7055_s16 = scalar_lea.sflag [#allocation5], %s7054_s20 }
 0x725   : > { %p8207_p12 = pnand %p10838_p9, %p10837_p7 }
 0x727   : > { %9305 = dma.done.wait (!%p8207_p12), %s7055_s16, 2048  }
 0x728   : > { %9307 = vsyncadd (!%p8207_p12), %s7055_s16, 4294965248  ;;  %p17_p2 = scmp.ge.s32.totalorder %s9464_s4, 4   ;;  %s10839_s12 = smov %s9314_s13 }
 0x729   : > { %s10840_s13 = smov %s9318_s14  ;;  %s10841_s14 = smov %s9480_s9 }
 0x72a   : > { %s10842_s15 = smov %s9464_s4  ;;  %19 = sbr.rel (!%p17_p2) target bundleno = 6 (0x6), region = 91 }
 0x731   :  { %7060 = vsyncpa [#allocation4], 1 }
 0x732   :  { %7062 = vsyncpa [#allocation4 + $0x1], 1 }
 0x733   :  { %7063 = vsyncpa [#allocation7], 1 }
 0x734   :  { %7064 = vsyncpa [#allocation5], 1 }
 0x735   :  { %7066 = vsyncpa [#allocation5 + $0x1], 1 }

</bundles_post_ra>
